<compile_context>
chip_gen: v5e
topology: v5e:2x2
jax: 0.10.0
libtpu: 0.0.40
codegen_flags: <defaults>
</compile_context>

<pallas_src>
import functools

import jax
import jax.numpy as jnp
from jax.experimental import pallas as pl
from jax.experimental.pallas import tpu as pltpu

EPS = 1e-5  # PyTorch BatchNorm2d default eps


def _compiler_params():
    return pltpu.CompilerParams(
        dimension_semantics=("parallel", "parallel"),
        vmem_limit_bytes=32 * 1024 * 1024,
    )


def _divisor_tile(extent, target):
    """Largest divisor of `extent` that is <= target (and >= 1)."""
    t = max(1, min(target, extent))
    while extent % t:
        t -= 1
    return t


def _conv_row_tile(hout, wout, cout):
    """Rows per conv tile: big patch-matrix M, bounded f32 output block."""
    by_m = max(1, 2048 // max(wout, 1))                      # M ~ 2K rows
    by_vmem = max(1, (4 * 1024 * 1024) // max(1, wout * cout * 4))
    return _divisor_tile(hout, max(8, min(by_m, by_vmem)))


def _ew_row_tile(rows, wout, c):
    """Rows per elementwise/resample tile within a ~2 MiB block budget."""
    by_vmem = max(1, (2 * 1024 * 1024) // max(1, wout * c * 4))
    return _divisor_tile(rows, max(4, by_vmem))


# ---------------------------------------------------------------------------
# Pallas kernels
# ---------------------------------------------------------------------------
def _conv_taps(xp_ref, w_ref, row_tile, wimg):
    """3x3 conv as 9 accumulated shifted matmuls over a VMEM-resident padded
    image (bf16 operands, f32 accumulation)."""
    cin = xp_ref.shape[-1]
    cout = w_ref.shape[-1]
    r = pl.program_id(1)
    start = pl.multiple_of(r * row_tile, row_tile)
    # (row_tile + 2, wimg + 2, cin) halo'd slab of the resident padded image.
    slab = xp_ref[0, pl.ds(start, row_tile + 2), :, :]
    acc = jnp.zeros((row_tile * wimg, cout), jnp.float32)
    for kh in range(3):
        for kw in range(3):
            xk = slab[kh:kh + row_tile, kw:kw + wimg, :]
            xk = xk.reshape(row_tile * wimg, cin).astype(jnp.bfloat16)
            acc = acc + jnp.dot(xk, w_ref[kh * 3 + kw],
                                preferred_element_type=jnp.float32)
    return acc


def _conv_bias_stats_kernel(xp_ref, w_ref, b_ref, y_ref, s_ref, *,
                            row_tile, wimg):
    """conv3x3 + bias; writes pre-BN activations + per-tile (sum, sumsq)."""
    y = _conv_taps(xp_ref, w_ref, row_tile, wimg) + b_ref[...]
    s0 = jnp.sum(y, axis=0, keepdims=True)
    s1 = jnp.sum(y * y, axis=0, keepdims=True)
    s_ref[0, 0] = jnp.concatenate([s0, s1], axis=0)
    y_ref[0] = y.reshape(row_tile, wimg, y.shape[-1])


def _conv_bias_tanh_kernel(xp_ref, w_ref, b_ref, o_ref, *, row_tile, wimg):
    """conv3x3 + bias + tanh (final decoder conv)."""
    y = jnp.tanh(_conv_taps(xp_ref, w_ref, row_tile, wimg) + b_ref[...])
    # TODO(synk): the 3-channel output still stores 3 of 128 lanes (masked vst);
    # a fully lane-dense (W*3) store needs an in-kernel sublane->lane relayout.
    o_ref[0] = y.reshape(row_tile, wimg, y.shape[-1])


def _bn_relu_pool_kernel(y_ref, sc_ref, sh_ref, o_ref):
    """BN(scale/shift) + ReLU + 2x2 max-pool on a (.., 2, W/2, 2C) view."""
    v = y_ref[0]                                    # (TP, 2, W/2, 2C)
    v = jnp.maximum(v * sc_ref[...] + sh_ref[...], 0.0)
    v = jnp.maximum(v[:, 0], v[:, 1])               # pool over the row pair
    c = v.shape[-1] // 2
    o_ref[0] = jnp.maximum(v[..., :c], v[..., c:])  # pool over the column pair


def _bn_relu_upsample_kernel(y_ref, sc_ref, sh_ref, o_ref):
    """BN(scale/shift) + ReLU fused with nearest 2x upsample.

    Output block is (TP, 2, W/2, 2C): lane-concat duplicates columns, the
    sublane broadcast duplicates rows; a contiguous reshape in the wrapper
    restores (2*TP, W, C).
    """
    v = jnp.maximum(y_ref[0] * sc_ref[...] + sh_ref[...], 0.0)   # (TP, W/2, C)
    vv = jnp.concatenate([v, v], axis=-1)                        # (TP, W/2, 2C)
    o_ref[0] = jnp.broadcast_to(vv[:, None, :, :], o_ref.shape[1:])


# ---------------------------------------------------------------------------
# pallas_call wrappers
# ---------------------------------------------------------------------------
def _conv_bias_stats(xp, w9, b, hout, wout, row_tile):
    n, _, _, cin = xp.shape
    cout = w9.shape[-1]
    r_tiles = hout // row_tile
    kernel = functools.partial(_conv_bias_stats_kernel,
                               row_tile=row_tile, wimg=wout)
    return pl.pallas_call(
        kernel,
        grid=(n, r_tiles),
        in_specs=[
            pl.BlockSpec((1, hout + 2, wout + 2, cin),
                         lambda i, r: (i, 0, 0, 0)),    # image resident over r
            pl.BlockSpec((9, cin, cout), lambda i, r: (0, 0, 0)),  # resident w
            pl.BlockSpec((1, cout), lambda i, r: (0, 0)),          # resident b
        ],
        out_specs=(
            pl.BlockSpec((1, row_tile, wout, cout), lambda i, r: (i, r, 0, 0)),
            pl.BlockSpec((1, 1, 2, cout), lambda i, r: (i, r, 0, 0)),
        ),
        out_shape=(
            jax.ShapeDtypeStruct((n, hout, wout, cout), jnp.float32),
            jax.ShapeDtypeStruct((n, r_tiles, 2, cout), jnp.float32),
        ),
        compiler_params=_compiler_params(),
    )(xp, w9, b)


def _conv_bias_tanh(xp, w9, b, hout, wout, row_tile):
    n, _, _, cin = xp.shape
    cout = w9.shape[-1]
    r_tiles = hout // row_tile
    kernel = functools.partial(_conv_bias_tanh_kernel,
                               row_tile=row_tile, wimg=wout)
    return pl.pallas_call(
        kernel,
        grid=(n, r_tiles),
        in_specs=[
            pl.BlockSpec((1, hout + 2, wout + 2, cin),
                         lambda i, r: (i, 0, 0, 0)),
            pl.BlockSpec((9, cin, cout), lambda i, r: (0, 0, 0)),
            pl.BlockSpec((1, cout), lambda i, r: (0, 0)),
        ],
        out_specs=pl.BlockSpec((1, row_tile, wout, cout),
                               lambda i, r: (i, r, 0, 0)),
        out_shape=jax.ShapeDtypeStruct((n, hout, wout, cout), jnp.float32),
        compiler_params=_compiler_params(),
    )(xp, w9, b)


def _bn_relu_pool(y, scale, shift, row_tile):
    """y: (N, H, W, C) pre-BN activations; returns pooled (N, H/2, W/2, C)."""
    n, h, w, c = y.shape
    yg = y.reshape(n, h // 2, 2, w // 2, 2 * c)     # lane-dense pooled-pair view
    sc = jnp.concatenate([scale, scale]).reshape(1, 2 * c)
    sh = jnp.concatenate([shift, shift]).reshape(1, 2 * c)
    return pl.pallas_call(
        _bn_relu_pool_kernel,
        grid=(n, (h // 2) // row_tile),
        in_specs=[
            pl.BlockSpec((1, row_tile, 2, w // 2, 2 * c),
                         lambda i, r: (i, r, 0, 0, 0)),
            pl.BlockSpec((1, 2 * c), lambda i, r: (0, 0)),
            pl.BlockSpec((1, 2 * c), lambda i, r: (0, 0)),
        ],
        out_specs=pl.BlockSpec((1, row_tile, w // 2, c),
                               lambda i, r: (i, r, 0, 0)),
        out_shape=jax.ShapeDtypeStruct((n, h // 2, w // 2, c), jnp.float32),
        compiler_params=_compiler_params(),
    )(yg, sc, sh)


def _bn_relu_upsample(y, scale, shift, row_tile):
    """y: (N, Hh, Wh, C) pre-BN activations; returns (N, 2*Hh, 2*Wh, C) of
    upsample(relu(bn(y))) without an extra HBM round trip for the small map."""
    n, hh, wh, c = y.shape
    sc = scale.reshape(1, c)
    sh = shift.reshape(1, c)
    out = pl.pallas_call(
        _bn_relu_upsample_kernel,
        grid=(n, hh // row_tile),
        in_specs=[
            pl.BlockSpec((1, row_tile, wh, c), lambda i, r: (i, r, 0, 0)),
            pl.BlockSpec((1, c), lambda i, r: (0, 0)),
            pl.BlockSpec((1, c), lambda i, r: (0, 0)),
        ],
        out_specs=pl.BlockSpec((1, row_tile, 2, wh, 2 * c),
                               lambda i, r: (i, r, 0, 0, 0)),
        out_shape=jax.ShapeDtypeStruct((n, hh, 2, wh, 2 * c), jnp.float32),
        compiler_params=_compiler_params(),
    )(y, sc, sh)
    # (N, Hh, 2, Wh, 2, C) -> (N, 2*Hh, 2*Wh, C): contiguous, no data movement.
    return out.reshape(n, 2 * hh, 2 * wh, c)


# ---------------------------------------------------------------------------
# Glue: batch-statistics reduction, padding, layout transposes
# ---------------------------------------------------------------------------
def _bn_scale_shift(stats, gamma, beta, count):
    """Reduce per-tile (sum, sumsq) -> per-channel BN scale/shift (training)."""
    s = jnp.sum(stats, axis=(0, 1))                 # (2, C)
    mean = s[0] / count
    var = jnp.maximum(s[1] / count - mean * mean, 0.0)
    scale = gamma * jax.lax.rsqrt(var + EPS)
    shift = beta - mean * scale
    return scale, shift


def encoder_decoder_forward(x_nchw, params):
    w1, b1, g1, bt1, w2, b2, g2, bt2, w3, b3 = params
    n, c0, h, w = x_nchw.shape
    assert h % 2 == 0 and w % 8 == 0, "layout assumes H even, W % 8 == 0"

    x = jnp.transpose(x_nchw, (0, 2, 3, 1)).astype(jnp.float32)     # NHWC
    pad = ((0, 0), (1, 1), (1, 1), (0, 0))

    w1q = w1.reshape(9, c0, 64).astype(jnp.bfloat16)
    w2q = w2.reshape(9, 64, 32).astype(jnp.bfloat16)
    w3q = w3.reshape(9, 32, 3).astype(jnp.bfloat16)

    tr1 = _conv_row_tile(h, w, 64)
    tp1 = _ew_row_tile(h // 2, w, 2 * 64)
    tr2 = _conv_row_tile(h // 2, w // 2, 32)
    tp2 = _ew_row_tile(h // 2, w, 2 * 32)
    tr3 = _conv_row_tile(h, w, 3)

    # ---- encoder: Conv2d(3,64,3,1,1) + BN + ReLU + MaxPool2d(2,2) ----
    y1, s1 = _conv_bias_stats(jnp.pad(x, pad), w1q, b1, h, w, tr1)
    sc1, sh1 = _bn_scale_shift(s1, g1, bt1, n * h * w)
    h1 = _bn_relu_pool(y1, sc1, sh1, tp1)                   # (N, H/2, W/2, 64)

    # ---- decoder: Conv2d(64,32,3,1,1) + BN + ReLU + Upsample(x2, nearest) ----
    y2, s2 = _conv_bias_stats(jnp.pad(h1, pad), w2q, b2, h // 2, w // 2, tr2)
    sc2, sh2 = _bn_scale_shift(s2, g2, bt2, n * (h // 2) * (w // 2))
    u = _bn_relu_upsample(y2, sc2, sh2, tp2)                # (N, H, W, 32)

    # ---- decoder: Conv2d(32,3,3,1,1) + Tanh ----
    out = _conv_bias_tanh(jnp.pad(u, pad), w3q, b3, h, w, tr3)
    return jnp.transpose(out, (0, 3, 1, 2))                 # NCHW


# ---------------------------------------------------------------------------
# Deterministic parameter init (synthetic; matches PyTorch shapes)
# ---------------------------------------------------------------------------
def init_params(key):
    ks = jax.random.split(key, 6)
    w1 = 0.10 * jax.random.normal(ks[0], (3, 3, 3, 64), jnp.float32)   # HWIO
    b1 = 0.10 * jax.random.normal(ks[1], (1, 64), jnp.float32)
    g1 = jnp.ones((64,), jnp.float32)     # BN weight default = 1
    bt1 = jnp.zeros((64,), jnp.float32)   # BN bias default = 0
    w2 = 0.05 * jax.random.normal(ks[2], (3, 3, 64, 32), jnp.float32)
    b2 = 0.10 * jax.random.normal(ks[3], (1, 32), jnp.float32)
    g2 = jnp.ones((32,), jnp.float32)
    bt2 = jnp.zeros((32,), jnp.float32)
    w3 = 0.05 * jax.random.normal(ks[4], (3, 3, 32, 3), jnp.float32)
    b3 = 0.10 * jax.random.normal(ks[5], (1, 3), jnp.float32)
    return (w1, b1, g1, bt1, w2, b2, g2, bt2, w3, b3)


# ---------------------------------------------------------------------------
# References for numerical self-checks
# ---------------------------------------------------------------------------
def _conv_ref(x, w, b, bf16_operands, precision=None):
    if bf16_operands:
        x = x.astype(jnp.bfloat16)
        w = w.astype(jnp.bfloat16)
    y = jax.lax.conv_general_dilated(
        x, w, (1, 1), 'SAME',
        dimension_numbers=('NHWC', 'HWIO', 'NHWC'),
        precision=precision,
        preferred_element_type=jnp.float32)
    return y + b


def reference_matched(x_nchw, params):
    """Same numerical recipe as the Pallas path (bf16 conv operands, f32
    accumulation, BN via E[y^2]-E[y]^2) computed with lax.conv -- tight check."""
    w1, b1, g1, bt1, w2, b2, g2, bt2, w3, b3 = params
    x = jnp.transpose(x_nchw, (0, 2, 3, 1)).astype(jnp.float32)

    def bn(y, g, bt):
        m = jnp.mean(y, axis=(0, 1, 2))
        ms = jnp.mean(y * y, axis=(0, 1, 2))
        var = jnp.maximum(ms - m * m, 0.0)
        scale = g * jax.lax.rsqrt(var + EPS)
        return y * scale + (bt - m * scale)

    t = jax.nn.relu(bn(_conv_ref(x, w1, b1, True), g1, bt1))
    n, hh, ww, c = t.shape
    t = jnp.max(t.reshape(n, hh // 2, 2, ww // 2, 2, c), axis=(2, 4))
    t = jax.nn.relu(bn(_conv_ref(t, w2, b2, True), g2, bt2))
    t = jnp.repeat(jnp.repeat(t, 2, axis=1), 2, axis=2)
    t = jnp.tanh(_conv_ref(t, w3, b3, True))
    return jnp.transpose(t, (0, 3, 1, 2))


def reference_fp32(x_nchw, params):
    """Full-f32, HIGHEST-precision reference of the module's true semantics."""
    w1, b1, g1, bt1, w2, b2, g2, bt2, w3, b3 = params
    x = jnp.transpose(x_nchw, (0, 2, 3, 1)).astype(jnp.float32)

    def bn(y, g, bt):
        m = jnp.mean(y, axis=(0, 1, 2), keepdims=True)
        v = jnp.mean(jnp.square(y - m), axis=(0, 1, 2), keepdims=True)
        return (y - m) * jax.lax.rsqrt(v + EPS) * g + bt

    hp = jax.lax.Precision.HIGHEST
    t = jax.nn.relu(bn(_conv_ref(x, w1, b1, False, hp), g1, bt1))
    n, hh, ww, c = t.shape
    t = jnp.max(t.reshape(n, hh // 2, 2, ww // 2, 2, c), axis=(2, 4))
    t = jax.nn.relu(bn(_conv_ref(t, w2, b2, False, hp), g2, bt2))
    t = jnp.repeat(jnp.repeat(t, 2, axis=1), 2, axis=2)
    t = jnp.tanh(_conv_ref(t, w3, b3, False, hp))
    return jnp.transpose(t, (0, 3, 1, 2))


if __name__ == "__main__":
    key = jax.random.PRNGKey(0)
    pkey, xkey = jax.random.split(key)
    params = init_params(pkey)
    x = jax.random.normal(xkey, (2, 3, 16, 16), jnp.float32)   # NCHW like PyTorch

    out = jax.block_until_ready(jax.jit(encoder_decoder_forward)(x, params))
    assert out.shape == (2, 3, 16, 16), out.shape

    # Tight check against a lax.conv reference using the same bf16-operand /
    # f32-accumulate recipe (validates patches, BN stats, pool, upsample, tanh).
    ref_m = reference_matched(x, params)
    err_m = float(jnp.max(jnp.abs(out - ref_m)))
    assert jnp.allclose(out, ref_m, atol=1e-3, rtol=1e-3), f"matched err={err_m}"

    # Loose sanity check against the full-f32 HIGHEST-precision semantics
    # (bounds the intentional bf16-operand quantization error).
    ref_f = reference_fp32(x, params)
    err_f = float(jnp.max(jnp.abs(out - ref_f)))
    assert err_f < 5e-2, f"fp32 ref err={err_f}"

    print("KERNEL_OK")
</pallas_src>

<mosaic_0001>
module attributes {stable_mosaic.version = 11 : i64} {
  func.func @_conv_bias_stats_kernel(%arg0: i32, %arg1: i32, %arg2: memref<1x18x18x3xf32, #tpu.memory_space<vmem>>, %arg3: memref<9x3x64xbf16, #tpu.memory_space<vmem>>, %arg4: memref<1x64xf32, #tpu.memory_space<vmem>>, %arg5: memref<1x16x16x64xf32, #tpu.memory_space<vmem>>, %arg6: memref<1x1x2x64xf32, #tpu.memory_space<vmem>>) attributes {dimension_semantics = [#tpu.dimension_semantics<parallel>, #tpu.dimension_semantics<parallel>], iteration_bounds = array<i64: 2, 1>, scalar_prefetch = 0 : i64, scratch_operands = 0 : i64, tpu.core_type = #tpu.core_type<tc>, window_params = [{transform_indices = @transform_0, window_bounds = array<i64: 1, 18, 18, 3>}, {pipeline_mode = #tpu.pipeline_mode<synchronous>, transform_indices = @transform_1, window_bounds = array<i64: 9, 3, 64>}, {pipeline_mode = #tpu.pipeline_mode<synchronous>, transform_indices = @transform_2, window_bounds = array<i64: 1, 64>}, {transform_indices = @transform_3, window_bounds = array<i64: 1, 16, 16, 64>}, {transform_indices = @transform_4, window_bounds = array<i64: 1, 1, 2, 64>}]} {
    %c16_i32 = arith.constant 16 : i32
    %0 = arith.muli %arg1, %c16_i32 : i32
    %1 = tpu.assume_multiple %0, 16 : i32
    %c0 = arith.constant 0 : index
    %2 = arith.index_cast %1 : i32 to index
    %c0_0 = arith.constant 0 : index
    %c0_1 = arith.constant 0 : index
    %3 = vector.load %arg2[%c0, %2, %c0_0, %c0_1] : memref<1x18x18x3xf32, #tpu.memory_space<vmem>>, vector<1x18x18x3xf32>
    %4 = vector.shape_cast %3 : vector<1x18x18x3xf32> to vector<18x18x3xf32>
    %cst = arith.constant 0.000000e+00 : f32
    %5 = vector.broadcast %cst : f32 to vector<256x64xf32>
    %6 = vector.extract_strided_slice %4 {offsets = [0, 0, 0], sizes = [16, 16, 3], strides = [1, 1, 1]} : vector<18x18x3xf32> to vector<16x16x3xf32>
    %7 = vector.shape_cast %6 : vector<16x16x3xf32> to vector<256x3xf32>
    %8 = arith.truncf %7 : vector<256x3xf32> to vector<256x3xbf16>
    %c0_2 = arith.constant 0 : index
    %c0_3 = arith.constant 0 : index
    %c0_4 = arith.constant 0 : index
    %9 = vector.load %arg3[%c0_2, %c0_3, %c0_4] : memref<9x3x64xbf16, #tpu.memory_space<vmem>>, vector<1x3x64xbf16>
    %10 = vector.shape_cast %9 : vector<1x3x64xbf16> to vector<3x64xbf16>
    %cst_5 = arith.constant dense<0.000000e+00> : vector<256x64xf32>
    %11 = tpu.matmul %8, %10, %cst_5 {dimension_numbers = #tpu.dot_dimension_numbers<[1], [0], [0], [1], [0, 0, 1, 1], [], []>} : vector<256x3xbf16>, vector<3x64xbf16>, vector<256x64xf32> -> vector<256x64xf32>
    %12 = arith.addf %5, %11 : vector<256x64xf32>
    %13 = vector.extract_strided_slice %4 {offsets = [0, 1, 0], sizes = [16, 16, 3], strides = [1, 1, 1]} : vector<18x18x3xf32> to vector<16x16x3xf32>
    %14 = vector.shape_cast %13 : vector<16x16x3xf32> to vector<256x3xf32>
    %15 = arith.truncf %14 : vector<256x3xf32> to vector<256x3xbf16>
    %c1 = arith.constant 1 : index
    %c0_6 = arith.constant 0 : index
    %c0_7 = arith.constant 0 : index
    %16 = vector.load %arg3[%c1, %c0_6, %c0_7] : memref<9x3x64xbf16, #tpu.memory_space<vmem>>, vector<1x3x64xbf16>
    %17 = vector.shape_cast %16 : vector<1x3x64xbf16> to vector<3x64xbf16>
    %cst_8 = arith.constant dense<0.000000e+00> : vector<256x64xf32>
    %18 = tpu.matmul %15, %17, %cst_8 {dimension_numbers = #tpu.dot_dimension_numbers<[1], [0], [0], [1], [0, 0, 1, 1], [], []>} : vector<256x3xbf16>, vector<3x64xbf16>, vector<256x64xf32> -> vector<256x64xf32>
    %19 = arith.addf %12, %18 : vector<256x64xf32>
    %20 = vector.extract_strided_slice %4 {offsets = [0, 2, 0], sizes = [16, 16, 3], strides = [1, 1, 1]} : vector<18x18x3xf32> to vector<16x16x3xf32>
    %21 = vector.shape_cast %20 : vector<16x16x3xf32> to vector<256x3xf32>
    %22 = arith.truncf %21 : vector<256x3xf32> to vector<256x3xbf16>
    %c2 = arith.constant 2 : index
    %c0_9 = arith.constant 0 : index
    %c0_10 = arith.constant 0 : index
    %23 = vector.load %arg3[%c2, %c0_9, %c0_10] : memref<9x3x64xbf16, #tpu.memory_space<vmem>>, vector<1x3x64xbf16>
    %24 = vector.shape_cast %23 : vector<1x3x64xbf16> to vector<3x64xbf16>
    %cst_11 = arith.constant dense<0.000000e+00> : vector<256x64xf32>
    %25 = tpu.matmul %22, %24, %cst_11 {dimension_numbers = #tpu.dot_dimension_numbers<[1], [0], [0], [1], [0, 0, 1, 1], [], []>} : vector<256x3xbf16>, vector<3x64xbf16>, vector<256x64xf32> -> vector<256x64xf32>
    %26 = arith.addf %19, %25 : vector<256x64xf32>
    %27 = vector.extract_strided_slice %4 {offsets = [1, 0, 0], sizes = [16, 16, 3], strides = [1, 1, 1]} : vector<18x18x3xf32> to vector<16x16x3xf32>
    %28 = vector.shape_cast %27 : vector<16x16x3xf32> to vector<256x3xf32>
    %29 = arith.truncf %28 : vector<256x3xf32> to vector<256x3xbf16>
    %c3 = arith.constant 3 : index
    %c0_12 = arith.constant 0 : index
    %c0_13 = arith.constant 0 : index
    %30 = vector.load %arg3[%c3, %c0_12, %c0_13] : memref<9x3x64xbf16, #tpu.memory_space<vmem>>, vector<1x3x64xbf16>
    %31 = vector.shape_cast %30 : vector<1x3x64xbf16> to vector<3x64xbf16>
    %cst_14 = arith.constant dense<0.000000e+00> : vector<256x64xf32>
    %32 = tpu.matmul %29, %31, %cst_14 {dimension_numbers = #tpu.dot_dimension_numbers<[1], [0], [0], [1], [0, 0, 1, 1], [], []>} : vector<256x3xbf16>, vector<3x64xbf16>, vector<256x64xf32> -> vector<256x64xf32>
    %33 = arith.addf %26, %32 : vector<256x64xf32>
    %34 = vector.extract_strided_slice %4 {offsets = [1, 1, 0], sizes = [16, 16, 3], strides = [1, 1, 1]} : vector<18x18x3xf32> to vector<16x16x3xf32>
    %35 = vector.shape_cast %34 : vector<16x16x3xf32> to vector<256x3xf32>
    %36 = arith.truncf %35 : vector<256x3xf32> to vector<256x3xbf16>
    %c4 = arith.constant 4 : index
    %c0_15 = arith.constant 0 : index
    %c0_16 = arith.constant 0 : index
    %37 = vector.load %arg3[%c4, %c0_15, %c0_16] : memref<9x3x64xbf16, #tpu.memory_space<vmem>>, vector<1x3x64xbf16>
    %38 = vector.shape_cast %37 : vector<1x3x64xbf16> to vector<3x64xbf16>
    %cst_17 = arith.constant dense<0.000000e+00> : vector<256x64xf32>
    %39 = tpu.matmul %36, %38, %cst_17 {dimension_numbers = #tpu.dot_dimension_numbers<[1], [0], [0], [1], [0, 0, 1, 1], [], []>} : vector<256x3xbf16>, vector<3x64xbf16>, vector<256x64xf32> -> vector<256x64xf32>
    %40 = arith.addf %33, %39 : vector<256x64xf32>
    %41 = vector.extract_strided_slice %4 {offsets = [1, 2, 0], sizes = [16, 16, 3], strides = [1, 1, 1]} : vector<18x18x3xf32> to vector<16x16x3xf32>
    %42 = vector.shape_cast %41 : vector<16x16x3xf32> to vector<256x3xf32>
    %43 = arith.truncf %42 : vector<256x3xf32> to vector<256x3xbf16>
    %c5 = arith.constant 5 : index
    %c0_18 = arith.constant 0 : index
    %c0_19 = arith.constant 0 : index
    %44 = vector.load %arg3[%c5, %c0_18, %c0_19] : memref<9x3x64xbf16, #tpu.memory_space<vmem>>, vector<1x3x64xbf16>
    %45 = vector.shape_cast %44 : vector<1x3x64xbf16> to vector<3x64xbf16>
    %cst_20 = arith.constant dense<0.000000e+00> : vector<256x64xf32>
    %46 = tpu.matmul %43, %45, %cst_20 {dimension_numbers = #tpu.dot_dimension_numbers<[1], [0], [0], [1], [0, 0, 1, 1], [], []>} : vector<256x3xbf16>, vector<3x64xbf16>, vector<256x64xf32> -> vector<256x64xf32>
    %47 = arith.addf %40, %46 : vector<256x64xf32>
    %48 = vector.extract_strided_slice %4 {offsets = [2, 0, 0], sizes = [16, 16, 3], strides = [1, 1, 1]} : vector<18x18x3xf32> to vector<16x16x3xf32>
    %49 = vector.shape_cast %48 : vector<16x16x3xf32> to vector<256x3xf32>
    %50 = arith.truncf %49 : vector<256x3xf32> to vector<256x3xbf16>
    %c6 = arith.constant 6 : index
    %c0_21 = arith.constant 0 : index
    %c0_22 = arith.constant 0 : index
    %51 = vector.load %arg3[%c6, %c0_21, %c0_22] : memref<9x3x64xbf16, #tpu.memory_space<vmem>>, vector<1x3x64xbf16>
    %52 = vector.shape_cast %51 : vector<1x3x64xbf16> to vector<3x64xbf16>
    %cst_23 = arith.constant dense<0.000000e+00> : vector<256x64xf32>
    %53 = tpu.matmul %50, %52, %cst_23 {dimension_numbers = #tpu.dot_dimension_numbers<[1], [0], [0], [1], [0, 0, 1, 1], [], []>} : vector<256x3xbf16>, vector<3x64xbf16>, vector<256x64xf32> -> vector<256x64xf32>
    %54 = arith.addf %47, %53 : vector<256x64xf32>
    %55 = vector.extract_strided_slice %4 {offsets = [2, 1, 0], sizes = [16, 16, 3], strides = [1, 1, 1]} : vector<18x18x3xf32> to vector<16x16x3xf32>
    %56 = vector.shape_cast %55 : vector<16x16x3xf32> to vector<256x3xf32>
    %57 = arith.truncf %56 : vector<256x3xf32> to vector<256x3xbf16>
    %c7 = arith.constant 7 : index
    %c0_24 = arith.constant 0 : index
    %c0_25 = arith.constant 0 : index
    %58 = vector.load %arg3[%c7, %c0_24, %c0_25] : memref<9x3x64xbf16, #tpu.memory_space<vmem>>, vector<1x3x64xbf16>
    %59 = vector.shape_cast %58 : vector<1x3x64xbf16> to vector<3x64xbf16>
    %cst_26 = arith.constant dense<0.000000e+00> : vector<256x64xf32>
    %60 = tpu.matmul %57, %59, %cst_26 {dimension_numbers = #tpu.dot_dimension_numbers<[1], [0], [0], [1], [0, 0, 1, 1], [], []>} : vector<256x3xbf16>, vector<3x64xbf16>, vector<256x64xf32> -> vector<256x64xf32>
    %61 = arith.addf %54, %60 : vector<256x64xf32>
    %62 = vector.extract_strided_slice %4 {offsets = [2, 2, 0], sizes = [16, 16, 3], strides = [1, 1, 1]} : vector<18x18x3xf32> to vector<16x16x3xf32>
    %63 = vector.shape_cast %62 : vector<16x16x3xf32> to vector<256x3xf32>
    %64 = arith.truncf %63 : vector<256x3xf32> to vector<256x3xbf16>
    %c8 = arith.constant 8 : index
    %c0_27 = arith.constant 0 : index
    %c0_28 = arith.constant 0 : index
    %65 = vector.load %arg3[%c8, %c0_27, %c0_28] : memref<9x3x64xbf16, #tpu.memory_space<vmem>>, vector<1x3x64xbf16>
    %66 = vector.shape_cast %65 : vector<1x3x64xbf16> to vector<3x64xbf16>
    %cst_29 = arith.constant dense<0.000000e+00> : vector<256x64xf32>
    %67 = tpu.matmul %64, %66, %cst_29 {dimension_numbers = #tpu.dot_dimension_numbers<[1], [0], [0], [1], [0, 0, 1, 1], [], []>} : vector<256x3xbf16>, vector<3x64xbf16>, vector<256x64xf32> -> vector<256x64xf32>
    %68 = arith.addf %61, %67 : vector<256x64xf32>
    %c0_30 = arith.constant 0 : index
    %c0_31 = arith.constant 0 : index
    %69 = vector.load %arg4[%c0_30, %c0_31] : memref<1x64xf32, #tpu.memory_space<vmem>>, vector<1x64xf32>
    %70 = vector.broadcast %69 : vector<1x64xf32> to vector<256x64xf32>
    %71 = arith.addf %68, %70 : vector<256x64xf32>
    %cst_32 = arith.constant dense<0.000000e+00> : vector<64xf32>
    %72 = vector.multi_reduction <add>, %71, %cst_32 [0] : vector<256x64xf32> to vector<64xf32>
    %73 = vector.shape_cast %72 : vector<64xf32> to vector<1x64xf32>
    %74 = arith.mulf %71, %71 : vector<256x64xf32>
    %cst_33 = arith.constant dense<0.000000e+00> : vector<64xf32>
    %75 = vector.multi_reduction <add>, %74, %cst_33 [0] : vector<256x64xf32> to vector<64xf32>
    %76 = vector.shape_cast %75 : vector<64xf32> to vector<1x64xf32>
    %77 = tpu.concatenate %73, %76 in 0 : vector<1x64xf32>, vector<1x64xf32> -> vector<2x64xf32>
    %c0_34 = arith.constant 0 : index
    %c0_35 = arith.constant 0 : index
    %c0_36 = arith.constant 0 : index
    %c0_37 = arith.constant 0 : index
    %78 = vector.load %arg6[%c0_34, %c0_35, %c0_36, %c0_37] : memref<1x1x2x64xf32, #tpu.memory_space<vmem>>, vector<1x1x2x64xf32>
    %79 = vector.shape_cast %78 : vector<1x1x2x64xf32> to vector<2x64xf32>
    %80 = vector.shape_cast %77 : vector<2x64xf32> to vector<1x1x2x64xf32>
    tpu.vector_store %arg6[%c0_34, %c0_35, %c0_36, %c0_37], %80 {strides = array<i32>} : memref<1x1x2x64xf32, #tpu.memory_space<vmem>>, vector<1x1x2x64xf32>,
    %81 = vector.shape_cast %71 : vector<256x64xf32> to vector<16x16x64xf32>
    %c0_38 = arith.constant 0 : index
    %c0_39 = arith.constant 0 : index
    %c0_40 = arith.constant 0 : index
    %c0_41 = arith.constant 0 : index
    %82 = vector.load %arg5[%c0_38, %c0_39, %c0_40, %c0_41] : memref<1x16x16x64xf32, #tpu.memory_space<vmem>>, vector<1x16x16x64xf32>
    %83 = vector.shape_cast %82 : vector<1x16x16x64xf32> to vector<16x16x64xf32>
    %84 = vector.shape_cast %81 : vector<16x16x64xf32> to vector<1x16x16x64xf32>
    tpu.vector_store %arg5[%c0_38, %c0_39, %c0_40, %c0_41], %84 {strides = array<i32>} : memref<1x16x16x64xf32, #tpu.memory_space<vmem>>, vector<1x16x16x64xf32>,
    return
  }
  func.func @transform_0(%arg0: i32, %arg1: i32) -> (i32, i32, i32, i32) {
    %c0_i32 = arith.constant 0 : i32
    %c0_i32_0 = arith.constant 0 : i32
    %c0_i32_1 = arith.constant 0 : i32
    %c0_i32_2 = arith.constant 0 : i32
    return %arg0, %c0_i32, %c0_i32_0, %c0_i32_1 : i32, i32, i32, i32
  }
  func.func @transform_1(%arg0: i32, %arg1: i32) -> (i32, i32, i32) {
    %c0_i32 = arith.constant 0 : i32
    %c0_i32_0 = arith.constant 0 : i32
    %c0_i32_1 = arith.constant 0 : i32
    %c0_i32_2 = arith.constant 0 : i32
    return %c0_i32, %c0_i32_0, %c0_i32_1 : i32, i32, i32
  }
  func.func @transform_2(%arg0: i32, %arg1: i32) -> (i32, i32) {
    %c0_i32 = arith.constant 0 : i32
    %c0_i32_0 = arith.constant 0 : i32
    %c0_i32_1 = arith.constant 0 : i32
    return %c0_i32, %c0_i32_0 : i32, i32
  }
  func.func @transform_3(%arg0: i32, %arg1: i32) -> (i32, i32, i32, i32) {
    %c0_i32 = arith.constant 0 : i32
    %c0_i32_0 = arith.constant 0 : i32
    %c0_i32_1 = arith.constant 0 : i32
    return %arg0, %arg1, %c0_i32, %c0_i32_0 : i32, i32, i32, i32
  }
  func.func @transform_4(%arg0: i32, %arg1: i32) -> (i32, i32, i32, i32) {
    %c0_i32 = arith.constant 0 : i32
    %c0_i32_0 = arith.constant 0 : i32
    %c0_i32_1 = arith.constant 0 : i32
    return %arg0, %arg1, %c0_i32, %c0_i32_0 : i32, i32, i32, i32
  }
}

module attributes {stable_mosaic.version = 11 : i64} {
  func.func @_bn_relu_pool_kernel(%arg0: i32, %arg1: i32, %arg2: memref<1x8x2x8x128xf32, #tpu.memory_space<vmem>>, %arg3: memref<1x128xf32, #tpu.memory_space<vmem>>, %arg4: memref<1x128xf32, #tpu.memory_space<vmem>>, %arg5: memref<1x8x8x64xf32, #tpu.memory_space<vmem>>) attributes {dimension_semantics = [#tpu.dimension_semantics<parallel>, #tpu.dimension_semantics<parallel>], iteration_bounds = array<i64: 2, 1>, scalar_prefetch = 0 : i64, scratch_operands = 0 : i64, tpu.core_type = #tpu.core_type<tc>, window_params = [{transform_indices = @transform_0, window_bounds = array<i64: 1, 8, 2, 8, 128>}, {pipeline_mode = #tpu.pipeline_mode<synchronous>, transform_indices = @transform_1, window_bounds = array<i64: 1, 128>}, {pipeline_mode = #tpu.pipeline_mode<synchronous>, transform_indices = @transform_2, window_bounds = array<i64: 1, 128>}, {transform_indices = @transform_3, window_bounds = array<i64: 1, 8, 8, 64>}]} {
    %c0 = arith.constant 0 : index
    %c0_0 = arith.constant 0 : index
    %c0_1 = arith.constant 0 : index
    %c0_2 = arith.constant 0 : index
    %c0_3 = arith.constant 0 : index
    %0 = vector.load %arg2[%c0, %c0_0, %c0_1, %c0_2, %c0_3] : memref<1x8x2x8x128xf32, #tpu.memory_space<vmem>>, vector<1x8x2x8x128xf32>
    %1 = vector.shape_cast %0 : vector<1x8x2x8x128xf32> to vector<8x2x8x128xf32>
    %c0_4 = arith.constant 0 : index
    %c0_5 = arith.constant 0 : index
    %2 = vector.load %arg3[%c0_4, %c0_5] : memref<1x128xf32, #tpu.memory_space<vmem>>, vector<1x128xf32>
    %3 = vector.shape_cast %2 : vector<1x128xf32> to vector<1x1x1x128xf32>
    %4 = vector.broadcast %3 : vector<1x1x1x128xf32> to vector<8x2x8x128xf32>
    %5 = arith.mulf %1, %4 : vector<8x2x8x128xf32>
    %c0_6 = arith.constant 0 : index
    %c0_7 = arith.constant 0 : index
    %6 = vector.load %arg4[%c0_6, %c0_7] : memref<1x128xf32, #tpu.memory_space<vmem>>, vector<1x128xf32>
    %7 = vector.shape_cast %6 : vector<1x128xf32> to vector<1x1x1x128xf32>
    %8 = vector.broadcast %7 : vector<1x1x1x128xf32> to vector<8x2x8x128xf32>
    %9 = arith.addf %5, %8 : vector<8x2x8x128xf32>
    %cst = arith.constant 0.000000e+00 : f32
    %10 = vector.broadcast %cst : f32 to vector<8x2x8x128xf32>
    %11 = arith.maximumf %9, %10 : vector<8x2x8x128xf32>
    %12 = vector.extract_strided_slice %11 {offsets = [0, 0, 0, 0], sizes = [8, 1, 8, 128], strides = [1, 1, 1, 1]} : vector<8x2x8x128xf32> to vector<8x1x8x128xf32>
    %13 = vector.shape_cast %12 : vector<8x1x8x128xf32> to vector<8x8x128xf32>
    %14 = vector.extract_strided_slice %11 {offsets = [0, 1, 0, 0], sizes = [8, 1, 8, 128], strides = [1, 1, 1, 1]} : vector<8x2x8x128xf32> to vector<8x1x8x128xf32>
    %15 = vector.shape_cast %14 : vector<8x1x8x128xf32> to vector<8x8x128xf32>
    %16 = arith.maximumf %13, %15 : vector<8x8x128xf32>
    %17 = vector.extract_strided_slice %16 {offsets = [0, 0, 0], sizes = [8, 8, 64], strides = [1, 1, 1]} : vector<8x8x128xf32> to vector<8x8x64xf32>
    %18 = vector.extract_strided_slice %16 {offsets = [0, 0, 64], sizes = [8, 8, 64], strides = [1, 1, 1]} : vector<8x8x128xf32> to vector<8x8x64xf32>
    %19 = arith.maximumf %17, %18 : vector<8x8x64xf32>
    %c0_8 = arith.constant 0 : index
    %c0_9 = arith.constant 0 : index
    %c0_10 = arith.constant 0 : index
    %c0_11 = arith.constant 0 : index
    %20 = vector.load %arg5[%c0_8, %c0_9, %c0_10, %c0_11] : memref<1x8x8x64xf32, #tpu.memory_space<vmem>>, vector<1x8x8x64xf32>
    %21 = vector.shape_cast %20 : vector<1x8x8x64xf32> to vector<8x8x64xf32>
    %22 = vector.shape_cast %19 : vector<8x8x64xf32> to vector<1x8x8x64xf32>
    tpu.vector_store %arg5[%c0_8, %c0_9, %c0_10, %c0_11], %22 {strides = array<i32>} : memref<1x8x8x64xf32, #tpu.memory_space<vmem>>, vector<1x8x8x64xf32>,
    return
  }
  func.func @transform_0(%arg0: i32, %arg1: i32) -> (i32, i32, i32, i32, i32) {
    %c0_i32 = arith.constant 0 : i32
    %c0_i32_0 = arith.constant 0 : i32
    %c0_i32_1 = arith.constant 0 : i32
    %c0_i32_2 = arith.constant 0 : i32
    return %arg0, %arg1, %c0_i32, %c0_i32_0, %c0_i32_1 : i32, i32, i32, i32, i32
  }
  func.func @transform_1(%arg0: i32, %arg1: i32) -> (i32, i32) {
    %c0_i32 = arith.constant 0 : i32
    %c0_i32_0 = arith.constant 0 : i32
    %c0_i32_1 = arith.constant 0 : i32
    return %c0_i32, %c0_i32_0 : i32, i32
  }
  func.func @transform_2(%arg0: i32, %arg1: i32) -> (i32, i32) {
    %c0_i32 = arith.constant 0 : i32
    %c0_i32_0 = arith.constant 0 : i32
    %c0_i32_1 = arith.constant 0 : i32
    return %c0_i32, %c0_i32_0 : i32, i32
  }
  func.func @transform_3(%arg0: i32, %arg1: i32) -> (i32, i32, i32, i32) {
    %c0_i32 = arith.constant 0 : i32
    %c0_i32_0 = arith.constant 0 : i32
    %c0_i32_1 = arith.constant 0 : i32
    return %arg0, %arg1, %c0_i32, %c0_i32_0 : i32, i32, i32, i32
  }
}

module attributes {stable_mosaic.version = 11 : i64} {
  func.func @_conv_bias_stats_kernel(%arg0: i32, %arg1: i32, %arg2: memref<1x10x10x64xf32, #tpu.memory_space<vmem>>, %arg3: memref<9x64x32xbf16, #tpu.memory_space<vmem>>, %arg4: memref<1x32xf32, #tpu.memory_space<vmem>>, %arg5: memref<1x8x8x32xf32, #tpu.memory_space<vmem>>, %arg6: memref<1x1x2x32xf32, #tpu.memory_space<vmem>>) attributes {dimension_semantics = [#tpu.dimension_semantics<parallel>, #tpu.dimension_semantics<parallel>], iteration_bounds = array<i64: 2, 1>, scalar_prefetch = 0 : i64, scratch_operands = 0 : i64, tpu.core_type = #tpu.core_type<tc>, window_params = [{transform_indices = @transform_0, window_bounds = array<i64: 1, 10, 10, 64>}, {pipeline_mode = #tpu.pipeline_mode<synchronous>, transform_indices = @transform_1, window_bounds = array<i64: 9, 64, 32>}, {pipeline_mode = #tpu.pipeline_mode<synchronous>, transform_indices = @transform_2, window_bounds = array<i64: 1, 32>}, {transform_indices = @transform_3, window_bounds = array<i64: 1, 8, 8, 32>}, {transform_indices = @transform_4, window_bounds = array<i64: 1, 1, 2, 32>}]} {
    %c8_i32 = arith.constant 8 : i32
    %0 = arith.muli %arg1, %c8_i32 : i32
    %1 = tpu.assume_multiple %0, 8 : i32
    %c0 = arith.constant 0 : index
    %2 = arith.index_cast %1 : i32 to index
    %c0_0 = arith.constant 0 : index
    %c0_1 = arith.constant 0 : index
    %3 = vector.load %arg2[%c0, %2, %c0_0, %c0_1] : memref<1x10x10x64xf32, #tpu.memory_space<vmem>>, vector<1x10x10x64xf32>
    %4 = vector.shape_cast %3 : vector<1x10x10x64xf32> to vector<10x10x64xf32>
    %cst = arith.constant 0.000000e+00 : f32
    %5 = vector.broadcast %cst : f32 to vector<64x32xf32>
    %6 = vector.extract_strided_slice %4 {offsets = [0, 0, 0], sizes = [8, 8, 64], strides = [1, 1, 1]} : vector<10x10x64xf32> to vector<8x8x64xf32>
    %7 = vector.shape_cast %6 : vector<8x8x64xf32> to vector<64x64xf32>
    %8 = arith.truncf %7 : vector<64x64xf32> to vector<64x64xbf16>
    %c0_2 = arith.constant 0 : index
    %c0_3 = arith.constant 0 : index
    %c0_4 = arith.constant 0 : index
    %9 = vector.load %arg3[%c0_2, %c0_3, %c0_4] : memref<9x64x32xbf16, #tpu.memory_space<vmem>>, vector<1x64x32xbf16>
    %10 = vector.shape_cast %9 : vector<1x64x32xbf16> to vector<64x32xbf16>
    %cst_5 = arith.constant dense<0.000000e+00> : vector<64x32xf32>
    %11 = tpu.matmul %8, %10, %cst_5 {dimension_numbers = #tpu.dot_dimension_numbers<[1], [0], [0], [1], [0, 0, 1, 1], [], []>} : vector<64x64xbf16>, vector<64x32xbf16>, vector<64x32xf32> -> vector<64x32xf32>
    %12 = arith.addf %5, %11 : vector<64x32xf32>
    %13 = vector.extract_strided_slice %4 {offsets = [0, 1, 0], sizes = [8, 8, 64], strides = [1, 1, 1]} : vector<10x10x64xf32> to vector<8x8x64xf32>
    %14 = vector.shape_cast %13 : vector<8x8x64xf32> to vector<64x64xf32>
    %15 = arith.truncf %14 : vector<64x64xf32> to vector<64x64xbf16>
    %c1 = arith.constant 1 : index
    %c0_6 = arith.constant 0 : index
    %c0_7 = arith.constant 0 : index
    %16 = vector.load %arg3[%c1, %c0_6, %c0_7] : memref<9x64x32xbf16, #tpu.memory_space<vmem>>, vector<1x64x32xbf16>
    %17 = vector.shape_cast %16 : vector<1x64x32xbf16> to vector<64x32xbf16>
    %cst_8 = arith.constant dense<0.000000e+00> : vector<64x32xf32>
    %18 = tpu.matmul %15, %17, %cst_8 {dimension_numbers = #tpu.dot_dimension_numbers<[1], [0], [0], [1], [0, 0, 1, 1], [], []>} : vector<64x64xbf16>, vector<64x32xbf16>, vector<64x32xf32> -> vector<64x32xf32>
    %19 = arith.addf %12, %18 : vector<64x32xf32>
    %20 = vector.extract_strided_slice %4 {offsets = [0, 2, 0], sizes = [8, 8, 64], strides = [1, 1, 1]} : vector<10x10x64xf32> to vector<8x8x64xf32>
    %21 = vector.shape_cast %20 : vector<8x8x64xf32> to vector<64x64xf32>
    %22 = arith.truncf %21 : vector<64x64xf32> to vector<64x64xbf16>
    %c2 = arith.constant 2 : index
    %c0_9 = arith.constant 0 : index
    %c0_10 = arith.constant 0 : index
    %23 = vector.load %arg3[%c2, %c0_9, %c0_10] : memref<9x64x32xbf16, #tpu.memory_space<vmem>>, vector<1x64x32xbf16>
    %24 = vector.shape_cast %23 : vector<1x64x32xbf16> to vector<64x32xbf16>
    %cst_11 = arith.constant dense<0.000000e+00> : vector<64x32xf32>
    %25 = tpu.matmul %22, %24, %cst_11 {dimension_numbers = #tpu.dot_dimension_numbers<[1], [0], [0], [1], [0, 0, 1, 1], [], []>} : vector<64x64xbf16>, vector<64x32xbf16>, vector<64x32xf32> -> vector<64x32xf32>
    %26 = arith.addf %19, %25 : vector<64x32xf32>
    %27 = vector.extract_strided_slice %4 {offsets = [1, 0, 0], sizes = [8, 8, 64], strides = [1, 1, 1]} : vector<10x10x64xf32> to vector<8x8x64xf32>
    %28 = vector.shape_cast %27 : vector<8x8x64xf32> to vector<64x64xf32>
    %29 = arith.truncf %28 : vector<64x64xf32> to vector<64x64xbf16>
    %c3 = arith.constant 3 : index
    %c0_12 = arith.constant 0 : index
    %c0_13 = arith.constant 0 : index
    %30 = vector.load %arg3[%c3, %c0_12, %c0_13] : memref<9x64x32xbf16, #tpu.memory_space<vmem>>, vector<1x64x32xbf16>
    %31 = vector.shape_cast %30 : vector<1x64x32xbf16> to vector<64x32xbf16>
    %cst_14 = arith.constant dense<0.000000e+00> : vector<64x32xf32>
    %32 = tpu.matmul %29, %31, %cst_14 {dimension_numbers = #tpu.dot_dimension_numbers<[1], [0], [0], [1], [0, 0, 1, 1], [], []>} : vector<64x64xbf16>, vector<64x32xbf16>, vector<64x32xf32> -> vector<64x32xf32>
    %33 = arith.addf %26, %32 : vector<64x32xf32>
    %34 = vector.extract_strided_slice %4 {offsets = [1, 1, 0], sizes = [8, 8, 64], strides = [1, 1, 1]} : vector<10x10x64xf32> to vector<8x8x64xf32>
    %35 = vector.shape_cast %34 : vector<8x8x64xf32> to vector<64x64xf32>
    %36 = arith.truncf %35 : vector<64x64xf32> to vector<64x64xbf16>
    %c4 = arith.constant 4 : index
    %c0_15 = arith.constant 0 : index
    %c0_16 = arith.constant 0 : index
    %37 = vector.load %arg3[%c4, %c0_15, %c0_16] : memref<9x64x32xbf16, #tpu.memory_space<vmem>>, vector<1x64x32xbf16>
    %38 = vector.shape_cast %37 : vector<1x64x32xbf16> to vector<64x32xbf16>
    %cst_17 = arith.constant dense<0.000000e+00> : vector<64x32xf32>
    %39 = tpu.matmul %36, %38, %cst_17 {dimension_numbers = #tpu.dot_dimension_numbers<[1], [0], [0], [1], [0, 0, 1, 1], [], []>} : vector<64x64xbf16>, vector<64x32xbf16>, vector<64x32xf32> -> vector<64x32xf32>
    %40 = arith.addf %33, %39 : vector<64x32xf32>
    %41 = vector.extract_strided_slice %4 {offsets = [1, 2, 0], sizes = [8, 8, 64], strides = [1, 1, 1]} : vector<10x10x64xf32> to vector<8x8x64xf32>
    %42 = vector.shape_cast %41 : vector<8x8x64xf32> to vector<64x64xf32>
    %43 = arith.truncf %42 : vector<64x64xf32> to vector<64x64xbf16>
    %c5 = arith.constant 5 : index
    %c0_18 = arith.constant 0 : index
    %c0_19 = arith.constant 0 : index
    %44 = vector.load %arg3[%c5, %c0_18, %c0_19] : memref<9x64x32xbf16, #tpu.memory_space<vmem>>, vector<1x64x32xbf16>
    %45 = vector.shape_cast %44 : vector<1x64x32xbf16> to vector<64x32xbf16>
    %cst_20 = arith.constant dense<0.000000e+00> : vector<64x32xf32>
    %46 = tpu.matmul %43, %45, %cst_20 {dimension_numbers = #tpu.dot_dimension_numbers<[1], [0], [0], [1], [0, 0, 1, 1], [], []>} : vector<64x64xbf16>, vector<64x32xbf16>, vector<64x32xf32> -> vector<64x32xf32>
    %47 = arith.addf %40, %46 : vector<64x32xf32>
    %48 = vector.extract_strided_slice %4 {offsets = [2, 0, 0], sizes = [8, 8, 64], strides = [1, 1, 1]} : vector<10x10x64xf32> to vector<8x8x64xf32>
    %49 = vector.shape_cast %48 : vector<8x8x64xf32> to vector<64x64xf32>
    %50 = arith.truncf %49 : vector<64x64xf32> to vector<64x64xbf16>
    %c6 = arith.constant 6 : index
    %c0_21 = arith.constant 0 : index
    %c0_22 = arith.constant 0 : index
    %51 = vector.load %arg3[%c6, %c0_21, %c0_22] : memref<9x64x32xbf16, #tpu.memory_space<vmem>>, vector<1x64x32xbf16>
    %52 = vector.shape_cast %51 : vector<1x64x32xbf16> to vector<64x32xbf16>
    %cst_23 = arith.constant dense<0.000000e+00> : vector<64x32xf32>
    %53 = tpu.matmul %50, %52, %cst_23 {dimension_numbers = #tpu.dot_dimension_numbers<[1], [0], [0], [1], [0, 0, 1, 1], [], []>} : vector<64x64xbf16>, vector<64x32xbf16>, vector<64x32xf32> -> vector<64x32xf32>
    %54 = arith.addf %47, %53 : vector<64x32xf32>
    %55 = vector.extract_strided_slice %4 {offsets = [2, 1, 0], sizes = [8, 8, 64], strides = [1, 1, 1]} : vector<10x10x64xf32> to vector<8x8x64xf32>
    %56 = vector.shape_cast %55 : vector<8x8x64xf32> to vector<64x64xf32>
    %57 = arith.truncf %56 : vector<64x64xf32> to vector<64x64xbf16>
    %c7 = arith.constant 7 : index
    %c0_24 = arith.constant 0 : index
    %c0_25 = arith.constant 0 : index
    %58 = vector.load %arg3[%c7, %c0_24, %c0_25] : memref<9x64x32xbf16, #tpu.memory_space<vmem>>, vector<1x64x32xbf16>
    %59 = vector.shape_cast %58 : vector<1x64x32xbf16> to vector<64x32xbf16>
    %cst_26 = arith.constant dense<0.000000e+00> : vector<64x32xf32>
    %60 = tpu.matmul %57, %59, %cst_26 {dimension_numbers = #tpu.dot_dimension_numbers<[1], [0], [0], [1], [0, 0, 1, 1], [], []>} : vector<64x64xbf16>, vector<64x32xbf16>, vector<64x32xf32> -> vector<64x32xf32>
    %61 = arith.addf %54, %60 : vector<64x32xf32>
    %62 = vector.extract_strided_slice %4 {offsets = [2, 2, 0], sizes = [8, 8, 64], strides = [1, 1, 1]} : vector<10x10x64xf32> to vector<8x8x64xf32>
    %63 = vector.shape_cast %62 : vector<8x8x64xf32> to vector<64x64xf32>
    %64 = arith.truncf %63 : vector<64x64xf32> to vector<64x64xbf16>
    %c8 = arith.constant 8 : index
    %c0_27 = arith.constant 0 : index
    %c0_28 = arith.constant 0 : index
    %65 = vector.load %arg3[%c8, %c0_27, %c0_28] : memref<9x64x32xbf16, #tpu.memory_space<vmem>>, vector<1x64x32xbf16>
    %66 = vector.shape_cast %65 : vector<1x64x32xbf16> to vector<64x32xbf16>
    %cst_29 = arith.constant dense<0.000000e+00> : vector<64x32xf32>
    %67 = tpu.matmul %64, %66, %cst_29 {dimension_numbers = #tpu.dot_dimension_numbers<[1], [0], [0], [1], [0, 0, 1, 1], [], []>} : vector<64x64xbf16>, vector<64x32xbf16>, vector<64x32xf32> -> vector<64x32xf32>
    %68 = arith.addf %61, %67 : vector<64x32xf32>
    %c0_30 = arith.constant 0 : index
    %c0_31 = arith.constant 0 : index
    %69 = vector.load %arg4[%c0_30, %c0_31] : memref<1x32xf32, #tpu.memory_space<vmem>>, vector<1x32xf32>
    %70 = vector.broadcast %69 : vector<1x32xf32> to vector<64x32xf32>
    %71 = arith.addf %68, %70 : vector<64x32xf32>
    %cst_32 = arith.constant dense<0.000000e+00> : vector<32xf32>
    %72 = vector.multi_reduction <add>, %71, %cst_32 [0] : vector<64x32xf32> to vector<32xf32>
    %73 = vector.shape_cast %72 : vector<32xf32> to vector<1x32xf32>
    %74 = arith.mulf %71, %71 : vector<64x32xf32>
    %cst_33 = arith.constant dense<0.000000e+00> : vector<32xf32>
    %75 = vector.multi_reduction <add>, %74, %cst_33 [0] : vector<64x32xf32> to vector<32xf32>
    %76 = vector.shape_cast %75 : vector<32xf32> to vector<1x32xf32>
    %77 = tpu.concatenate %73, %76 in 0 : vector<1x32xf32>, vector<1x32xf32> -> vector<2x32xf32>
    %c0_34 = arith.constant 0 : index
    %c0_35 = arith.constant 0 : index
    %c0_36 = arith.constant 0 : index
    %c0_37 = arith.constant 0 : index
    %78 = vector.load %arg6[%c0_34, %c0_35, %c0_36, %c0_37] : memref<1x1x2x32xf32, #tpu.memory_space<vmem>>, vector<1x1x2x32xf32>
    %79 = vector.shape_cast %78 : vector<1x1x2x32xf32> to vector<2x32xf32>
    %80 = vector.shape_cast %77 : vector<2x32xf32> to vector<1x1x2x32xf32>
    tpu.vector_store %arg6[%c0_34, %c0_35, %c0_36, %c0_37], %80 {strides = array<i32>} : memref<1x1x2x32xf32, #tpu.memory_space<vmem>>, vector<1x1x2x32xf32>,
    %81 = vector.shape_cast %71 : vector<64x32xf32> to vector<8x8x32xf32>
    %c0_38 = arith.constant 0 : index
    %c0_39 = arith.constant 0 : index
    %c0_40 = arith.constant 0 : index
    %c0_41 = arith.constant 0 : index
    %82 = vector.load %arg5[%c0_38, %c0_39, %c0_40, %c0_41] : memref<1x8x8x32xf32, #tpu.memory_space<vmem>>, vector<1x8x8x32xf32>
    %83 = vector.shape_cast %82 : vector<1x8x8x32xf32> to vector<8x8x32xf32>
    %84 = vector.shape_cast %81 : vector<8x8x32xf32> to vector<1x8x8x32xf32>
    tpu.vector_store %arg5[%c0_38, %c0_39, %c0_40, %c0_41], %84 {strides = array<i32>} : memref<1x8x8x32xf32, #tpu.memory_space<vmem>>, vector<1x8x8x32xf32>,
    return
  }
  func.func @transform_0(%arg0: i32, %arg1: i32) -> (i32, i32, i32, i32) {
    %c0_i32 = arith.constant 0 : i32
    %c0_i32_0 = arith.constant 0 : i32
    %c0_i32_1 = arith.constant 0 : i32
    %c0_i32_2 = arith.constant 0 : i32
    return %arg0, %c0_i32, %c0_i32_0, %c0_i32_1 : i32, i32, i32, i32
  }
  func.func @transform_1(%arg0: i32, %arg1: i32) -> (i32, i32, i32) {
    %c0_i32 = arith.constant 0 : i32
    %c0_i32_0 = arith.constant 0 : i32
    %c0_i32_1 = arith.constant 0 : i32
    %c0_i32_2 = arith.constant 0 : i32
    return %c0_i32, %c0_i32_0, %c0_i32_1 : i32, i32, i32
  }
  func.func @transform_2(%arg0: i32, %arg1: i32) -> (i32, i32) {
    %c0_i32 = arith.constant 0 : i32
    %c0_i32_0 = arith.constant 0 : i32
    %c0_i32_1 = arith.constant 0 : i32
    return %c0_i32, %c0_i32_0 : i32, i32
  }
  func.func @transform_3(%arg0: i32, %arg1: i32) -> (i32, i32, i32, i32) {
    %c0_i32 = arith.constant 0 : i32
    %c0_i32_0 = arith.constant 0 : i32
    %c0_i32_1 = arith.constant 0 : i32
    return %arg0, %arg1, %c0_i32, %c0_i32_0 : i32, i32, i32, i32
  }
  func.func @transform_4(%arg0: i32, %arg1: i32) -> (i32, i32, i32, i32) {
    %c0_i32 = arith.constant 0 : i32
    %c0_i32_0 = arith.constant 0 : i32
    %c0_i32_1 = arith.constant 0 : i32
    return %arg0, %arg1, %c0_i32, %c0_i32_0 : i32, i32, i32, i32
  }
}

module attributes {stable_mosaic.version = 11 : i64} {
  func.func @_bn_relu_upsample_kernel(%arg0: i32, %arg1: i32, %arg2: memref<1x8x8x32xf32, #tpu.memory_space<vmem>>, %arg3: memref<1x32xf32, #tpu.memory_space<vmem>>, %arg4: memref<1x32xf32, #tpu.memory_space<vmem>>, %arg5: memref<1x8x2x8x64xf32, #tpu.memory_space<vmem>>) attributes {dimension_semantics = [#tpu.dimension_semantics<parallel>, #tpu.dimension_semantics<parallel>], iteration_bounds = array<i64: 2, 1>, scalar_prefetch = 0 : i64, scratch_operands = 0 : i64, tpu.core_type = #tpu.core_type<tc>, window_params = [{transform_indices = @transform_0, window_bounds = array<i64: 1, 8, 8, 32>}, {pipeline_mode = #tpu.pipeline_mode<synchronous>, transform_indices = @transform_1, window_bounds = array<i64: 1, 32>}, {pipeline_mode = #tpu.pipeline_mode<synchronous>, transform_indices = @transform_2, window_bounds = array<i64: 1, 32>}, {transform_indices = @transform_3, window_bounds = array<i64: 1, 8, 2, 8, 64>}]} {
    %c0 = arith.constant 0 : index
    %c0_0 = arith.constant 0 : index
    %c0_1 = arith.constant 0 : index
    %c0_2 = arith.constant 0 : index
    %0 = vector.load %arg2[%c0, %c0_0, %c0_1, %c0_2] : memref<1x8x8x32xf32, #tpu.memory_space<vmem>>, vector<1x8x8x32xf32>
    %1 = vector.shape_cast %0 : vector<1x8x8x32xf32> to vector<8x8x32xf32>
    %c0_3 = arith.constant 0 : index
    %c0_4 = arith.constant 0 : index
    %2 = vector.load %arg3[%c0_3, %c0_4] : memref<1x32xf32, #tpu.memory_space<vmem>>, vector<1x32xf32>
    %3 = vector.shape_cast %2 : vector<1x32xf32> to vector<1x1x32xf32>
    %4 = vector.broadcast %3 : vector<1x1x32xf32> to vector<8x8x32xf32>
    %5 = arith.mulf %1, %4 : vector<8x8x32xf32>
    %c0_5 = arith.constant 0 : index
    %c0_6 = arith.constant 0 : index
    %6 = vector.load %arg4[%c0_5, %c0_6] : memref<1x32xf32, #tpu.memory_space<vmem>>, vector<1x32xf32>
    %7 = vector.shape_cast %6 : vector<1x32xf32> to vector<1x1x32xf32>
    %8 = vector.broadcast %7 : vector<1x1x32xf32> to vector<8x8x32xf32>
    %9 = arith.addf %5, %8 : vector<8x8x32xf32>
    %cst = arith.constant 0.000000e+00 : f32
    %10 = vector.broadcast %cst : f32 to vector<8x8x32xf32>
    %11 = arith.maximumf %9, %10 : vector<8x8x32xf32>
    %12 = tpu.concatenate %11, %11 in 2 : vector<8x8x32xf32>, vector<8x8x32xf32> -> vector<8x8x64xf32>
    %13 = vector.shape_cast %12 : vector<8x8x64xf32> to vector<8x1x8x64xf32>
    %14 = vector.shape_cast %13 : vector<8x1x8x64xf32> to vector<8x1x8x64xf32>
    %15 = vector.broadcast %14 : vector<8x1x8x64xf32> to vector<8x2x8x64xf32>
    %c0_7 = arith.constant 0 : index
    %c0_8 = arith.constant 0 : index
    %c0_9 = arith.constant 0 : index
    %c0_10 = arith.constant 0 : index
    %c0_11 = arith.constant 0 : index
    %16 = vector.load %arg5[%c0_7, %c0_8, %c0_9, %c0_10, %c0_11] : memref<1x8x2x8x64xf32, #tpu.memory_space<vmem>>, vector<1x8x2x8x64xf32>
    %17 = vector.shape_cast %16 : vector<1x8x2x8x64xf32> to vector<8x2x8x64xf32>
    %18 = vector.shape_cast %15 : vector<8x2x8x64xf32> to vector<1x8x2x8x64xf32>
    tpu.vector_store %arg5[%c0_7, %c0_8, %c0_9, %c0_10, %c0_11], %18 {strides = array<i32>} : memref<1x8x2x8x64xf32, #tpu.memory_space<vmem>>, vector<1x8x2x8x64xf32>,
    return
  }
  func.func @transform_0(%arg0: i32, %arg1: i32) -> (i32, i32, i32, i32) {
    %c0_i32 = arith.constant 0 : i32
    %c0_i32_0 = arith.constant 0 : i32
    %c0_i32_1 = arith.constant 0 : i32
    return %arg0, %arg1, %c0_i32, %c0_i32_0 : i32, i32, i32, i32
  }
  func.func @transform_1(%arg0: i32, %arg1: i32) -> (i32, i32) {
    %c0_i32 = arith.constant 0 : i32
    %c0_i32_0 = arith.constant 0 : i32
    %c0_i32_1 = arith.constant 0 : i32
    return %c0_i32, %c0_i32_0 : i32, i32
  }
  func.func @transform_2(%arg0: i32, %arg1: i32) -> (i32, i32) {
    %c0_i32 = arith.constant 0 : i32
    %c0_i32_0 = arith.constant 0 : i32
    %c0_i32_1 = arith.constant 0 : i32
    return %c0_i32, %c0_i32_0 : i32, i32
  }
  func.func @transform_3(%arg0: i32, %arg1: i32) -> (i32, i32, i32, i32, i32) {
    %c0_i32 = arith.constant 0 : i32
    %c0_i32_0 = arith.constant 0 : i32
    %c0_i32_1 = arith.constant 0 : i32
    %c0_i32_2 = arith.constant 0 : i32
    return %arg0, %arg1, %c0_i32, %c0_i32_0, %c0_i32_1 : i32, i32, i32, i32, i32
  }
}

module attributes {stable_mosaic.version = 11 : i64} {
  func.func @_conv_bias_tanh_kernel(%arg0: i32, %arg1: i32, %arg2: memref<1x18x18x32xf32, #tpu.memory_space<vmem>>, %arg3: memref<9x32x3xbf16, #tpu.memory_space<vmem>>, %arg4: memref<1x3xf32, #tpu.memory_space<vmem>>, %arg5: memref<1x16x16x3xf32, #tpu.memory_space<vmem>>) attributes {dimension_semantics = [#tpu.dimension_semantics<parallel>, #tpu.dimension_semantics<parallel>], iteration_bounds = array<i64: 2, 1>, scalar_prefetch = 0 : i64, scratch_operands = 0 : i64, tpu.core_type = #tpu.core_type<tc>, window_params = [{transform_indices = @transform_0, window_bounds = array<i64: 1, 18, 18, 32>}, {pipeline_mode = #tpu.pipeline_mode<synchronous>, transform_indices = @transform_1, window_bounds = array<i64: 9, 32, 3>}, {pipeline_mode = #tpu.pipeline_mode<synchronous>, transform_indices = @transform_2, window_bounds = array<i64: 1, 3>}, {transform_indices = @transform_3, window_bounds = array<i64: 1, 16, 16, 3>}]} {
    %c16_i32 = arith.constant 16 : i32
    %0 = arith.muli %arg1, %c16_i32 : i32
    %1 = tpu.assume_multiple %0, 16 : i32
    %c0 = arith.constant 0 : index
    %2 = arith.index_cast %1 : i32 to index
    %c0_0 = arith.constant 0 : index
    %c0_1 = arith.constant 0 : index
    %3 = vector.load %arg2[%c0, %2, %c0_0, %c0_1] : memref<1x18x18x32xf32, #tpu.memory_space<vmem>>, vector<1x18x18x32xf32>
    %4 = vector.shape_cast %3 : vector<1x18x18x32xf32> to vector<18x18x32xf32>
    %cst = arith.constant 0.000000e+00 : f32
    %5 = vector.broadcast %cst : f32 to vector<256x3xf32>
    %6 = vector.extract_strided_slice %4 {offsets = [0, 0, 0], sizes = [16, 16, 32], strides = [1, 1, 1]} : vector<18x18x32xf32> to vector<16x16x32xf32>
    %7 = vector.shape_cast %6 : vector<16x16x32xf32> to vector<256x32xf32>
    %8 = arith.truncf %7 : vector<256x32xf32> to vector<256x32xbf16>
    %c0_2 = arith.constant 0 : index
    %c0_3 = arith.constant 0 : index
    %c0_4 = arith.constant 0 : index
    %9 = vector.load %arg3[%c0_2, %c0_3, %c0_4] : memref<9x32x3xbf16, #tpu.memory_space<vmem>>, vector<1x32x3xbf16>
    %10 = vector.shape_cast %9 : vector<1x32x3xbf16> to vector<32x3xbf16>
    %cst_5 = arith.constant dense<0.000000e+00> : vector<256x3xf32>
    %11 = tpu.matmul %8, %10, %cst_5 {dimension_numbers = #tpu.dot_dimension_numbers<[1], [0], [0], [1], [0, 0, 1, 1], [], []>} : vector<256x32xbf16>, vector<32x3xbf16>, vector<256x3xf32> -> vector<256x3xf32>
    %12 = arith.addf %5, %11 : vector<256x3xf32>
    %13 = vector.extract_strided_slice %4 {offsets = [0, 1, 0], sizes = [16, 16, 32], strides = [1, 1, 1]} : vector<18x18x32xf32> to vector<16x16x32xf32>
    %14 = vector.shape_cast %13 : vector<16x16x32xf32> to vector<256x32xf32>
    %15 = arith.truncf %14 : vector<256x32xf32> to vector<256x32xbf16>
    %c1 = arith.constant 1 : index
    %c0_6 = arith.constant 0 : index
    %c0_7 = arith.constant 0 : index
    %16 = vector.load %arg3[%c1, %c0_6, %c0_7] : memref<9x32x3xbf16, #tpu.memory_space<vmem>>, vector<1x32x3xbf16>
    %17 = vector.shape_cast %16 : vector<1x32x3xbf16> to vector<32x3xbf16>
    %cst_8 = arith.constant dense<0.000000e+00> : vector<256x3xf32>
    %18 = tpu.matmul %15, %17, %cst_8 {dimension_numbers = #tpu.dot_dimension_numbers<[1], [0], [0], [1], [0, 0, 1, 1], [], []>} : vector<256x32xbf16>, vector<32x3xbf16>, vector<256x3xf32> -> vector<256x3xf32>
    %19 = arith.addf %12, %18 : vector<256x3xf32>
    %20 = vector.extract_strided_slice %4 {offsets = [0, 2, 0], sizes = [16, 16, 32], strides = [1, 1, 1]} : vector<18x18x32xf32> to vector<16x16x32xf32>
    %21 = vector.shape_cast %20 : vector<16x16x32xf32> to vector<256x32xf32>
    %22 = arith.truncf %21 : vector<256x32xf32> to vector<256x32xbf16>
    %c2 = arith.constant 2 : index
    %c0_9 = arith.constant 0 : index
    %c0_10 = arith.constant 0 : index
    %23 = vector.load %arg3[%c2, %c0_9, %c0_10] : memref<9x32x3xbf16, #tpu.memory_space<vmem>>, vector<1x32x3xbf16>
    %24 = vector.shape_cast %23 : vector<1x32x3xbf16> to vector<32x3xbf16>
    %cst_11 = arith.constant dense<0.000000e+00> : vector<256x3xf32>
    %25 = tpu.matmul %22, %24, %cst_11 {dimension_numbers = #tpu.dot_dimension_numbers<[1], [0], [0], [1], [0, 0, 1, 1], [], []>} : vector<256x32xbf16>, vector<32x3xbf16>, vector<256x3xf32> -> vector<256x3xf32>
    %26 = arith.addf %19, %25 : vector<256x3xf32>
    %27 = vector.extract_strided_slice %4 {offsets = [1, 0, 0], sizes = [16, 16, 32], strides = [1, 1, 1]} : vector<18x18x32xf32> to vector<16x16x32xf32>
    %28 = vector.shape_cast %27 : vector<16x16x32xf32> to vector<256x32xf32>
    %29 = arith.truncf %28 : vector<256x32xf32> to vector<256x32xbf16>
    %c3 = arith.constant 3 : index
    %c0_12 = arith.constant 0 : index
    %c0_13 = arith.constant 0 : index
    %30 = vector.load %arg3[%c3, %c0_12, %c0_13] : memref<9x32x3xbf16, #tpu.memory_space<vmem>>, vector<1x32x3xbf16>
    %31 = vector.shape_cast %30 : vector<1x32x3xbf16> to vector<32x3xbf16>
    %cst_14 = arith.constant dense<0.000000e+00> : vector<256x3xf32>
    %32 = tpu.matmul %29, %31, %cst_14 {dimension_numbers = #tpu.dot_dimension_numbers<[1], [0], [0], [1], [0, 0, 1, 1], [], []>} : vector<256x32xbf16>, vector<32x3xbf16>, vector<256x3xf32> -> vector<256x3xf32>
    %33 = arith.addf %26, %32 : vector<256x3xf32>
    %34 = vector.extract_strided_slice %4 {offsets = [1, 1, 0], sizes = [16, 16, 32], strides = [1, 1, 1]} : vector<18x18x32xf32> to vector<16x16x32xf32>
    %35 = vector.shape_cast %34 : vector<16x16x32xf32> to vector<256x32xf32>
    %36 = arith.truncf %35 : vector<256x32xf32> to vector<256x32xbf16>
    %c4 = arith.constant 4 : index
    %c0_15 = arith.constant 0 : index
    %c0_16 = arith.constant 0 : index
    %37 = vector.load %arg3[%c4, %c0_15, %c0_16] : memref<9x32x3xbf16, #tpu.memory_space<vmem>>, vector<1x32x3xbf16>
    %38 = vector.shape_cast %37 : vector<1x32x3xbf16> to vector<32x3xbf16>
    %cst_17 = arith.constant dense<0.000000e+00> : vector<256x3xf32>
    %39 = tpu.matmul %36, %38, %cst_17 {dimension_numbers = #tpu.dot_dimension_numbers<[1], [0], [0], [1], [0, 0, 1, 1], [], []>} : vector<256x32xbf16>, vector<32x3xbf16>, vector<256x3xf32> -> vector<256x3xf32>
    %40 = arith.addf %33, %39 : vector<256x3xf32>
    %41 = vector.extract_strided_slice %4 {offsets = [1, 2, 0], sizes = [16, 16, 32], strides = [1, 1, 1]} : vector<18x18x32xf32> to vector<16x16x32xf32>
    %42 = vector.shape_cast %41 : vector<16x16x32xf32> to vector<256x32xf32>
    %43 = arith.truncf %42 : vector<256x32xf32> to vector<256x32xbf16>
    %c5 = arith.constant 5 : index
    %c0_18 = arith.constant 0 : index
    %c0_19 = arith.constant 0 : index
    %44 = vector.load %arg3[%c5, %c0_18, %c0_19] : memref<9x32x3xbf16, #tpu.memory_space<vmem>>, vector<1x32x3xbf16>
    %45 = vector.shape_cast %44 : vector<1x32x3xbf16> to vector<32x3xbf16>
    %cst_20 = arith.constant dense<0.000000e+00> : vector<256x3xf32>
    %46 = tpu.matmul %43, %45, %cst_20 {dimension_numbers = #tpu.dot_dimension_numbers<[1], [0], [0], [1], [0, 0, 1, 1], [], []>} : vector<256x32xbf16>, vector<32x3xbf16>, vector<256x3xf32> -> vector<256x3xf32>
    %47 = arith.addf %40, %46 : vector<256x3xf32>
    %48 = vector.extract_strided_slice %4 {offsets = [2, 0, 0], sizes = [16, 16, 32], strides = [1, 1, 1]} : vector<18x18x32xf32> to vector<16x16x32xf32>
    %49 = vector.shape_cast %48 : vector<16x16x32xf32> to vector<256x32xf32>
    %50 = arith.truncf %49 : vector<256x32xf32> to vector<256x32xbf16>
    %c6 = arith.constant 6 : index
    %c0_21 = arith.constant 0 : index
    %c0_22 = arith.constant 0 : index
    %51 = vector.load %arg3[%c6, %c0_21, %c0_22] : memref<9x32x3xbf16, #tpu.memory_space<vmem>>, vector<1x32x3xbf16>
    %52 = vector.shape_cast %51 : vector<1x32x3xbf16> to vector<32x3xbf16>
    %cst_23 = arith.constant dense<0.000000e+00> : vector<256x3xf32>
    %53 = tpu.matmul %50, %52, %cst_23 {dimension_numbers = #tpu.dot_dimension_numbers<[1], [0], [0], [1], [0, 0, 1, 1], [], []>} : vector<256x32xbf16>, vector<32x3xbf16>, vector<256x3xf32> -> vector<256x3xf32>
    %54 = arith.addf %47, %53 : vector<256x3xf32>
    %55 = vector.extract_strided_slice %4 {offsets = [2, 1, 0], sizes = [16, 16, 32], strides = [1, 1, 1]} : vector<18x18x32xf32> to vector<16x16x32xf32>
    %56 = vector.shape_cast %55 : vector<16x16x32xf32> to vector<256x32xf32>
    %57 = arith.truncf %56 : vector<256x32xf32> to vector<256x32xbf16>
    %c7 = arith.constant 7 : index
    %c0_24 = arith.constant 0 : index
    %c0_25 = arith.constant 0 : index
    %58 = vector.load %arg3[%c7, %c0_24, %c0_25] : memref<9x32x3xbf16, #tpu.memory_space<vmem>>, vector<1x32x3xbf16>
    %59 = vector.shape_cast %58 : vector<1x32x3xbf16> to vector<32x3xbf16>
    %cst_26 = arith.constant dense<0.000000e+00> : vector<256x3xf32>
    %60 = tpu.matmul %57, %59, %cst_26 {dimension_numbers = #tpu.dot_dimension_numbers<[1], [0], [0], [1], [0, 0, 1, 1], [], []>} : vector<256x32xbf16>, vector<32x3xbf16>, vector<256x3xf32> -> vector<256x3xf32>
    %61 = arith.addf %54, %60 : vector<256x3xf32>
    %62 = vector.extract_strided_slice %4 {offsets = [2, 2, 0], sizes = [16, 16, 32], strides = [1, 1, 1]} : vector<18x18x32xf32> to vector<16x16x32xf32>
    %63 = vector.shape_cast %62 : vector<16x16x32xf32> to vector<256x32xf32>
    %64 = arith.truncf %63 : vector<256x32xf32> to vector<256x32xbf16>
    %c8 = arith.constant 8 : index
    %c0_27 = arith.constant 0 : index
    %c0_28 = arith.constant 0 : index
    %65 = vector.load %arg3[%c8, %c0_27, %c0_28] : memref<9x32x3xbf16, #tpu.memory_space<vmem>>, vector<1x32x3xbf16>
    %66 = vector.shape_cast %65 : vector<1x32x3xbf16> to vector<32x3xbf16>
    %cst_29 = arith.constant dense<0.000000e+00> : vector<256x3xf32>
    %67 = tpu.matmul %64, %66, %cst_29 {dimension_numbers = #tpu.dot_dimension_numbers<[1], [0], [0], [1], [0, 0, 1, 1], [], []>} : vector<256x32xbf16>, vector<32x3xbf16>, vector<256x3xf32> -> vector<256x3xf32>
    %68 = arith.addf %61, %67 : vector<256x3xf32>
    %c0_30 = arith.constant 0 : index
    %c0_31 = arith.constant 0 : index
    %69 = vector.load %arg4[%c0_30, %c0_31] : memref<1x3xf32, #tpu.memory_space<vmem>>, vector<1x3xf32>
    %70 = vector.broadcast %69 : vector<1x3xf32> to vector<256x3xf32>
    %71 = arith.addf %68, %70 : vector<256x3xf32>
    %72 = math.tanh %71 : vector<256x3xf32>
    %73 = vector.shape_cast %72 : vector<256x3xf32> to vector<16x16x3xf32>
    %c0_32 = arith.constant 0 : index
    %c0_33 = arith.constant 0 : index
    %c0_34 = arith.constant 0 : index
    %c0_35 = arith.constant 0 : index
    %74 = vector.load %arg5[%c0_32, %c0_33, %c0_34, %c0_35] : memref<1x16x16x3xf32, #tpu.memory_space<vmem>>, vector<1x16x16x3xf32>
    %75 = vector.shape_cast %74 : vector<1x16x16x3xf32> to vector<16x16x3xf32>
    %76 = vector.shape_cast %73 : vector<16x16x3xf32> to vector<1x16x16x3xf32>
    tpu.vector_store %arg5[%c0_32, %c0_33, %c0_34, %c0_35], %76 {strides = array<i32>} : memref<1x16x16x3xf32, #tpu.memory_space<vmem>>, vector<1x16x16x3xf32>,
    return
  }
  func.func @transform_0(%arg0: i32, %arg1: i32) -> (i32, i32, i32, i32) {
    %c0_i32 = arith.constant 0 : i32
    %c0_i32_0 = arith.constant 0 : i32
    %c0_i32_1 = arith.constant 0 : i32
    %c0_i32_2 = arith.constant 0 : i32
    return %arg0, %c0_i32, %c0_i32_0, %c0_i32_1 : i32, i32, i32, i32
  }
  func.func @transform_1(%arg0: i32, %arg1: i32) -> (i32, i32, i32) {
    %c0_i32 = arith.constant 0 : i32
    %c0_i32_0 = arith.constant 0 : i32
    %c0_i32_1 = arith.constant 0 : i32
    %c0_i32_2 = arith.constant 0 : i32
    return %c0_i32, %c0_i32_0, %c0_i32_1 : i32, i32, i32
  }
  func.func @transform_2(%arg0: i32, %arg1: i32) -> (i32, i32) {
    %c0_i32 = arith.constant 0 : i32
    %c0_i32_0 = arith.constant 0 : i32
    %c0_i32_1 = arith.constant 0 : i32
    return %c0_i32, %c0_i32_0 : i32, i32
  }
  func.func @transform_3(%arg0: i32, %arg1: i32) -> (i32, i32, i32, i32) {
    %c0_i32 = arith.constant 0 : i32
    %c0_i32_0 = arith.constant 0 : i32
    %c0_i32_1 = arith.constant 0 : i32
    return %arg0, %arg1, %c0_i32, %c0_i32_0 : i32, i32, i32, i32
  }
}

</mosaic_0001>

<bundles_post_ra>
// kernel: encoder_decoder_forward.6
= control target key start
LH: loop header
LB: loop body
LE: loop exit
PB: predicated region body
PF: predicated region fallthrough
CT: control target
= control target key end

     0   :  { %s517_s12 = smov 0   ;;  %s519_s13 = smov 0   ;;  %s616_s0 = inlined_call_operand.vmem [shape: f32[2,8,2,8,128], index: 0, kind: input, shape index: {}]   ;;  %s617_s1 = inlined_call_operand.vmem [shape: f32[1,128], index: 1, kind: input, shape index: {}]   ;;  %s618_s2 = inlined_call_operand.vmem [shape: f32[1,128], index: 2, kind: input, shape index: {}]   ;;  %s619_s3 = inlined_call_operand.vmem [shape: f32[2,8,8,64], index: 3, kind: output, shape index: {}]  }
   0x1   :  { %s521_s14 = smov 0  }
   0x2 LB: > { %s25_s15 = sadd.s32 1, %s490_s13  ;;  %p436_p0 = scmp.ge.s32.totalorder %s494_s14, 1  ;;  %s494_s14 = sphi %s521_s14, %s13_s14   ;;  %s490_s13 = sphi %s519_s13, %s621_s13   ;;  %s486_s12 = sphi %s517_s12, %s620_s12  }
   0x3   : > { %p27_p1 = scmp.ge.s32.totalorder %s25_s15, 2  ;;  %p159_p2 = scmp.lt.s32.totalorder %s494_s14, 3 }
   0x5   : > { %s623_s15 = smov (%p27_p1, %s25_s15), 0  ;;  %p160_p3 = pnand %p436_p0, %p159_p2 }
   0x6   : > { %p193_p4 = scmp.lt.s32.totalorder (!%p160_p3), %s486_s12, 1  ;;  %s496_s24 = smov (!%p160_p3), 64  }
   0x7   : > { %163 = sbr.rel (%p160_p3) target bundleno = 159 (0x9f), region = 32 }
   0xc   : > { %s625_s12 = smov (!%p193_p4, %s486_s12), 1  ;;  %v470_v0 = vld [vmem:[%s617_s1] ss:$0 sm:$0xff]  ;;  %vm333_vm0 = vcmask 523264  }
   0xd   : > { %s443_s18 = sshll.u32 %s625_s12, 7  ;;  %v549_v1 = vld [vmem:[%s618_s2] ss:$0 sm:$0xff]  ;;  %s444_s25 = sshll.u32 %s625_s12, 6 }
   0xe   : > { %s544_s21 = scalar_lea.vmem %s616_s0, %s443_s18  ;;  %s211_s28 = scalar_lea.vmem %s619_s3, %s444_s25 }
   0xf   : > { %v217_v2 = vld [vmem:[%s544_s21 + $0x20] sm:$0xff]  ;;  %v218_v3 = vld [vmem:[%s544_s21 + $0x28] sm:$0xff]  ;;  %v219_v9 = vld [vmem:[%s544_s21 + $0x30] sm:$0xff] }
  0x10   : > { %v213_v4 = vld [vmem:[%s544_s21] sm:$0xff]  ;;  %v237_v5 = vmul.f32 %v470_v0, %v217_v2  ;;  %v238_v6 = vmul.f32 %v470_v0, %v218_v3  ;;  %v214_v7 = vld [vmem:[%s544_s21 + $0x8] sm:$0xff]  ;;  %v220_v10 = vld [vmem:[%s544_s21 + $0x38] sm:$0xff]  ;;  %v239_v12 = vmul.f32 %v470_v0, %v219_v9 }
  0x11   : > { %v233_v8 = vmul.f32 %v470_v0, %v213_v4  ;;  %v234_v11 = vmul.f32 %v470_v0, %v214_v7  ;;  %v240_v13 = vmul.f32 %v470_v0, %v220_v10  ;;  %v215_v14 = vld [vmem:[%s544_s21 + $0x10] sm:$0xff]  ;;  %v216_v15 = vld [vmem:[%s544_s21 + $0x18] sm:$0xff]  ;;  %v225_v32 = vld [vmem:[%s544_s21 + $0x60] sm:$0xff] }
  0x12   : > { %v257_v16 = vadd.f32 %v549_v1, %v237_v5  ;;  %v258_v17 = vadd.f32 %v549_v1, %v238_v6  ;;  %v235_v19 = vmul.f32 %v470_v0, %v215_v14  ;;  %v259_v21 = vadd.f32 %v549_v1, %v239_v12  ;;  %v227_v28 = vld [vmem:[%s544_s21 + $0x70] sm:$0xff]  ;;  %v228_v31 = vld [vmem:[%s544_s21 + $0x78] sm:$0xff]  ;;  %v221_v33 = vld [vmem:[%s544_s21 + $0x40] sm:$0xff] }
  0x13   : > { %v253_v18 = vadd.f32 %v549_v1, %v233_v8  ;;  %v254_v20 = vadd.f32 %v549_v1, %v234_v11  ;;  %v260_v22 = vadd.f32 %v549_v1, %v240_v13  ;;  %v236_v23 = vmul.f32 %v470_v0, %v216_v15  ;;  %v226_v36 = vld [vmem:[%s544_s21 + $0x68] sm:$0xff]  ;;  %v223_v38 = vld [vmem:[%s544_s21 + $0x50] sm:$0xff]  ;;  %v224_v47 = vld [vmem:[%s544_s21 + $0x58] sm:$0xff] }
  0x14   : > { %v273_v24 = vmax.f32 %v257_v16, 0.0  ;;  %v274_v25 = vmax.f32 %v258_v17, 0.0  ;;  %v255_v27 = vadd.f32 %v549_v1, %v235_v19  ;;  %v275_v35 = vmax.f32 %v259_v21, 0.0  ;;  %v222_v37 = vld [vmem:[%s544_s21 + $0x48] sm:$0xff] }
  0x15   : > { %v269_v26 = vmax.f32 %v253_v18, 0.0  ;;  %v270_v29 = vmax.f32 %v254_v20, 0.0  ;;  %v256_v30 = vadd.f32 %v549_v1, %v236_v23  ;;  %v276_v40 = vmax.f32 %v260_v22, 0.0 }
  0x16   : > { %v571_v34 = vmax.f32 %v273_v24, %v274_v25  ;;  %v271_v41 = vmax.f32 %v255_v27, 0.0  ;;  %v247_v42 = vmul.f32 %v470_v0, %v227_v28  ;;  %v248_v44 = vmul.f32 %v470_v0, %v228_v31 }
  0x17   : > { %v285_v39 = vmax.f32 %v269_v26, %v270_v29  ;;  %v272_v43 = vmax.f32 %v256_v30, 0.0  ;;  %v245_v45 = vmul.f32 %v470_v0, %v225_v32  ;;  %v241_v46 = vmul.f32 %v470_v0, %v221_v33 }
  0x18   : > { %305 = vrot.lane.b32.xlu1 %v571_v34, %s496_s24  ;;  %v246_v48 = vmul.f32 %v470_v0, %v226_v36  ;;  %v242_v49 = vmul.f32 %v470_v0, %v222_v37  ;;  %v243_v50 = vmul.f32 %v470_v0, %v223_v38  ;;  %v288_v52 = vmax.f32 %v275_v35, %v276_v40 }
  0x19   : > { %301 = vrot.lane.b32.xlu0 %v285_v39, %s496_s24  ;;  %v261_v51 = vadd.f32 %v549_v1, %v241_v46  ;;  %v267_v53 = vadd.f32 %v549_v1, %v247_v42  ;;  %v244_v55 = vmul.f32 %v470_v0, %v224_v47  ;;  %v286_v56 = vmax.f32 %v271_v41, %v272_v43 }
  0x1a   : > { %v262_v54 = vadd.f32 %v549_v1, %v242_v49  ;;  %v268_v57 = vadd.f32 %v549_v1, %v248_v44  ;;  %v265_v58 = vadd.f32 %v549_v1, %v245_v45  ;;  %v266_v60 = vadd.f32 %v549_v1, %v246_v48 }
  0x1b   : > { %v277_v59 = vmax.f32 %v261_v51, 0.0  ;;  %v263_v62 = vadd.f32 %v549_v1, %v243_v50  ;;  %v264_v63 = vadd.f32 %v549_v1, %v244_v55  ;;  %v283_v3 = vmax.f32 %v267_v53, 0.0 }
  0x1c   : > { %v278_v61 = vmax.f32 %v262_v54, 0.0  ;;  %v284_v4 = vmax.f32 %v268_v57, 0.0  ;;  %v281_v0 = vmax.f32 %v265_v58, 0.0  ;;  %v282_v5 = vmax.f32 %v266_v60, 0.0 }
  0x1d   : > { %v279_v6 = vmax.f32 %v263_v62, 0.0  ;;  %v280_v7 = vmax.f32 %v264_v63, 0.0 }
  0x1e   : > { %v289_v2 = vmax.f32 %v277_v59, %v278_v61  ;;  %v292_v8 = vmax.f32 %v283_v3, %v284_v4  ;;  %v291_v9 = vmax.f32 %v281_v0, %v282_v5 }
  0x1f   : > { %v290_v10 = vmax.f32 %v279_v6, %v280_v7 }
  0x20   : > { %307 = vrot.lane.b32.xlu1 %v288_v52, %s496_s24  ;;  %309 = vrot.lane.b32.xlu2 %v289_v2, %s496_s24 }
  0x21   : > { %303 = vrot.lane.b32.xlu0 %v286_v56, %s496_s24 }
  0x28   : > { %315 = vrot.lane.b32.xlu1 %v292_v8, %s496_s24  ;;  %311 = vrot.lane.b32.xlu2 %v290_v10, %s496_s24 }
  0x29   : > { %313 = vrot.lane.b32.xlu0 %v291_v9, %s496_s24 }
  0x7a   : > { %v310_v1 = vpop.permute.xlu2 %309 }
  0x7b   : > { %v329_v11 = vmax.f32 %v289_v2, %v310_v1 }
  0x7d   : > { %338 = vst.msk [vmem:[%s211_s28 + $0x20] sm:$0xff] %vm333_vm0, %v329_v11 }
  0x82   : > { %v312_v12 = vpop.permute.xlu2 %311 }
  0x83   : > { %v330_v13 = vmax.f32 %v290_v10, %v312_v12 }
  0x85   : > { %339 = vst.msk [vmem:[%s211_s28 + $0x28] sm:$0xff] %vm333_vm0, %v330_v13 }
  0x8a   : > { %v306_v14 = vpop.permute.xlu1 %305 }
  0x8b   : > { %v327_v15 = vmax.f32 %v571_v34, %v306_v14  ;;  %v302_v16 = vpop.permute.xlu0 %301 }
  0x8c   : > { %v325_v17 = vmax.f32 %v285_v39, %v302_v16 }
  0x8d   : > { %336 = vst.msk [vmem:[%s211_s28 + $0x10] sm:$0xff] %vm333_vm0, %v327_v15 }
  0x8e   : > { %334 = vst.msk [vmem:[%s211_s28] sm:$0xff] %vm333_vm0, %v325_v17 }
  0x92   : > { %v308_v18 = vpop.permute.xlu1 %307 }
  0x93   : > { %v328_v19 = vmax.f32 %v288_v52, %v308_v18  ;;  %v304_v20 = vpop.permute.xlu0 %303 }
  0x94   : > { %v326_v21 = vmax.f32 %v286_v56, %v304_v20 }
  0x95   : > { %337 = vst.msk [vmem:[%s211_s28 + $0x18] sm:$0xff] %vm333_vm0, %v328_v19 }
  0x96   : > { %335 = vst.msk [vmem:[%s211_s28 + $0x8] sm:$0xff] %vm333_vm0, %v326_v21 }
  0x9a   : > { %v316_v22 = vpop.permute.xlu1 %315 }
  0x9b   : > { %v332_v23 = vmax.f32 %v292_v8, %v316_v22  ;;  %v314_v24 = vpop.permute.xlu0 %313 }
  0x9c   : > { %v331_v25 = vmax.f32 %v291_v9, %v314_v24 }
  0x9d   : > { %341 = vst.msk [vmem:[%s211_s28 + $0x38] sm:$0xff] %vm333_vm0, %v332_v23 }
  0x9e   : > { %340 = vst.msk [vmem:[%s211_s28 + $0x30] sm:$0xff] %vm333_vm0, %v331_v25 }
  0x9f PF: > { %s13_s14 = sadd.s32 1, %s494_s14   ;;  %s620_s12 = smov %s490_s13 }
  0xa0   : > { %p10_p5 = scmp.ge.s32.totalorder %s13_s14, 4   ;;  %s621_s13 = smov %s623_s15 }
  0xa2   :  { %12 = sbr.rel (!%p10_p5) target bundleno = 2 (0x2), region = 62 }

// kernel: encoder_decoder_forward.8
= control target key start
LH: loop header
LB: loop body
LE: loop exit
PB: predicated region body
PF: predicated region fallthrough
CT: control target
= control target key end

     0   :  { %s488_s12 = smov 0   ;;  %s490_s13 = smov 0   ;;  %s573_s0 = inlined_call_operand.vmem [shape: f32[2,8,8,32], index: 0, kind: input, shape index: {}]   ;;  %s574_s1 = inlined_call_operand.vmem [shape: f32[1,32], index: 1, kind: input, shape index: {}]   ;;  %s575_s2 = inlined_call_operand.vmem [shape: f32[1,32], index: 2, kind: input, shape index: {}]   ;;  %s576_s3 = inlined_call_operand.vmem [shape: f32[2,8,2,8,64], index: 3, kind: output, shape index: {}]  }
   0x1   :  { %s492_s14 = smov 0  }
   0x2 LB: > { %s25_s15 = sadd.s32 1, %s461_s13  ;;  %p407_p0 = scmp.ge.s32.totalorder %s465_s14, 1  ;;  %s465_s14 = sphi %s492_s14, %s13_s14   ;;  %s461_s13 = sphi %s490_s13, %s578_s13   ;;  %s457_s12 = sphi %s488_s12, %s577_s12  }
   0x3   : > { %p27_p1 = scmp.ge.s32.totalorder %s25_s15, 2  ;;  %p158_p2 = scmp.lt.s32.totalorder %s465_s14, 3 }
   0x5   : > { %s580_s15 = smov (%p27_p1, %s25_s15), 0  ;;  %p159_p3 = pnand %p407_p0, %p158_p2 }
   0x6   : > { %p192_p4 = scmp.lt.s32.totalorder (!%p159_p3), %s457_s12, 1  ;;  %s467_s24 = smov (!%p159_p3), 32  }
   0x7   : > { %162 = sbr.rel (%p159_p3) target bundleno = 158 (0x9e), region = 32 }
   0xc   : > { %s582_s12 = smov (!%p192_p4, %s457_s12), 1  ;;  %v441_v0 = vld [vmem:[%s574_s1] ss:$0 sm:$0xff]  ;;  %vm284_vm0 = vcmask 261120   ;;  %vm293_vm1 = vcmask 523264  }
   0xd   : > { %s414_s18 = sshll.u32 %s582_s12, 6  ;;  %v442_v1 = vld [vmem:[%s575_s2] ss:$0 sm:$0xff]  ;;  %s415_s25 = sshll.u32 %s582_s12, 7 }
   0xe   : > { %s199_s21 = scalar_lea.vmem %s573_s0, %s414_s18  ;;  %s522_s28 = scalar_lea.vmem %s576_s3, %s415_s25 }
   0xf   : > { %v214_v2 = vld [vmem:[%s199_s21 + $0x10] sm:$0xff]  ;;  %v212_v3 = vld [vmem:[%s199_s21] sm:$0xff]  ;;  %v215_v4 = vld [vmem:[%s199_s21 + $0x18] sm:$0xff] }
  0x10   : > { %v226_v5 = vmul.f32 %v441_v0, %v214_v2  ;;  %v224_v6 = vmul.f32 %v441_v0, %v212_v3  ;;  %v213_v7 = vld [vmem:[%s199_s21 + $0x8] sm:$0xff]  ;;  %v227_v8 = vmul.f32 %v441_v0, %v215_v4  ;;  %v216_v9 = vld [vmem:[%s199_s21 + $0x20] sm:$0xff]  ;;  %v219_v22 = vld [vmem:[%s199_s21 + $0x38] sm:$0xff] }
  0x11   : > { %v217_v10 = vld [vmem:[%s199_s21 + $0x28] sm:$0xff]  ;;  %v225_v13 = vmul.f32 %v441_v0, %v213_v7  ;;  %v228_v14 = vmul.f32 %v441_v0, %v216_v9  ;;  %v218_v23 = vld [vmem:[%s199_s21 + $0x30] sm:$0xff]  ;;  %v231_v27 = vmul.f32 %v441_v0, %v219_v22 }
  0x12   : > { %v238_v11 = vadd.f32 %v442_v1, %v226_v5  ;;  %v236_v12 = vadd.f32 %v442_v1, %v224_v6  ;;  %v229_v18 = vmul.f32 %v441_v0, %v217_v10  ;;  %v239_v19 = vadd.f32 %v442_v1, %v227_v8 }
  0x13   : > { %v240_v17 = vadd.f32 %v442_v1, %v228_v14  ;;  %v237_v20 = vadd.f32 %v442_v1, %v225_v13  ;;  %v230_v28 = vmul.f32 %v441_v0, %v218_v23  ;;  %v243_v30 = vadd.f32 %v442_v1, %v231_v27 }
  0x14   : > { %v246_v15 = vmax.f32 %v238_v11, 0.0  ;;  %v244_v16 = vmax.f32 %v236_v12, 0.0  ;;  %v241_v24 = vadd.f32 %v442_v1, %v229_v18  ;;  %v247_v25 = vmax.f32 %v239_v19, 0.0 }
  0x15   : > { %v248_v21 = vmax.f32 %v240_v17, 0.0  ;;  %v245_v26 = vmax.f32 %v237_v20, 0.0  ;;  %v242_v31 = vadd.f32 %v442_v1, %v230_v28  ;;  %v251_v32 = vmax.f32 %v243_v30, 0.0 }
  0x16   : > { %264 = vrot.lane.b32.xlu1 %v246_v15, %s467_s24  ;;  %260 = vrot.lane.b32.xlu0 %v244_v16, %s467_s24  ;;  %v249_v29 = vmax.f32 %v241_v24, 0.0 }
  0x17   : > { %268 = vrot.lane.b32.xlu2 %v248_v21, %s467_s24  ;;  %v250_v33 = vmax.f32 %v242_v31, 0.0 }
  0x1e   : > { %266 = vrot.lane.b32.xlu1 %v247_v25, %s467_s24  ;;  %262 = vrot.lane.b32.xlu0 %v245_v26, %s467_s24 }
  0x1f   : > { %270 = vrot.lane.b32.xlu2 %v249_v29, %s467_s24 }
  0x26   : > { %274 = vrot.lane.b32.xlu1 %v251_v32, %s467_s24  ;;  %272 = vrot.lane.b32.xlu0 %v250_v33, %s467_s24 }
  0x71   : > { %v269_v34 = vpop.permute.xlu2 %268 }
  0x72   : > { %v289_v35 = vsel %vm284_vm0, %v248_v21, %v269_v34 }
  0x73   : > { %302 = vst.msk [vmem:[%s522_s28 + $0x40] sm:$0xff] %vm293_vm1, %v289_v35 }
  0x74   : > { %303 = vst.msk [vmem:[%s522_s28 + $0x48] sm:$0xff] %vm293_vm1, %v289_v35 }
  0x79   : > { %v271_v36 = vpop.permute.xlu2 %270 }
  0x7a   : > { %v290_v37 = vsel %vm284_vm0, %v249_v29, %v271_v36 }
  0x7b   : > { %304 = vst.msk [vmem:[%s522_s28 + $0x50] sm:$0xff] %vm293_vm1, %v290_v37 }
  0x7c   : > { %305 = vst.msk [vmem:[%s522_s28 + $0x58] sm:$0xff] %vm293_vm1, %v290_v37 }
  0x88   : > { %v265_v38 = vpop.permute.xlu1 %264  ;;  %v261_v39 = vpop.permute.xlu0 %260 }
  0x89   : > { %v287_v40 = vsel %vm284_vm0, %v246_v15, %v265_v38  ;;  %v285_v41 = vsel %vm284_vm0, %v244_v16, %v261_v39 }
  0x8a   : > { %298 = vst.msk [vmem:[%s522_s28 + $0x20] sm:$0xff] %vm293_vm1, %v287_v40 }
  0x8b   : > { %299 = vst.msk [vmem:[%s522_s28 + $0x28] sm:$0xff] %vm293_vm1, %v287_v40 }
  0x8c   : > { %294 = vst.msk [vmem:[%s522_s28] sm:$0xff] %vm293_vm1, %v285_v41 }
  0x8d   : > { %295 = vst.msk [vmem:[%s522_s28 + $0x8] sm:$0xff] %vm293_vm1, %v285_v41 }
  0x90   : > { %v267_v42 = vpop.permute.xlu1 %266  ;;  %v263_v43 = vpop.permute.xlu0 %262 }
  0x91   : > { %v288_v44 = vsel %vm284_vm0, %v247_v25, %v267_v42  ;;  %v286_v45 = vsel %vm284_vm0, %v245_v26, %v263_v43 }
  0x92   : > { %300 = vst.msk [vmem:[%s522_s28 + $0x30] sm:$0xff] %vm293_vm1, %v288_v44 }
  0x93   : > { %301 = vst.msk [vmem:[%s522_s28 + $0x38] sm:$0xff] %vm293_vm1, %v288_v44 }
  0x94   : > { %296 = vst.msk [vmem:[%s522_s28 + $0x10] sm:$0xff] %vm293_vm1, %v286_v45 }
  0x95   : > { %297 = vst.msk [vmem:[%s522_s28 + $0x18] sm:$0xff] %vm293_vm1, %v286_v45 }
  0x98   : > { %v275_v46 = vpop.permute.xlu1 %274  ;;  %v273_v47 = vpop.permute.xlu0 %272 }
  0x99   : > { %v292_v48 = vsel %vm284_vm0, %v251_v32, %v275_v46  ;;  %v291_v49 = vsel %vm284_vm0, %v250_v33, %v273_v47 }
  0x9a   : > { %308 = vst.msk [vmem:[%s522_s28 + $0x70] sm:$0xff] %vm293_vm1, %v292_v48 }
  0x9b   : > { %309 = vst.msk [vmem:[%s522_s28 + $0x78] sm:$0xff] %vm293_vm1, %v292_v48 }
  0x9c   : > { %306 = vst.msk [vmem:[%s522_s28 + $0x60] sm:$0xff] %vm293_vm1, %v291_v49 }
  0x9d   : > { %307 = vst.msk [vmem:[%s522_s28 + $0x68] sm:$0xff] %vm293_vm1, %v291_v49 }
  0x9e PF: > { %s13_s14 = sadd.s32 1, %s465_s14   ;;  %s577_s12 = smov %s461_s13 }
  0x9f   : > { %p10_p5 = scmp.ge.s32.totalorder %s13_s14, 4   ;;  %s578_s13 = smov %s580_s15 }
  0xa1   :  { %12 = sbr.rel (!%p10_p5) target bundleno = 2 (0x2), region = 62 }

// kernel: encoder_decoder_forward.7
= control target key start
LH: loop header
LB: loop body
LE: loop exit
PB: predicated region body
PF: predicated region fallthrough
CT: control target
= control target key end

     0   :  { %s1666_s15 = smov 0   ;;  %s1668_s16 = smov 0   ;;  %s2121_s0 = inlined_call_operand.vmem [shape: f32[2,10,10,64], index: 0, kind: input, shape index: {}]   ;;  %s2122_s1 = inlined_call_operand.vmem [shape: bf16[9,64,32], index: 1, kind: input, shape index: {}]   ;;  %s2123_s2 = inlined_call_operand.vmem [shape: f32[1,32], index: 2, kind: input, shape index: {}]   ;;  %s2124_s3 = inlined_call_operand.vmem [shape: f32[2,8,8,32], index: 3, kind: output, shape index: {0}]   ;;  %s2125_s4 = inlined_call_operand.vmem [shape: f32[2,1,2,32], index: 4, kind: output, shape index: {1}]  }
   0x1   :  { %s1670_s17 = smov 0  }
   0x2 LB: > { %s27_s18 = sadd.s32 1, %s1635_s16  ;;  %p1291_p0 = scmp.ge.s32.totalorder %s1639_s17, 1  ;;  %s1639_s17 = sphi %s1670_s17, %s15_s17   ;;  %s1635_s16 = sphi %s1668_s16, %s2127_s16   ;;  %s1631_s15 = sphi %s1666_s15, %s2126_s15  }
   0x3   : > { %p29_p1 = scmp.ge.s32.totalorder %s27_s18, 2  ;;  %p181_p2 = scmp.lt.s32.totalorder %s1639_s17, 3 }
   0x5   : > { %s2129_s18 = smov (%p29_p1, %s27_s18), 0  ;;  %p182_p3 = pnand %p1291_p0, %p181_p2 }
   0x6   : > { %p218_p4 = scmp.lt.s32.totalorder (!%p182_p3), %s1631_s15, 1 }
   0x7   : > { %185 = sbr.rel (%p182_p3) target bundleno = 323 (0x143), region = 32 }
   0xc   : > { %v1550_v0 = vld [vmem:[%s2122_s1 + $0x38] sm:$0xff]  ;;  %v1549_v1 = vld [vmem:[%s2122_s1 + $0x30] sm:$0xff]  ;;  %s2131_s15 = smov (!%p218_p4, %s1631_s15), 1  ;;  %v1548_v2 = vld [vmem:[%s2122_s1 + $0x28] sm:$0xff]  ;;  %vm292_vm0 = vcmask 1046528   ;;  %vm362_vm1 = vcmask 523264  }
   0xd   : > { %1579 = vmatpush.bf16.msra.mxu1 %v1550_v0  ;;  %1580 = vmatpush.bf16.msra.mxu2 %v1550_v0  ;;  %s1591_s23 = smul.u32 160, %s2131_s15  ;;  %v1547_v6 = vld [vmem:[%s2122_s1 + $0x20] sm:$0xff]  ;;  %v1554_v22 = vld [vmem:[%s2122_s1 + $0x58] sm:$0xff]  ;;  %v1553_v51 = vld [vmem:[%s2122_s1 + $0x50] sm:$0xff]  ;;  %vm469_vm2 = vcmask 1045504   ;;  %vm1100_vm3 = vcmask 261120  }
   0xe   : > { %1581 = vmatpush.bf16.msra.mxu3 %v1550_v0  ;;  %379 = vmatpush.bf16.msra.mxu0 %v1550_v0  ;;  %v1546_v23 = vld [vmem:[%s2122_s1 + $0x18] sm:$0xff]  ;;  %v1545_v52 = vld [vmem:[%s2122_s1 + $0x10] sm:$0xff]  ;;  %v1552_v56 = vld [vmem:[%s2122_s1 + $0x48] sm:$0xff]  ;;  %s1295_s11 = sshll.u32 %s2131_s15, 1  ;;  %vm1151_vm4 = vcmask 1040384   ;;  %vm1153_vm5 = vcmask 254976  }
   0xf   : > { %s1699_s28 = scalar_lea.vmem %s2121_s0, %s1591_s23  ;;  %v1562_v46 = vld [vmem:[%s2122_s1 + $0x98] sm:$0xff]  ;;  %v1561_v54 = vld [vmem:[%s2122_s1 + $0x90] sm:$0xff]  ;;  %v1544_v57 = vld [vmem:[%s2122_s1 + $0x8] sm:$0xff]  ;;  %s239_s14 = scalar_lea.vmem %s2125_s4, %s1295_s11 }
  0x10   : > { %v1702_v3 = vld [vmem:[%s1699_s28 + $0x20] sm:$0xff]  ;;  %v1705_v4 = vld [vmem:[%s1699_s28 + $0x28] sm:$0x3]  ;;  %v1708_v5 = vld [vmem:[%s1699_s28 + $0x30] sm:$0xff] }
  0x11   : > { %1582 = vmatpush.bf16.msra.mxu1 %v1549_v1  ;;  %1583 = vmatpush.bf16.msra.mxu2 %v1549_v1  ;;  %v1714_v7 = vld [vmem:[%s1699_s28 + $0x38] sm:$0x3]  ;;  %v299_v8 = vrot.slane %v1702_v3, 1  ;;  %v300_v9 = vrot.slane %v1705_v4, 1  ;;  %v302_v10 = vrot.slane %v1708_v5, 1  ;;  %v1720_v11 = vld [vmem:[%s1699_s28 + $0x40] sm:$0xff] }
  0x12   : > { %1584 = vmatpush.bf16.msra.mxu3 %v1549_v1  ;;  %380 = vmatpush.bf16.msra.mxu0 %v1549_v1  ;;  %v303_v12 = vrot.slane %v1714_v7, 1  ;;  %v1724_v13 = vld [vmem:[%s1699_s28 + $0x48] sm:$0x3]  ;;  %v1727_v14 = vld [vmem:[%s1699_s28 + $0x50] sm:$0xff]  ;;  %v1730_v15 = vld [vmem:[%s1699_s28 + $0x58] sm:$0x3] }
  0x13   : > { %v1733_v16 = vsel %vm292_vm0, %v299_v8, %v300_v9  ;;  %v305_v17 = vrot.slane %v1720_v11, 1  ;;  %v306_v18 = vrot.slane %v1724_v13, 1  ;;  %v308_v19 = vrot.slane %v1727_v14, 1  ;;  %v1739_v20 = vld [vmem:[%s1699_s28 + $0x60] sm:$0xff]  ;;  %v1742_v21 = vld [vmem:[%s1699_s28 + $0x68] sm:$0x3] }
  0x14   : > { %v1751_v24 = vsel %vm292_vm0, %v302_v10, %v303_v12  ;;  %v309_v25 = vrot.slane %v1730_v15, 1  ;;  %v1755_v26 = vld [vmem:[%s1699_s28 + $0x70] sm:$0xff]  ;;  %v1758_v27 = vld [vmem:[%s1699_s28 + $0x78] sm:$0x3]  ;;  %v311_v28 = vrot.slane %v1739_v20, 1  ;;  %v312_v29 = vrot.slane %v1742_v21, 1 }
  0x15   : > { %1585 = vmatpush.bf16.msra.mxu1 %v1548_v2  ;;  %1586 = vmatpush.bf16.msra.mxu2 %v1548_v2  ;;  %v1764_v30 = vpack.c.bf16 %v1751_v24, %v1733_v16  ;;  %v1767_v31 = vsel %vm292_vm0, %v305_v17, %v306_v18  ;;  %v314_v32 = vrot.slane %v1755_v26, 1  ;;  %v315_v33 = vrot.slane %v1758_v27, 1  ;;  %v1772_v34 = vld [vmem:[%s1699_s28] sm:$0xff]  ;;  %v245_v35 = vld [vmem:[%s1699_s28 + $0x8] sm:$0x3]  ;;  %v1776_v36 = vld [vmem:[%s1699_s28 + $0x10] sm:$0xff] }
  0x16   : > { %1587 = vmatpush.bf16.msra.mxu3 %v1548_v2  ;;  %381 = vmatpush.bf16.msra.mxu0 %v1548_v2  ;;  %v1779_v37 = vsel %vm292_vm0, %v308_v19, %v309_v25  ;;  %v1782_v38 = vsel %vm292_vm0, %v311_v28, %v312_v29  ;;  %v247_v39 = vld [vmem:[%s1699_s28 + $0x18] sm:$0x3]  ;;  %v293_v40 = vrot.slane %v1772_v34, 1  ;;  %v294_v41 = vrot.slane %v245_v35, 1  ;;  %v1557_v55 = vld [vmem:[%s2122_s1 + $0x70] sm:$0xff]  ;;  %v1560_v60 = vld [vmem:[%s2122_s1 + $0x88] sm:$0xff] }
  0x17   : > { %v1788_v42 = vpack.c.bf16 %v1779_v37, %v1767_v31  ;;  %v1791_v43 = vsel %vm292_vm0, %v314_v32, %v315_v33  ;;  %v296_v44 = vrot.slane %v1776_v36, 1  ;;  %v297_v45 = vrot.slane %v247_v39, 1  ;;  %v1558_v48 = vld [vmem:[%s2122_s1 + $0x78] sm:$0xff]  ;;  %v1556_v63 = vld [vmem:[%s2122_s1 + $0x68] sm:$0xff]  ;;  %v1551_v0 = vld [vmem:[%s2122_s1 + $0x40] sm:$0xff] }
  0x18   : > { %v1799_v47 = vpack.c.bf16 %v1791_v43, %v1782_v38  ;;  %v295_v49 = vsel %vm292_vm0, %v293_v40, %v294_v41  ;;  %v471_v58 = vrot.slane %v245_v35, 2  ;;  %v474_v59 = vrot.slane %v247_v39, 2  ;;  %v1543_v1 = vld [vmem:[%s2122_s1] sm:$0xff]  ;;  %v1570_v2 = vld [vmem:[%s2122_s1 + $0xd8] sm:$0xff]  ;;  %v1569_v25 = vld [vmem:[%s2122_s1 + $0xd0] sm:$0xff] }
  0x19   : > { %1588 = vmatpush.bf16.msra.mxu1 %v1547_v6  ;;  %1589 = vmatpush.bf16.msra.mxu2 %v1547_v6  ;;  %v298_v50 = vsel %vm292_vm0, %v296_v44, %v297_v45  ;;  %v470_v61 = vrot.slane %v1772_v34, 2  ;;  %v473_v62 = vrot.slane %v1776_v36, 2  ;;  %v1559_v8 = vld [vmem:[%s2122_s1 + $0x80] sm:$0xff]  ;;  %v1578_v17 = vld [vmem:[%s2122_s1 + $0x118] sm:$0xff]  ;;  %v264_v19 = vpack.c.bf16 %v1776_v36, %v1772_v34  ;;  %v1565_v29 = vld [vmem:[%s2122_s1 + $0xb0] sm:$0xff] }
  0x1a   : > { %1590 = vmatpush.bf16.msra.mxu3 %v1547_v6  ;;  %382 = vmatpush.bf16.msra.mxu0 %v1547_v6  ;;  %v325_v53 = vpack.c.bf16 %v298_v50, %v295_v49  ;;  %v1566_v6 = vld [vmem:[%s2122_s1 + $0xb8] sm:$0xff]  ;;  %v1555_v12 = vld [vmem:[%s2122_s1 + $0x60] sm:$0xff]  ;;  %v680_v28 = vpack.c.bf16 %v1733_v16, %v298_v50  ;;  %v1573_v32 = vld [vmem:[%s2122_s1 + $0xf0] sm:$0xff]  ;;  %v1897_v35 = vpack.c.bf16 %v1755_v26, %v1739_v20  ;;  %v476_v40 = vrot.slane %v1702_v3, 2 }
  0x1b   : > { %v472_v9 = vsel %vm469_vm2, %v470_v61, %v471_v58  ;;  %v1856_v10 = vsel %vm469_vm2, %v473_v62, %v474_v59  ;;  %v1574_v18 = vld [vmem:[%s2122_s1 + $0xf8] sm:$0xff]  ;;  %v1577_v33 = vld [vmem:[%s2122_s1 + $0x110] sm:$0xff]  ;;  %v1568_v16 = vld [vmem:[%s2122_s1 + $0xc8] sm:$0xff]  ;;  %v477_v41 = vrot.slane %v1705_v4, 2  ;;  %v479_v44 = vrot.slane %v1708_v5, 2 }
  0x1c   : > { %1321 = vmatmul.msk.bf16.vlgmr.msra.gmra.mxu1 %vm362_vm1, %v1764_v30  ;;  %1322 = vmatmul.msk.bf16.vlgmr.msra.gmra.mxu2 %vm362_vm1, %v1788_v42  ;;  %v1564_v34 = vld [vmem:[%s2122_s1 + $0xa8] sm:$0xff]  ;;  %v480_v45 = vrot.slane %v1714_v7, 2  ;;  %v265_v49 = vpack.c.bf16 %v1708_v5, %v1702_v3  ;;  %v681_v4 = vpack.c.bf16 %v1767_v31, %v1751_v24  ;;  %v1567_v7 = vld [vmem:[%s2122_s1 + $0xc0] sm:$0xff]  ;;  %v482_v31 = vrot.slane %v1720_v11, 2 }
  0x1d   : > { %555 = vmatpush.bf16.msrb.mxu2 %v1554_v22  ;;  %444 = vmatpush.bf16.msrb.mxu1 %v1546_v23  ;;  %v502_v22 = vpack.c.bf16 %v1856_v10, %v472_v9  ;;  %v588_v23 = vpack.c.bf16 %v1702_v3, %v1776_v36  ;;  %v1572_v36 = vld [vmem:[%s2122_s1 + $0xe8] sm:$0xff]  ;;  %v1571_v3 = vld [vmem:[%s2122_s1 + $0xe0] sm:$0xff]  ;;  %v590_v59 = vpack.c.bf16 %v1739_v20, %v1727_v14  ;;  %v488_v61 = vrot.slane %v1739_v20, 2 }
  0x1e   : > { %1323 = vmatmul.msk.bf16.vlgmr.msra.gmra.mxu3 %vm362_vm1, %v1799_v47  ;;  %733 = vmatpush.bf16.msrb.mxu0 %v1562_v46  ;;  %v1576_v39 = vld [vmem:[%s2122_s1 + $0x108] sm:$0xff]  ;;  %v478_v46 = vsel %vm469_vm2, %v476_v40, %v477_v41  ;;  %v1575_v24 = vld [vmem:[%s2122_s1 + $0x100] sm:$0xff]  ;;  %v491_v62 = vrot.slane %v1755_v26, 2 }
  0x1f   : > { %641 = vmatpush.bf16.msrb.mxu3 %v1558_v48  ;;  %1320 = vmatmul.msk.bf16.vlgmr.msra.gmra.mxu0 %vm362_vm1, %v325_v53  ;;  %v481_v48 = vsel %vm469_vm2, %v479_v44, %v480_v45  ;;  %v485_v53 = vrot.slane %v1727_v14, 2  ;;  %v770_v20 = vpack.c.bf16 %v478_v46, %v1856_v10 }
  0x20   : > { %v503_v50 = vpack.c.bf16 %v481_v48, %v478_v46 }
  0x21   : > { %556 = vmatpush.bf16.msrb.mxu2 %v1553_v51  ;;  %445 = vmatpush.bf16.msrb.mxu1 %v1545_v52  ;;  %v589_v51 = vpack.c.bf16 %v1720_v11, %v1708_v5  ;;  %v1563_v5 = vld [vmem:[%s2122_s1 + $0xa0] sm:$0xff]  ;;  %v483_v52 = vrot.slane %v1724_v13, 2 }
  0x22   : > { %734 = vmatpush.bf16.msrb.mxu0 %v1561_v54  ;;  %v486_v54 = vrot.slane %v1730_v15, 2  ;;  %v260_v13 = vld [vmem:[%s1699_s28 + $0x80] sm:$0xff]  ;;  %v261_v15 = vld [vmem:[%s1699_s28 + $0x88] sm:$0x3] }
  0x23   : > { %642 = vmatpush.bf16.msrb.mxu3 %v1557_v55  ;;  %v484_v55 = vsel %vm469_vm2, %v482_v31, %v483_v52  ;;  %v767_v9 = vrot.slane %v261_v15, 2 }
  0x25   : > { %557 = vmatpush.bf16.msrb.mxu2 %v1552_v56  ;;  %446 = vmatpush.bf16.msrb.mxu1 %v1544_v57  ;;  %v487_v56 = vsel %vm469_vm2, %v485_v53, %v486_v54  ;;  %v266_v57 = vpack.c.bf16 %v1727_v14, %v1720_v11  ;;  %v489_v11 = vrot.slane %v1742_v21, 2  ;;  %v492_v14 = vrot.slane %v1758_v27, 2  ;;  %v262_v27 = vld [vmem:[%s1699_s28 + $0x90] sm:$0xff] }
  0x26   : > { %735 = vmatpush.bf16.msrb.mxu0 %v1560_v60  ;;  %v504_v58 = vpack.c.bf16 %v487_v56, %v484_v55  ;;  %v682_v60 = vpack.c.bf16 %v1782_v38, %v1779_v37  ;;  %v677_v37 = vrot.slane %v261_v15, 1  ;;  %v771_v21 = vpack.c.bf16 %v484_v55, %v481_v48 }
  0x27   : > { %643 = vmatpush.bf16.msrb.mxu3 %v1556_v63  ;;  %v676_v63 = vrot.slane %v260_v13, 1  ;;  %v490_v38 = vsel %vm469_vm2, %v488_v61, %v489_v11  ;;  %v932_v10 = vrot.slane %v262_v27, 1 }
  0x29   : > { %558 = vmatpush.bf16.msrb.mxu2 %v1551_v0  ;;  %447 = vmatpush.bf16.msrb.mxu1 %v1543_v1  ;;  %v493_v0 = vsel %vm469_vm2, %v491_v62, %v492_v14  ;;  %v678_v1 = vsel %vm292_vm0, %v676_v63, %v677_v37 }
  0x2a   : > { %736 = vmatpush.bf16.msrb.mxu0 %v1559_v8  ;;  %v683_v8 = vpack.c.bf16 %v678_v1, %v1791_v43  ;;  %v766_v43 = vrot.slane %v260_v13, 2 }
  0x2b   : > { %644 = vmatpush.bf16.msrb.mxu3 %v1555_v12 }
  0x2c   : > { %1340 = vmatmul.msk.bf16.vlgmr.msrb.gmra.mxu1 %vm362_vm1, %v264_v19  ;;  %1368 = vmatmul.msk.bf16.vlgmr.msrb.gmra.mxu2 %vm362_vm1, %v502_v22 }
  0x2d   : > { %897 = vmatpush.bf16.msra.mxu2 %v1570_v2  ;;  %823 = vmatpush.bf16.msra.mxu1 %v1566_v6  ;;  %v505_v2 = vpack.c.bf16 %v493_v0, %v490_v38  ;;  %v591_v6 = vpack.c.bf16 %v260_v13, %v1755_v26  ;;  %v772_v26 = vpack.c.bf16 %v490_v38, %v487_v56 }
  0x2e   : > { %1055 = vmatpush.bf16.msra.mxu0 %v1578_v17  ;;  %1396 = vmatmul.msk.bf16.vlgmr.msrb.gmra.mxu3 %vm362_vm1, %v588_v23 }
  0x2f   : > { %977 = vmatpush.bf16.msra.mxu3 %v1574_v18  ;;  %1424 = vmatmul.msk.bf16.vlgmr.msrb.gmra.mxu0 %vm362_vm1, %v680_v28  ;;  %v768_v18 = vsel %vm469_vm2, %v766_v43, %v767_v9 }
  0x30   : > { %v773_v23 = vpack.c.bf16 %v768_v18, %v493_v0 }
  0x31   : > { %898 = vmatpush.bf16.msra.mxu2 %v1569_v25  ;;  %824 = vmatpush.bf16.msra.mxu1 %v1565_v29  ;;  %v856_v25 = vpack.c.bf16 %v262_v27, %v260_v13 }
  0x32   : > { %1056 = vmatpush.bf16.msra.mxu0 %v1577_v33 }
  0x33   : > { %978 = vmatpush.bf16.msra.mxu3 %v1573_v32 }
  0x35   : > { %899 = vmatpush.bf16.msra.mxu2 %v1568_v16  ;;  %825 = vmatpush.bf16.msra.mxu1 %v1564_v34 }
  0x36   : > { %1057 = vmatpush.bf16.msra.mxu0 %v1576_v39 }
  0x37   : > { %979 = vmatpush.bf16.msra.mxu3 %v1572_v36 }
  0x39   : > { %900 = vmatpush.bf16.msra.mxu2 %v1567_v7  ;;  %826 = vmatpush.bf16.msra.mxu1 %v1563_v5 }
  0x3a   : > { %1058 = vmatpush.bf16.msra.mxu0 %v1575_v24 }
  0x3b   : > { %980 = vmatpush.bf16.msra.mxu3 %v1571_v3 }
  0x3c   : > { %1341 = vmatmul.msk.bf16.gmra.mxu1 %vm362_vm1, %v265_v49  ;;  %1369 = vmatmul.msk.bf16.gmra.mxu2 %vm362_vm1, %v503_v50 }
  0x3e   : > { %1397 = vmatmul.msk.bf16.gmra.mxu3 %vm362_vm1, %v589_v51 }
  0x3f   : > { %1425 = vmatmul.msk.bf16.gmra.mxu0 %vm362_vm1, %v681_v4 }
  0x4c   : > { %1342 = vmatmul.msk.bf16.gmra.mxu1 %vm362_vm1, %v266_v57  ;;  %1370 = vmatmul.msk.bf16.gmra.mxu2 %vm362_vm1, %v504_v58 }
  0x4e   : > { %1398 = vmatmul.msk.bf16.gmra.mxu3 %vm362_vm1, %v590_v59 }
  0x4f   : > { %1426 = vmatmul.msk.bf16.gmra.mxu0 %vm362_vm1, %v682_v60 }
  0x5c   : > { %1343 = vmatmul.msk.bf16.gmra.mxu1 %vm362_vm1, %v1897_v35  ;;  %1371 = vmatmul.msk.bf16.gmra.mxu2 %vm362_vm1, %v505_v2 }
  0x5e   : > { %1399 = vmatmul.msk.bf16.gmra.mxu3 %vm362_vm1, %v591_v6 }
  0x5f   : > { %1427 = vmatmul.msk.bf16.gmra.mxu0 %vm362_vm1, %v683_v8 }
  0x6c   : > { %1452 = vmatmul.msk.bf16.vlgmr.msra.gmra.mxu1 %vm362_vm1, %v770_v20  ;;  %1480 = vmatmul.msk.bf16.vlgmr.msra.gmra.mxu2 %vm362_vm1, %v265_v49 }
  0x6e   : > { %1508 = vmatmul.msk.bf16.vlgmr.msra.gmra.mxu3 %vm362_vm1, %v1764_v30  ;;  %v263_v30 = vld [vmem:[%s1699_s28 + $0x98] sm:$0x3]  ;;  %s1542_s28 = sshll.u32 %s2131_s15, 6 }
  0x6f   : > { %1536 = vmatmul.msk.bf16.vlgmr.msra.gmra.mxu0 %vm362_vm1, %v503_v50  ;;  %v933_v12 = vrot.slane %v263_v30, 1  ;;  %v1011_v17 = vrot.slane %v263_v30, 2  ;;  %s2044_s10 = scalar_lea.vmem %s2124_s3, %s1542_s28 }
  0x71   : > { %v934_v19 = vsel %vm292_vm0, %v932_v10, %v933_v12 }
  0x7c   : > { %1453 = vmatmul.msk.bf16.gmra.mxu1 %vm362_vm1, %v771_v21  ;;  %1481 = vmatmul.msk.bf16.gmra.mxu2 %vm362_vm1, %v266_v57 }
  0x7e   : > { %1509 = vmatmul.msk.bf16.gmra.mxu3 %vm362_vm1, %v1788_v42  ;;  %v1010_v42 = vrot.slane %v262_v27, 2 }
  0x7f   : > { %1537 = vmatmul.msk.bf16.gmra.mxu0 %vm362_vm1, %v504_v58 }
  0x80   : > { %v1012_v22 = vsel %vm469_vm2, %v1010_v42, %v1011_v17  ;;  %v2039_v17 = vld [vmem:[%s2123_s2] ss:$0 sm:$0xff] }
  0x81   : > { %v1014_v29 = vpack.c.bf16 %v1012_v22, %v768_v18 }
  0x8c   : > { %1454 = vmatmul.msk.bf16.gmra.mxu1 %vm362_vm1, %v772_v26  ;;  %1482 = vmatmul.msk.bf16.gmra.mxu2 %vm362_vm1, %v1897_v35 }
  0x8e   : > { %1510 = vmatmul.msk.bf16.gmra.mxu3 %vm362_vm1, %v1799_v47  ;;  %v936_v47 = vpack.c.bf16 %v934_v19, %v678_v1 }
  0x8f   : > { %1538 = vmatmul.msk.bf16.gmra.mxu0 %vm362_vm1, %v505_v2 }
  0x99   : > { %v389_v28 = vpop.f32.mrf.mxu1 }
  0x9c   : > { %v384_v32 = vpop.f32.mrf.mxu0  ;;  %1455 = vmatmul.msk.bf16.gmra.mxu1 %vm362_vm1, %v773_v23  ;;  %1483 = vmatmul.msk.bf16.gmra.mxu2 %vm362_vm1, %v856_v25 }
  0x9e   : > { %1511 = vmatmul.msk.bf16.gmra.mxu3 %vm362_vm1, %v936_v47 }
  0x9f   : > { %1539 = vmatmul.msk.bf16.gmra.mxu0 %vm362_vm1, %v1014_v29  ;;  %v1991_v33 = vpop.f32.mrf.mxu2 }
  0xa1   : > { %v1993_v16 = vpop.f32.mrf.mxu3  ;;  %v1995_v34 = vpop.f32.mrf.mxu1 }
  0xa4   : > { %v386_v35 = vpop.f32.mrf.mxu0 }
  0xa7   : > { %v1997_v36 = vpop.f32.mrf.mxu2 }
  0xa9   : > { %v1999_v39 = vpop.f32.mrf.mxu3  ;;  %v449_v40 = vpop.f32.mrf.mxu1 }
  0xaa   : > { %v450_v14 = vadd.f32 %v449_v40, %v384_v32 }
  0xac   : > { %v738_v41 = vpop.f32.mrf.mxu0 }
  0xaf   : > { %v560_v44 = vpop.f32.mrf.mxu2 }
  0xb0   : > { %v580_v37 = vadd.f32 %v560_v44, %v450_v14 }
  0xb1   : > { %v646_v45 = vpop.f32.mrf.mxu3  ;;  %v451_v46 = vpop.f32.mrf.mxu1 }
  0xb2   : > { %v666_v0 = vadd.f32 %v646_v45, %v580_v37  ;;  %v452_v6 = vadd.f32 %v451_v46, %v386_v35 }
  0xb4   : > { %v740_v48 = vpop.f32.mrf.mxu0  ;;  %v758_v21 = vadd.f32 %v738_v41, %v666_v0 }
  0xb7   : > { %v562_v49 = vpop.f32.mrf.mxu2 }
  0xb8   : > { %v581_v20 = vadd.f32 %v562_v49, %v452_v6 }
  0xb9   : > { %v648_v50 = vpop.f32.mrf.mxu3  ;;  %v454_v51 = vpop.f32.mrf.mxu1 }
  0xba   : > { %v667_v30 = vadd.f32 %v648_v50, %v581_v20  ;;  %v455_v12 = vadd.f32 %v454_v51, %v389_v28 }
  0xbc   : > { %v743_v4 = vpop.f32.mrf.mxu0  ;;  %v759_v23 = vadd.f32 %v740_v48, %v667_v30 }
  0xbf   : > { %v565_v7 = vpop.f32.mrf.mxu2 }
  0xc0   : > { %v582_v19 = vadd.f32 %v565_v7, %v455_v12 }
  0xc1   : > { %v651_v3 = vpop.f32.mrf.mxu3  ;;  %v456_v5 = vpop.f32.mrf.mxu1 }
  0xc2   : > { %v668_v29 = vadd.f32 %v651_v3, %v582_v19  ;;  %v457_v40 = vadd.f32 %v456_v5, %v1995_v34 }
  0xc4   : > { %v2001_v24 = vpop.f32.mrf.mxu0  ;;  %v760_v49 = vadd.f32 %v743_v4, %v668_v29 }
  0xc7   : > { %v567_v31 = vpop.f32.mrf.mxu2 }
  0xc8   : > { %v583_v45 = vadd.f32 %v567_v31, %v457_v40 }
  0xc9   : > { %v653_v52 = vpop.f32.mrf.mxu3  ;;  %v2003_v53 = vpop.f32.mrf.mxu1 }
  0xca   : > { %v669_v14 = vadd.f32 %v653_v52, %v583_v45  ;;  %v460_v4 = vadd.f32 %v2003_v53, %v1991_v33 }
  0xcc   : > { %v2005_v54 = vpop.f32.mrf.mxu0 }
  0xcf   : > { %v2007_v55 = vpop.f32.mrf.mxu2 }
  0xd1   : > { %v2009_v56 = vpop.f32.mrf.mxu3  ;;  %v2011_v57 = vpop.f32.mrf.mxu1 }
  0xd4   : > { %v2013_v58 = vpop.f32.mrf.mxu0 }
  0xd7   : > { %v2015_v59 = vpop.f32.mrf.mxu2 }
  0xd9   : > { %v2017_v60 = vpop.f32.mrf.mxu3  ;;  %v2019_v13 = vpop.f32.mrf.mxu1 }
  0xdc   : > { %v2021_v15 = vpop.f32.mrf.mxu0 }
  0xdf   : > { %v2023_v61 = vpop.f32.mrf.mxu2 }
  0xe1   : > { %v2025_v11 = vpop.f32.mrf.mxu3  ;;  %v2027_v62 = vpop.f32.mrf.mxu1 }
  0xe4   : > { %v2029_v63 = vpop.f32.mrf.mxu0 }
  0xe7   : > { %v2031_v38 = vpop.f32.mrf.mxu2 }
  0xe9   : > { %v2033_v1 = vpop.f32.mrf.mxu3  ;;  %v828_v2 = vpop.f32.mrf.mxu1 }
  0xea   : > { %v848_v26 = vadd.f32 %v828_v2, %v758_v21 }
  0xec   : > { %v1060_v8 = vpop.f32.mrf.mxu0 }
  0xef   : > { %v902_v27 = vpop.f32.mrf.mxu2 }
  0xf0   : > { %v922_v43 = vadd.f32 %v902_v27, %v848_v26  ;;  %v584_v27 = vadd.f32 %v2007_v55, %v460_v4  ;;  %v462_v55 = vadd.f32 %v2011_v57, %v1997_v36 }
  0xf1   : > { %v982_v9 = vpop.f32.mrf.mxu3  ;;  %v830_v10 = vpop.f32.mrf.mxu1 }
  0xf2   : > { %v1002_v42 = vadd.f32 %v982_v9, %v922_v43  ;;  %v849_v28 = vadd.f32 %v830_v10, %v759_v23  ;;  %v761_v43 = vadd.f32 %v2001_v24, %v669_v14 }
  0xf4   : > { %v1062_v18 = vpop.f32.mrf.mxu0  ;;  %v1080_v22 = vadd.f32 %v1060_v8, %v1002_v42  ;;  %v670_v42 = vadd.f32 %v2009_v56, %v584_v27 }
  0xf6   : > { %v1092_v25 = vadd.f32 %v2039_v17, %v1080_v22  ;;  %v762_v29 = vadd.f32 %v2005_v54, %v670_v42  ;;  %v465_v54 = vadd.f32 %v2019_v13, %v1993_v16 }
  0xf7   : > { %v904_v47 = vpop.f32.mrf.mxu2 }
  0xf8   : > { %1155 = vst.msk [vmem:[%s2044_s10] sm:$0xff] %vm1100_vm3, %v1092_v25  ;;  %v923_v32 = vadd.f32 %v904_v47, %v849_v28  ;;  %v1122_v50 = vmul.f32 %v1092_v25, %v1092_v25  ;;  %v1101_v3 = vsel %vm1100_vm3, %v1092_v25, 0.0  ;;  %v585_v47 = vadd.f32 %v2015_v59, %v462_v55 }
  0xf9   : > { %v984_v35 = vpop.f32.mrf.mxu3  ;;  %v833_v41 = vpop.f32.mrf.mxu1 }
  0xfa   : > { %v1003_v44 = vadd.f32 %v984_v35, %v923_v32  ;;  %v850_v7 = vadd.f32 %v833_v41, %v760_v49  ;;  %v1130_v8 = vsel %vm1100_vm3, %v1122_v50, 0.0 }
  0xfc   : > { %v1065_v46 = vpop.f32.mrf.mxu0  ;;  %v1081_v48 = vadd.f32 %v1062_v18, %v1003_v44  ;;  %v671_v44 = vadd.f32 %v2017_v60, %v585_v47 }
  0xfe   : > { %v1093_v51 = vadd.f32 %v2039_v17, %v1081_v48  ;;  %v763_v14 = vadd.f32 %v2013_v58, %v671_v44  ;;  %v467_v58 = vadd.f32 %v2027_v62, %v1999_v39 }
  0xff   : > { %v907_v37 = vpop.f32.mrf.mxu2 }
 0x100   : > { %v1102_v0 = vsel %vm1100_vm3, %v1093_v51, 0.0  ;;  %v1123_v2 = vmul.f32 %v1093_v51, %v1093_v51  ;;  %1156 = vst.msk [vmem:[%s2044_s10 + $0x8] sm:$0xff] %vm1100_vm3, %v1093_v51  ;;  %v924_v34 = vadd.f32 %v907_v37, %v850_v7  ;;  %v586_v7 = vadd.f32 %v2023_v61, %v465_v54 }
 0x101   : > { %v987_v5 = vpop.f32.mrf.mxu3  ;;  %v1103_v6 = vadd.f32 %v1102_v0, %v1101_v3  ;;  %v835_v31 = vpop.f32.mrf.mxu1 }
 0x102   : > { %v1131_v52 = vsel %vm1100_vm3, %v1123_v2, 0.0  ;;  %v1004_v20 = vadd.f32 %v987_v5, %v924_v34  ;;  %v851_v10 = vadd.f32 %v835_v31, %v761_v43  ;;  %v672_v34 = vadd.f32 %v2025_v11, %v586_v7 }
 0x103   : > { %v1132_v21 = vadd.f32 %v1131_v52, %v1130_v8 }
 0x104   : > { %v1067_v26 = vpop.f32.mrf.mxu0  ;;  %v1082_v30 = vadd.f32 %v1065_v46, %v1004_v20  ;;  %v587_v20 = vadd.f32 %v2031_v38, %v467_v58 }
 0x106   : > { %v1094_v9 = vadd.f32 %v2039_v17, %v1082_v30  ;;  %v673_v43 = vadd.f32 %v2033_v1, %v587_v20 }
 0x107   : > { %v909_v12 = vpop.f32.mrf.mxu2 }
 0x108   : > { %v1104_v33 = vsel %vm1100_vm3, %v1094_v9, 0.0  ;;  %v1124_v53 = vmul.f32 %v1094_v9, %v1094_v9  ;;  %1157 = vst.msk [vmem:[%s2044_s10 + $0x10] sm:$0xff] %vm1100_vm3, %v1094_v9  ;;  %v925_v18 = vadd.f32 %v909_v12, %v851_v10 }
 0x109   : > { %v989_v19 = vpop.f32.mrf.mxu3  ;;  %v1105_v22 = vadd.f32 %v1104_v33, %v1103_v6  ;;  %v838_v23 = vpop.f32.mrf.mxu1 }
 0x10a   : > { %v1133_v24 = vsel %vm1100_vm3, %v1124_v53, 0.0  ;;  %v1005_v25 = vadd.f32 %v989_v19, %v925_v18  ;;  %v852_v40 = vadd.f32 %v838_v23, %v762_v29  ;;  %v765_v19 = vadd.f32 %v2029_v63, %v673_v43 }
 0x10b   : > { %v1134_v28 = vadd.f32 %v1133_v24, %v1132_v21  ;;  %v764_v21 = vadd.f32 %v2021_v15, %v672_v34 }
 0x10c   : > { %v1083_v56 = vadd.f32 %v1067_v26, %v1005_v25  ;;  %v1070_v32 = vpop.f32.mrf.mxu0 }
 0x10e   : > { %v1095_v35 = vadd.f32 %v2039_v17, %v1083_v56 }
 0x10f   : > { %v912_v41 = vpop.f32.mrf.mxu2 }
 0x110   : > { %v1106_v45 = vsel %vm1100_vm3, %v1095_v35, 0.0  ;;  %v1125_v46 = vmul.f32 %v1095_v35, %v1095_v35  ;;  %1158 = vst.msk [vmem:[%s2044_s10 + $0x18] sm:$0xff] %vm1100_vm3, %v1095_v35  ;;  %v926_v36 = vadd.f32 %v912_v41, %v852_v40 }
 0x111   : > { %v992_v57 = vpop.f32.mrf.mxu3  ;;  %v1107_v48 = vadd.f32 %v1106_v45, %v1105_v22  ;;  %v840_v59 = vpop.f32.mrf.mxu1 }
 0x112   : > { %v1135_v49 = vsel %vm1100_vm3, %v1125_v46, 0.0  ;;  %v1006_v50 = vadd.f32 %v992_v57, %v926_v36  ;;  %v853_v3 = vadd.f32 %v840_v59, %v763_v14 }
 0x113   : > { %v1136_v51 = vadd.f32 %v1135_v49, %v1134_v28 }
 0x114   : > { %v1084_v60 = vadd.f32 %v1070_v32, %v1006_v50  ;;  %v1072_v0 = vpop.f32.mrf.mxu0 }
 0x116   : > { %v1096_v37 = vadd.f32 %v2039_v17, %v1084_v60 }
 0x117   : > { %v914_v2 = vpop.f32.mrf.mxu2 }
 0x118   : > { %v1108_v5 = vsel %vm1100_vm3, %v1096_v37, 0.0  ;;  %v1126_v6 = vmul.f32 %v1096_v37, %v1096_v37  ;;  %1159 = vst.msk [vmem:[%s2044_s10 + $0x20] sm:$0xff] %vm1100_vm3, %v1096_v37  ;;  %v927_v16 = vadd.f32 %v914_v2, %v853_v3 }
 0x119   : > { %v994_v13 = vpop.f32.mrf.mxu3  ;;  %v1109_v31 = vadd.f32 %v1108_v5, %v1107_v48  ;;  %v843_v61 = vpop.f32.mrf.mxu1 }
 0x11a   : > { %v1137_v4 = vsel %vm1100_vm3, %v1126_v6, 0.0  ;;  %v1007_v8 = vadd.f32 %v994_v13, %v927_v16  ;;  %v854_v27 = vadd.f32 %v843_v61, %v764_v21 }
 0x11b   : > { %v1138_v52 = vadd.f32 %v1137_v4, %v1136_v51 }
 0x11c   : > { %v1085_v11 = vadd.f32 %v1072_v0, %v1007_v8  ;;  %v1075_v42 = vpop.f32.mrf.mxu0 }
 0x11e   : > { %v1097_v26 = vadd.f32 %v2039_v17, %v1085_v11 }
 0x11f   : > { %v917_v30 = vpop.f32.mrf.mxu2 }
 0x120   : > { %v1110_v9 = vsel %vm1100_vm3, %v1097_v26, 0.0  ;;  %v1127_v10 = vmul.f32 %v1097_v26, %v1097_v26  ;;  %1160 = vst.msk [vmem:[%s2044_s10 + $0x28] sm:$0xff] %vm1100_vm3, %v1097_v26  ;;  %v928_v39 = vadd.f32 %v917_v30, %v854_v27 }
 0x121   : > { %v997_v62 = vpop.f32.mrf.mxu3  ;;  %v1111_v12 = vadd.f32 %v1110_v9, %v1109_v31  ;;  %v845_v53 = vpop.f32.mrf.mxu1 }
 0x122   : > { %v1139_v38 = vsel %vm1100_vm3, %v1127_v10, 0.0  ;;  %v1008_v33 = vadd.f32 %v997_v62, %v928_v39  ;;  %v855_v22 = vadd.f32 %v845_v53, %v765_v19 }
 0x123   : > { %v1140_v15 = vadd.f32 %v1139_v38, %v1138_v52 }
 0x124   : > { %v1086_v18 = vadd.f32 %v1075_v42, %v1008_v33  ;;  %v1077_v35 = vpop.f32.mrf.mxu0 }
 0x126   : > { %v1098_v1 = vadd.f32 %v2039_v17, %v1086_v18 }
 0x127   : > { %v919_v23 = vpop.f32.mrf.mxu2 }
 0x128   : > { %v1112_v55 = vsel %vm1100_vm3, %v1098_v1, 0.0  ;;  %v1128_v24 = vmul.f32 %v1098_v1, %v1098_v1  ;;  %1161 = vst.msk [vmem:[%s2044_s10 + $0x30] sm:$0xff] %vm1100_vm3, %v1098_v1  ;;  %v929_v25 = vadd.f32 %v919_v23, %v855_v22 }
 0x129   : > { %v1113_v28 = vadd.f32 %v1112_v55, %v1111_v12  ;;  %v999_v47 = vpop.f32.mrf.mxu3 }
 0x12a   : > { %v1141_v56 = vsel %vm1100_vm3, %v1128_v24, 0.0  ;;  %v1009_v29 = vadd.f32 %v999_v47, %v929_v25 }
 0x12b   : > { %v1142_v32 = vadd.f32 %v1141_v56, %v1140_v15 }
 0x12c   : > { %v1087_v40 = vadd.f32 %v1077_v35, %v1009_v29 }
 0x12e   : > { %v1099_v63 = vadd.f32 %v2039_v17, %v1087_v40 }
 0x130   : > { %v1114_v41 = vsel %vm1100_vm3, %v1099_v63, 0.0  ;;  %v1129_v44 = vmul.f32 %v1099_v63, %v1099_v63  ;;  %1162 = vst.msk [vmem:[%s2044_s10 + $0x38] sm:$0xff] %vm1100_vm3, %v1099_v63 }
 0x131   : > { %v1115_v45 = vadd.f32 %v1114_v41, %v1113_v28 }
 0x132   : > { %v1143_v46 = vsel %vm1100_vm3, %v1129_v44, 0.0 }
 0x133   : > { %v1116_v36 = vrot.slane %v1115_v45, 4  ;;  %v1144_v57 = vadd.f32 %v1143_v46, %v1142_v32 }
 0x135   : > { %v1117_v48 = vadd.f32 %v1116_v36, %v1115_v45  ;;  %v1145_v59 = vrot.slane %v1144_v57, 4 }
 0x137   : > { %v1118_v54 = vrot.slane %v1117_v48, 2  ;;  %v1146_v49 = vadd.f32 %v1145_v59, %v1144_v57 }
 0x139   : > { %v1119_v50 = vadd.f32 %v1118_v54, %v1117_v48  ;;  %v1147_v51 = vrot.slane %v1146_v49, 2 }
 0x13b   : > { %v1120_v7 = vrot.slane %v1119_v50, 1  ;;  %v1148_v60 = vadd.f32 %v1147_v51, %v1146_v49 }
 0x13d   : > { %v1149_v17 = vrot.slane %v1148_v60, 1  ;;  %v1121_v14 = vadd.f32 %v1120_v7, %v1119_v50 }
 0x13f   : > { %v1150_v37 = vadd.f32 %v1149_v17, %v1148_v60 }
 0x141   : > { %v1152_v3 = vsel %vm1151_vm4, %v1121_v14, %v1150_v37 }
 0x142   : > { %1154 = vst.msk [vmem:[%s239_s14] sm:$0x3] %vm1153_vm5, %v1152_v3 }
 0x143 PF: > { %s15_s17 = sadd.s32 1, %s1639_s17   ;;  %s2126_s15 = smov %s1635_s16 }
 0x144   : > { %p12_p5 = scmp.ge.s32.totalorder %s15_s17, 4   ;;  %s2127_s16 = smov %s2129_s18 }
 0x146   :  { %14 = sbr.rel (!%p12_p5) target bundleno = 2 (0x2), region = 83 }

// kernel: encoder_decoder_forward.5
= control target key start
LH: loop header
LB: loop body
LE: loop exit
PB: predicated region body
PF: predicated region fallthrough
CT: control target
= control target key end

     0   :  { %s2515_s15 = smov 0   ;;  %s2517_s16 = smov 0   ;;  %s3697_s0 = inlined_call_operand.vmem [shape: f32[2,18,18,3], index: 0, kind: input, shape index: {}]   ;;  %s3698_s1 = inlined_call_operand.vmem [shape: bf16[9,3,64], index: 1, kind: input, shape index: {}]   ;;  %s3699_s2 = inlined_call_operand.vmem [shape: f32[1,64], index: 2, kind: input, shape index: {}]   ;;  %s3700_s3 = inlined_call_operand.vmem [shape: f32[2,16,16,64], index: 3, kind: output, shape index: {0}]   ;;  %s3701_s4 = inlined_call_operand.vmem [shape: f32[2,1,2,64], index: 4, kind: output, shape index: {1}]  }
   0x1   :  { %s2519_s17 = smov 0  }
   0x2 LB: > { %s27_s18 = sadd.s32 1, %s2483_s16  ;;  %p2274_p0 = scmp.ge.s32.totalorder %s2487_s17, 1  ;;  %s2487_s17 = sphi %s2519_s17, %s15_s17   ;;  %s2483_s16 = sphi %s2517_s16, %s3840_s16   ;;  %s2479_s15 = sphi %s2515_s15, %s3839_s15  }
   0x3   : > { %p29_p1 = scmp.ge.s32.totalorder %s27_s18, 2  ;;  %p181_p2 = scmp.lt.s32.totalorder %s2487_s17, 3 }
   0x5   : > { %s3842_s18 = smov (%p29_p1, %s27_s18), 0  ;;  %p182_p3 = pnand %p2274_p0, %p181_p2 }
   0x7   : > { %185 = sbr.rel (%p182_p3) target bundleno = 753 (0x2f1), region = 32 }
   0xc   : > { %v2279_v0 = vld [vmem:[%s3698_s1 + $0x2] sm:$0x3]  ;;  %vm545_vm0 = vcmask 1040384   ;;  %vm546_vm1 = vcmask 1041408   ;;  %p219_p4 = scmp.lt.s32.totalorder %s2479_s15, 1  ;;  %v2489_v1 = vmov 65535  }
   0xd   : > { %v547_v2 = vsel %vm545_vm0, 4294967295, %v2489_v1  ;;  %v2312_v3 = vld [vmem:[%s3698_s1 + $0x4] sm:$0x3]  ;;  %v2329_v5 = vld [vmem:[%s3698_s1 + $0x6] sm:$0x3]  ;;  %vm365_vm2 = vcmask 1046528  }
   0xe   : > { %v2540_v4 = vsel %vm546_vm1, %v547_v2, 0  ;;  %s3844_s15 = smov (!%p219_p4, %s2479_s15), 1  ;;  %v316_v6 = vld [vmem:[%s3698_s1] sm:$0x3]  ;;  %v2346_v10 = vld [vmem:[%s3698_s1 + $0x8] sm:$0x3] }
   0xf   : > { %v550_v7 = vand.u32 %v2279_v0, %v2540_v4  ;;  %v961_v8 = vand.u32 %v2312_v3, %v2540_v4  ;;  %v1091_v9 = vand.u32 %v2329_v5, %v2540_v4  ;;  %s2437_s29 = smul.u32 432, %s3844_s15  ;;  %v690_v11 = vand.u32 %v2540_v4, %v316_v6  ;;  %s2433_s19 = sshll.u32 %s3844_s15, 8 }
  0x10   : > { %v1231_v12 = vand.u32 %v2346_v10, %v2540_v4  ;;  %vm496_vm3 = vcmask 23552   ;;  %vm781_vm4 = vcmask 1045504   ;;  %s3421_s24 = scalar_lea.vmem %s3700_s3, %s2433_s19  ;;  %vm1934_vm5 = vcmask 523264   ;;  %s2278_s27 = sshll.u32 %s3844_s15, 1 }
  0x11   : > { %2434 = vmatpush.bf16.msra.mxu1 %v550_v7  ;;  %2435 = vmatpush.bf16.msra.mxu2 %v550_v7  ;;  %s2562_s6 = scalar_lea.vmem %s3697_s0, %s2437_s29  ;;  %s241_s30 = scalar_lea.vmem %s3701_s4, %s2278_s27  ;;  %vm2106_vm6 = vcmask 517120  }
  0x12   : > { %2436 = vmatpush.bf16.msra.mxu3 %v550_v7  ;;  %559 = vmatpush.bf16.msra.mxu0 %v550_v7  ;;  %v2565_v13 = vld [vmem:[%s2562_s6 + $0x60] sm:$0xff]  ;;  %v2568_v14 = vld [vmem:[%s2562_s6 + $0x68] sm:$0xff]  ;;  %v2571_v15 = vld [vmem:[%s2562_s6 + $0x70] sm:$0x3] }
  0x13   : > { %v386_v16 = vrot.slane %v2565_v13, 1  ;;  %v387_v17 = vrot.slane %v2568_v14, 1  ;;  %v389_v18 = vrot.slane %v2571_v15, 1  ;;  %v2577_v19 = vld [vmem:[%s2562_s6 + $0xc0] sm:$0xff]  ;;  %v2580_v20 = vld [vmem:[%s2562_s6 + $0xc8] sm:$0xff]  ;;  %v2631_v48 = vld [vmem:[%s2562_s6 + $0x78] sm:$0xff] }
  0x14   : > { %v2583_v21 = vld [vmem:[%s2562_s6 + $0x120] sm:$0xff]  ;;  %v2586_v22 = vld [vmem:[%s2562_s6 + $0xd0] sm:$0x3]  ;;  %v406_v23 = vrot.slane %v2577_v19, 1  ;;  %v407_v24 = vrot.slane %v2580_v20, 1  ;;  %v2591_v25 = vld [vmem:[%s2562_s6 + $0x128] sm:$0xff] }
  0x15   : > { %970 = vmatpush.bf16.msrb.mxu2 %v961_v8  ;;  %3746 = vst [vmem:[#allocation2_spill] sm:$0xff] %v2583_v21  ;;  %699 = vmatpush.bf16.msrb.mxu1 %v690_v11  ;;  %v426_v26 = vrot.slane %v2583_v21, 1  ;;  %v388_v27 = vsel %vm365_vm2, %v386_v16, %v387_v17  ;;  %v390_v28 = vsel %vm365_vm2, %v387_v17, %v389_v18  ;;  %v409_v29 = vrot.slane %v2586_v22, 1  ;;  %v2598_v30 = vld [vmem:[%s2562_s6 + $0x130] sm:$0x3]  ;;  %v2601_v31 = vld [vmem:[%s2562_s6] sm:$0xff] }
  0x16   : > { %1100 = vmatpush.bf16.msrb.mxu3 %v1091_v9  ;;  %1240 = vmatpush.bf16.msrb.mxu0 %v1231_v12  ;;  %3747 = vst [vmem:[#allocation3_spill] sm:$0xff] %v2591_v25  ;;  %v2604_v32 = vld [vmem:[%s2562_s6 + $0x8] sm:$0xff]  ;;  %v2606_v33 = vpack.c.bf16 %v390_v28, %v388_v27  ;;  %v408_v34 = vsel %vm365_vm2, %v406_v23, %v407_v24  ;;  %v427_v35 = vrot.slane %v2591_v25, 1  ;;  %v429_v36 = vrot.slane %v2598_v30, 1  ;;  %v2612_v37 = vld [vmem:[%s2562_s6 + $0x10] sm:$0x3] }
  0x17   : > { %3748 = vst [vmem:[#allocation4_spill] sm:$0xff] %v2598_v30  ;;  %v410_v38 = vsel %vm365_vm2, %v407_v24, %v409_v29  ;;  %v366_v39 = vrot.slane %v2601_v31, 1  ;;  %v367_v40 = vrot.slane %v2604_v32, 1  ;;  %v369_v44 = vrot.slane %v2612_v37, 1  ;;  %v2634_v49 = vld [vmem:[%s2562_s6 + $0x80] sm:$0xff]  ;;  %v2642_v52 = vld [vmem:[%s2562_s6 + $0xd8] sm:$0xff] }
  0x18   : > { %2284 = vmatmul.msk.bf16.vlgmr.msra.gmra.mxu1 %vm496_vm3, %v2606_v33  ;;  %v2619_v41 = vpack.c.bf16 %v410_v38, %v408_v34  ;;  %v428_v42 = vsel %vm365_vm2, %v426_v26, %v427_v35  ;;  %v430_v43 = vsel %vm365_vm2, %v427_v35, %v429_v36  ;;  %v2637_v50 = vld [vmem:[%s2562_s6 + $0x88] sm:$0x3]  ;;  %v2645_v53 = vld [vmem:[%s2562_s6 + $0xe0] sm:$0xff]  ;;  %v2651_v55 = vld [vmem:[%s2562_s6 + $0x138] sm:$0xff]  ;;  %v391_v56 = vrot.slane %v2631_v48, 1 }
  0x19   : > { %v2624_v45 = vpack.c.bf16 %v430_v43, %v428_v42  ;;  %v368_v46 = vsel %vm365_vm2, %v366_v39, %v367_v40  ;;  %v370_v47 = vsel %vm365_vm2, %v367_v40, %v369_v44  ;;  %v2648_v54 = vld [vmem:[%s2562_s6 + $0xe8] sm:$0x3]  ;;  %3751 = vst [vmem:[#allocation7_spill] sm:$0xff] %v2651_v55  ;;  %v392_v57 = vrot.slane %v2634_v49, 1  ;;  %v2658_v59 = vld [vmem:[%s2562_s6 + $0x140] sm:$0xff]  ;;  %v2664_v61 = vld [vmem:[%s2562_s6 + $0x18] sm:$0xff] }
  0x1a   : > { %3749 = vst [vmem:[#allocation5_spill] sm:$0xff] %v2619_v41  ;;  %2288 = vmatmul.msk.bf16.vlgmr.msra.gmra.mxu2 %vm496_vm3, %v2619_v41  ;;  %v478_v51 = vpack.c.bf16 %v370_v47, %v368_v46  ;;  %v394_v58 = vrot.slane %v2637_v50, 1  ;;  %v2661_v60 = vld [vmem:[%s2562_s6 + $0x148] sm:$0x3]  ;;  %v411_v62 = vrot.slane %v2642_v52, 1  ;;  %v412_v63 = vrot.slane %v2645_v53, 1 }
  0x1b   : > { %3750 = vst [vmem:[#allocation6_spill] sm:$0xff] %v2624_v45  ;;  %2292 = vmatmul.msk.bf16.vlgmr.msra.gmra.mxu3 %vm496_vm3, %v2624_v45  ;;  %v414_v0 = vrot.slane %v2648_v54, 1  ;;  %v2670_v1 = vld [vmem:[%s2562_s6 + $0x20] sm:$0xff]  ;;  %v2673_v2 = vld [vmem:[%s2562_s6 + $0x28] sm:$0x3]  ;;  %v431_v3 = vrot.slane %v2651_v55, 1  ;;  %v393_v7 = vsel %vm365_vm2, %v391_v56, %v392_v57 }
  0x1c   : > { %2280 = vmatmul.msk.bf16.vlgmr.msra.gmra.mxu0 %vm496_vm3, %v478_v51  ;;  %3752 = vst [vmem:[#allocation8_spill] sm:$0xff] %v2658_v59  ;;  %v432_v5 = vrot.slane %v2658_v59, 1  ;;  %v434_v6 = vrot.slane %v2661_v60, 1  ;;  %v395_v8 = vsel %vm365_vm2, %v392_v57, %v394_v58  ;;  %v371_v9 = vrot.slane %v2664_v61, 1  ;;  %v2702_v34 = vld [vmem:[%s2562_s6 + $0x90] sm:$0xff]  ;;  %v2705_v35 = vld [vmem:[%s2562_s6 + $0x98] sm:$0xff] }
  0x1d   : > { %3753 = vst [vmem:[#allocation9_spill] sm:$0xff] %v2661_v60  ;;  %v372_v10 = vrot.slane %v2670_v1, 1  ;;  %v374_v11 = vrot.slane %v2673_v2, 1  ;;  %v413_v12 = vsel %vm365_vm2, %v411_v62, %v412_v63  ;;  %v415_v16 = vsel %vm365_vm2, %v412_v63, %v414_v0  ;;  %v2708_v36 = vld [vmem:[%s2562_s6 + $0xa0] sm:$0x3]  ;;  %v2713_v38 = vld [vmem:[%s2562_s6 + $0xf0] sm:$0xff] }
  0x1e   : > { %v2685_v17 = vpack.c.bf16 %v395_v8, %v393_v7  ;;  %v433_v18 = vsel %vm365_vm2, %v431_v3, %v432_v5  ;;  %v435_v23 = vsel %vm365_vm2, %v432_v5, %v434_v6  ;;  %v2689_v24 = vpack.c.bf16 %v415_v16, %v413_v12  ;;  %v2716_v39 = vld [vmem:[%s2562_s6 + $0xf8] sm:$0xff]  ;;  %v2719_v40 = vld [vmem:[%s2562_s6 + $0x100] sm:$0x3]  ;;  %v2722_v42 = vld [vmem:[%s2562_s6 + $0x150] sm:$0xff] }
  0x1f   : > { %v373_v26 = vsel %vm365_vm2, %v371_v9, %v372_v10  ;;  %v375_v27 = vsel %vm365_vm2, %v372_v10, %v374_v11  ;;  %v2693_v28 = vpack.c.bf16 %v435_v23, %v433_v18  ;;  %3756 = vst [vmem:[#allocation12_spill] sm:$0xff] %v2722_v42  ;;  %v396_v43 = vrot.slane %v2702_v34, 1  ;;  %v2730_v47 = vld [vmem:[%s2562_s6 + $0x158] sm:$0xff]  ;;  %v2733_v51 = vld [vmem:[%s2562_s6 + $0x160] sm:$0x3]  ;;  %v2736_v56 = vld [vmem:[%s2562_s6 + $0x30] sm:$0xff] }
  0x20   : > { %3754 = vst [vmem:[#allocation10_spill] sm:$0xff] %v2689_v24  ;;  %v2697_v29 = vpack.c.bf16 %v375_v27, %v373_v26  ;;  %v397_v44 = vrot.slane %v2705_v35, 1  ;;  %v399_v46 = vrot.slane %v2708_v36, 1  ;;  %v416_v57 = vrot.slane %v2713_v38, 1  ;;  %v2742_v63 = vld [vmem:[%s2562_s6 + $0x38] sm:$0xff]  ;;  %v2827_v59 = vld [vmem:[%s2562_s6 + $0x48] sm:$0xff] }
  0x21   : > { %3755 = vst [vmem:[#allocation11_spill] sm:$0xff] %v2693_v28  ;;  %v417_v58 = vrot.slane %v2716_v39, 1  ;;  %v419_v62 = vrot.slane %v2719_v40, 1  ;;  %v2745_v0 = vld [vmem:[%s2562_s6 + $0x40] sm:$0x3]  ;;  %v436_v3 = vrot.slane %v2722_v42, 1 }
  0x22   : > { %3757 = vst [vmem:[#allocation13_spill] sm:$0xff] %v2730_v47  ;;  %v437_v5 = vrot.slane %v2730_v47, 1  ;;  %v439_v6 = vrot.slane %v2733_v51, 1  ;;  %v398_v7 = vsel %vm365_vm2, %v396_v43, %v397_v44  ;;  %v400_v8 = vsel %vm365_vm2, %v397_v44, %v399_v46  ;;  %v2830_v55 = vld [vmem:[%s2562_s6 + $0x50] sm:$0xff]  ;;  %v2833_v30 = vld [vmem:[%s2562_s6 + $0x58] sm:$0x3] }
  0x23   : > { %3758 = vst [vmem:[#allocation14_spill] sm:$0xff] %v2733_v51  ;;  %v376_v9 = vrot.slane %v2736_v56, 1  ;;  %v377_v10 = vrot.slane %v2742_v63, 1  ;;  %v379_v11 = vrot.slane %v2745_v0, 1  ;;  %v418_v12 = vsel %vm365_vm2, %v416_v57, %v417_v58  ;;  %v2770_v57 = vld [vmem:[%s2562_s6 + $0xa8] sm:$0xff] }
  0x24   : > { %v420_v16 = vsel %vm365_vm2, %v417_v58, %v419_v62  ;;  %v2757_v18 = vpack.c.bf16 %v400_v8, %v398_v7  ;;  %v438_v23 = vsel %vm365_vm2, %v436_v3, %v437_v5  ;;  %v440_v26 = vsel %vm365_vm2, %v437_v5, %v439_v6  ;;  %v2775_v62 = vld [vmem:[%s2562_s6 + $0xb0] sm:$0xff]  ;;  %v2778_v3 = vld [vmem:[%s2562_s6 + $0xb8] sm:$0x3]  ;;  %v2783_v5 = vld [vmem:[%s2562_s6 + $0x108] sm:$0xff] }
  0x25   : > { %v2761_v27 = vpack.c.bf16 %v420_v16, %v418_v12  ;;  %v378_v43 = vsel %vm365_vm2, %v376_v9, %v377_v10  ;;  %v380_v44 = vsel %vm365_vm2, %v377_v10, %v379_v11  ;;  %v2765_v46 = vpack.c.bf16 %v440_v26, %v438_v23  ;;  %v2789_v7 = vld [vmem:[%s2562_s6 + $0x110] sm:$0xff]  ;;  %v2792_v8 = vld [vmem:[%s2562_s6 + $0x118] sm:$0x3]  ;;  %v2380_v9 = vld [vmem:[%s3698_s1 + $0xc] sm:$0x3] }
  0x26   : > { %3759 = vst [vmem:[#allocation15_spill] sm:$0xff] %v2757_v18  ;;  %v2772_v58 = vpack.c.bf16 %v380_v44, %v378_v43  ;;  %v401_v6 = vrot.slane %v2770_v57, 1  ;;  %v402_v10 = vrot.slane %v2775_v62, 1  ;;  %v404_v11 = vrot.slane %v2778_v3, 1  ;;  %v2800_v12 = vld [vmem:[%s2562_s6 + $0x168] sm:$0xff]  ;;  %v2803_v16 = vld [vmem:[%s2562_s6 + $0x170] sm:$0xff] }
  0x27   : > { %3760 = vst [vmem:[#allocation16_spill] sm:$0xff] %v2765_v46  ;;  %v2806_v23 = vld [vmem:[%s2562_s6 + $0x178] sm:$0x3]  ;;  %v1498_v26 = vand.u32 %v2380_v9, %v2540_v4  ;;  %v2397_v43 = vld [vmem:[%s3698_s1 + $0xe] sm:$0x3]  ;;  %v422_v60 = vrot.slane %v2789_v7, 1 }
  0x28   : > { %2285 = vmatmul.msk.bf16.gmra.mxu1 %vm496_vm3, %v2685_v17  ;;  %3761 = vst [vmem:[#allocation17_spill] sm:$0xff] %v2792_v8  ;;  %v2363_v44 = vld [vmem:[%s3698_s1 + $0xa] sm:$0x3]  ;;  %v2414_v51 = vld [vmem:[%s3698_s1 + $0x10] sm:$0x3]  ;;  %v1638_v9 = vand.u32 %v2397_v43, %v2540_v4  ;;  %v441_v45 = vrot.slane %v2800_v12, 1 }
  0x29   : > { %3762 = vst [vmem:[#allocation18_spill] sm:$0xff] %v2800_v12  ;;  %1507 = vmatpush.bf16.msra.mxu2 %v1498_v26  ;;  %v1368_v47 = vand.u32 %v2363_v44, %v2540_v4  ;;  %v1775_v42 = vand.u32 %v2414_v51, %v2540_v4  ;;  %v442_v26 = vrot.slane %v2803_v16, 1  ;;  %v444_v43 = vrot.slane %v2806_v23, 1 }
  0x2a   : > { %2289 = vmatmul.msk.bf16.gmra.mxu2 %vm496_vm3, %v2689_v24  ;;  %3763 = vst [vmem:[#allocation19_spill] sm:$0xff] %v2803_v16  ;;  %1647 = vmatpush.bf16.msra.mxu3 %v1638_v9  ;;  %v403_v4 = vsel %vm365_vm2, %v401_v6, %v402_v10  ;;  %v405_v51 = vsel %vm365_vm2, %v402_v10, %v404_v11  ;;  %v381_v44 = vrot.slane %v2827_v59, 1  ;;  %v382_v25 = vrot.slane %v2830_v55, 1 }
  0x2b   : > { %2293 = vmatmul.msk.bf16.gmra.mxu3 %vm496_vm3, %v2693_v28  ;;  %v424_v28 = vrot.slane %v2792_v8, 1  ;;  %1377 = vmatpush.bf16.msra.mxu1 %v1368_v47  ;;  %v384_v21 = vrot.slane %v2833_v30, 1  ;;  %v2845_v16 = vpack.c.bf16 %v405_v51, %v403_v4  ;;  %v443_v9 = vsel %vm365_vm2, %v441_v45, %v442_v26 }
  0x2c   : > { %2281 = vmatmul.msk.bf16.gmra.mxu0 %vm496_vm3, %v2697_v29  ;;  %v445_v47 = vsel %vm365_vm2, %v442_v26, %v444_v43  ;;  %v785_v45 = vrot.slane %v2612_v37, 2  ;;  %v301_v26 = vpack.c.bf16 %v2670_v1, %v2664_v61  ;;  %v787_v37 = vrot.slane %v2664_v61, 2 }
  0x2d   : > { %1784 = vmatpush.bf16.msra.mxu0 %v1775_v42  ;;  %v425_v12 = vsel %vm365_vm2, %v422_v60, %v424_v28  ;;  %3764 = vst [vmem:[#allocation20_spill] sm:$0xff] %v2845_v16  ;;  %v383_v42 = vsel %vm365_vm2, %v381_v44, %v382_v25  ;;  %v385_v10 = vsel %vm365_vm2, %v382_v25, %v384_v21  ;;  %v782_v21 = vrot.slane %v2601_v31, 2 }
  0x2e   : > { %v2853_v11 = vpack.c.bf16 %v445_v47, %v443_v9  ;;  %v783_v25 = vrot.slane %v2604_v32, 2  ;;  %v788_v43 = vrot.slane %v2670_v1, 2  ;;  %v790_v4 = vrot.slane %v2673_v2, 2 }
  0x2f   : > { %v2888_v44 = vpack.c.bf16 %v2742_v63, %v2736_v56  ;;  %v792_v61 = vrot.slane %v2736_v56, 2  ;;  %v793_v1 = vrot.slane %v2742_v63, 2  ;;  %v795_v2 = vrot.slane %v2745_v0, 2 }
  0x30   : > { %3765 = vst [vmem:[#allocation21_spill] sm:$0xff] %v2853_v11  ;;  %v786_v28 = vsel %vm781_vm4, %v783_v25, %v785_v45  ;;  %v797_v56 = vrot.slane %v2827_v59, 2  ;;  %v798_v63 = vrot.slane %v2830_v55, 2  ;;  %v800_v0 = vrot.slane %v2833_v30, 2 }
  0x31   : > { %v796_v9 = vsel %vm781_vm4, %v793_v1, %v795_v2  ;;  %v802_v30 = vrot.slane %v2565_v13, 2 }
  0x32   : > { %v801_v45 = vsel %vm781_vm4, %v798_v63, %v800_v0 }
  0x38   : > { %2286 = vmatmul.msk.bf16.gmra.mxu1 %vm496_vm3, %v2757_v18 }
  0x3a   : > { %2290 = vmatmul.msk.bf16.gmra.mxu2 %vm496_vm3, %v2761_v27 }
  0x3b   : > { %2294 = vmatmul.msk.bf16.gmra.mxu3 %vm496_vm3, %v2765_v46  ;;  %v421_v46 = vrot.slane %v2783_v5, 1 }
  0x3c   : > { %2282 = vmatmul.msk.bf16.gmra.mxu0 %vm496_vm3, %v2772_v58 }
  0x3d   : > { %v423_v8 = vsel %vm365_vm2, %v421_v46, %v422_v60  ;;  %v2857_v46 = vpack.c.bf16 %v385_v10, %v383_v42  ;;  %v784_v60 = vsel %vm781_vm4, %v782_v21, %v783_v25  ;;  %v2906_v42 = vpack.c.bf16 %v2830_v55, %v2827_v59 }
  0x3e   : > { %v2849_v6 = vpack.c.bf16 %v425_v12, %v423_v8  ;;  %v300_v8 = vpack.c.bf16 %v2604_v32, %v2601_v31  ;;  %v894_v12 = vpack.c.bf16 %v786_v28, %v784_v60  ;;  %v789_v31 = vsel %vm781_vm4, %v787_v37, %v788_v43 }
  0x3f   : > { %v791_v32 = vsel %vm781_vm4, %v788_v43, %v790_v4  ;;  %v799_v10 = vsel %vm781_vm4, %v797_v56, %v798_v63  ;;  %v2925_v25 = vpack.c.bf16 %v2568_v14, %v2565_v13  ;;  %v803_v55 = vrot.slane %v2568_v14, 2 }
  0x40   : > { %v2884_v51 = vpack.c.bf16 %v791_v32, %v789_v31  ;;  %v2921_v21 = vpack.c.bf16 %v801_v45, %v799_v10  ;;  %v805_v59 = vrot.slane %v2571_v15, 2  ;;  %v807_v43 = vrot.slane %v2631_v48, 2 }
  0x41   : > { %v804_v60 = vsel %vm781_vm4, %v802_v30, %v803_v55  ;;  %v808_v4 = vrot.slane %v2634_v49, 2  ;;  %v810_v31 = vrot.slane %v2637_v50, 2  ;;  %v812_v10 = vrot.slane %v2702_v34, 2 }
  0x42   : > { %v806_v28 = vsel %vm781_vm4, %v803_v55, %v805_v59  ;;  %v813_v45 = vrot.slane %v2705_v35, 2  ;;  %v815_v30 = vrot.slane %v2708_v36, 2 }
  0x44   : > { %v814_v59 = vsel %vm781_vm4, %v812_v10, %v813_v45  ;;  %v817_v10 = vrot.slane %v2770_v57, 2 }
  0x48   : > { %2287 = vmatmul.msk.bf16.gmra.mxu1 %vm496_vm3, %v2845_v16 }
  0x4a   : > { %2291 = vmatmul.msk.bf16.gmra.mxu2 %vm496_vm3, %v2849_v6 }
  0x4b   : > { %2295 = vmatmul.msk.bf16.gmra.mxu3 %vm496_vm3, %v2853_v11 }
  0x4c   : > { %2283 = vmatmul.msk.bf16.gmra.mxu0 %vm496_vm3, %v2857_v46 }
  0x58   : > { %2296 = vmatmul.msk.bf16.vlgmr.msrb.gmra.mxu1 %vm496_vm3, %v300_v8 }
  0x5a   : > { %2313 = vmatmul.msk.bf16.vlgmr.msrb.gmra.mxu2 %vm496_vm3, %v894_v12  ;;  %v2942_v12 = vpack.c.bf16 %v806_v28, %v804_v60  ;;  %v816_v60 = vsel %vm781_vm4, %v813_v45, %v815_v30  ;;  %v818_v45 = vrot.slane %v2775_v62, 2  ;;  %v820_v30 = vrot.slane %v2778_v3, 2 }
  0x5b   : > { %2330 = vmatmul.msk.bf16.vlgmr.msrb.gmra.mxu3 %vm496_vm3, %v301_v26 }
  0x5c   : > { %2347 = vmatmul.msk.bf16.vlgmr.msrb.gmra.mxu0 %vm496_vm3, %v2697_v29  ;;  %v794_v29 = vsel %vm781_vm4, %v792_v61, %v793_v1  ;;  %v809_v61 = vsel %vm781_vm4, %v807_v43, %v808_v4  ;;  %v811_v1 = vsel %vm781_vm4, %v808_v4, %v810_v31  ;;  %v3012_v31 = vpack.c.bf16 %v816_v60, %v814_v59 }
  0x5d   : > { %v2902_v47 = vpack.c.bf16 %v796_v9, %v794_v29  ;;  %v2977_v56 = vpack.c.bf16 %v811_v1, %v809_v61  ;;  %v819_v60 = vsel %vm781_vm4, %v817_v10, %v818_v45 }
  0x5e   : > { %3772 = vst [vmem:[#allocation28_spill] sm:$0xff] %v3012_v31 }
  0x5f   : > { %3768 = vst [vmem:[#allocation24_spill] sm:$0xff] %v2977_v56 }
  0x68   : > { %2297 = vmatmul.msk.bf16.gmra.mxu1 %vm496_vm3, %v301_v26  ;;  %v2946_v26 = vpack.c.bf16 %v2634_v49, %v2631_v48  ;;  %v2981_v48 = vpack.c.bf16 %v2705_v35, %v2702_v34  ;;  %v3016_v34 = vpack.c.bf16 %v2775_v62, %v2770_v57  ;;  %v3051_v57 = vpack.c.bf16 %v2580_v20, %v2577_v19 }
  0x6a   : > { %2314 = vmatmul.msk.bf16.gmra.mxu2 %vm496_vm3, %v2884_v51  ;;  %3769 = vst [vmem:[#allocation25_spill] sm:$0xff] %v2981_v48 }
  0x6b   : > { %2331 = vmatmul.msk.bf16.gmra.mxu3 %vm496_vm3, %v2888_v44  ;;  %3773 = vst [vmem:[#allocation29_spill] sm:$0xff] %v3016_v34 }
  0x6c   : > { %2348 = vmatmul.msk.bf16.gmra.mxu0 %vm496_vm3, %v2772_v58  ;;  %3777 = vst [vmem:[#allocation33_spill] sm:$0xff] %v3051_v57 }
  0x78   : > { %2298 = vmatmul.msk.bf16.gmra.mxu1 %vm496_vm3, %v2888_v44 }
  0x7a   : > { %2315 = vmatmul.msk.bf16.gmra.mxu2 %vm496_vm3, %v2902_v47 }
  0x7b   : > { %2332 = vmatmul.msk.bf16.gmra.mxu3 %vm496_vm3, %v2906_v42 }
  0x7c   : > { %2349 = vmatmul.msk.bf16.gmra.mxu0 %vm496_vm3, %v2857_v46 }
  0x88   : > { %2299 = vmatmul.msk.bf16.gmra.mxu1 %vm496_vm3, %v2906_v42 }
  0x8a   : > { %2316 = vmatmul.msk.bf16.gmra.mxu2 %vm496_vm3, %v2921_v21 }
  0x8b   : > { %2333 = vmatmul.msk.bf16.gmra.mxu3 %vm496_vm3, %v2925_v25 }
  0x8c   : > { %2350 = vmatmul.msk.bf16.gmra.mxu0 %vm496_vm3, %v2606_v33 }
  0x95   : > { %v2940_v8 = vpop.f32.mrf.mxu1 }
  0x98   : > { %2300 = vmatmul.msk.bf16.gmra.mxu1 %vm496_vm3, %v2925_v25 }
  0x99   : > { %v2950_v13 = vpop.f32.mrf.mxu0 }
  0x9a   : > { %2317 = vmatmul.msk.bf16.gmra.mxu2 %vm496_vm3, %v2942_v12 }
  0x9b   : > { %2334 = vmatmul.msk.bf16.gmra.mxu3 %vm496_vm3, %v2946_v26 }
  0x9c   : > { %2351 = vmatmul.msk.bf16.gmra.mxu0 %vm496_vm3, %v2685_v17 }
  0x9d   : > { %v2958_v14 = vpop.f32.mrf.mxu2  ;;  %v2960_v15 = vpop.f32.mrf.mxu1 }
  0x9e   : > { %v2962_v37 = vpop.f32.mrf.mxu3 }
  0x9f   : > { %3766 = vst [vmem:[#allocation22_spill] sm:$0xff] %v2962_v37 }
  0xa1   : > { %v2967_v32 = vpop.f32.mrf.mxu0 }
  0xa5   : > { %v2971_v2 = vpop.f32.mrf.mxu2  ;;  %v2973_v29 = vpop.f32.mrf.mxu1 }
  0xa6   : > { %v2975_v9 = vpop.f32.mrf.mxu3 }
  0xa7   : > { %3767 = vst [vmem:[#allocation23_spill] sm:$0xff] %v2975_v9 }
  0xa8   : > { %2301 = vmatmul.msk.bf16.gmra.mxu1 %vm496_vm3, %v2946_v26 }
  0xa9   : > { %v2985_v49 = vpop.f32.mrf.mxu0 }
  0xaa   : > { %2318 = vmatmul.msk.bf16.gmra.mxu2 %vm496_vm3, %v2977_v56 }
  0xab   : > { %2335 = vmatmul.msk.bf16.gmra.mxu3 %vm496_vm3, %v2981_v48 }
  0xac   : > { %2352 = vmatmul.msk.bf16.gmra.mxu0 %vm496_vm3, %v2757_v18 }
  0xad   : > { %v2993_v50 = vpop.f32.mrf.mxu2  ;;  %v2995_v63 = vpop.f32.mrf.mxu1 }
  0xae   : > { %v2997_v0 = vpop.f32.mrf.mxu3 }
  0xaf   : > { %3770 = vst [vmem:[#allocation26_spill] sm:$0xff] %v2997_v0 }
  0xb1   : > { %v3002_v55 = vpop.f32.mrf.mxu0 }
  0xb5   : > { %v3006_v28 = vpop.f32.mrf.mxu2  ;;  %v3008_v43 = vpop.f32.mrf.mxu1 }
  0xb6   : > { %v3010_v4 = vpop.f32.mrf.mxu3 }
  0xb7   : > { %3771 = vst [vmem:[#allocation27_spill] sm:$0xff] %v3010_v4  ;;  %v821_v4 = vsel %vm781_vm4, %v818_v45, %v820_v30  ;;  %v825_v45 = vrot.slane %v2586_v22, 2  ;;  %v822_v30 = vrot.slane %v2577_v19, 2  ;;  %v3085_v19 = vpack.c.bf16 %v2645_v53, %v2642_v52 }
  0xb8   : > { %2302 = vmatmul.msk.bf16.gmra.mxu1 %vm496_vm3, %v2981_v48 }
  0xb9   : > { %v3020_v35 = vpop.f32.mrf.mxu0 }
  0xba   : > { %2319 = vmatmul.msk.bf16.gmra.mxu2 %vm496_vm3, %v3012_v31  ;;  %v3047_v31 = vpack.c.bf16 %v821_v4, %v819_v60  ;;  %v823_v60 = vrot.slane %v2580_v20, 2 }
  0xbb   : > { %2336 = vmatmul.msk.bf16.gmra.mxu3 %vm496_vm3, %v3016_v34 }
  0xbc   : > { %2353 = vmatmul.msk.bf16.gmra.mxu0 %vm496_vm3, %v2845_v16  ;;  %3776 = vst [vmem:[#allocation32_spill] sm:$0xff] %v3047_v31 }
  0xbd   : > { %v3028_v36 = vpop.f32.mrf.mxu2  ;;  %v3030_v61 = vpop.f32.mrf.mxu1 }
  0xbe   : > { %v3032_v1 = vpop.f32.mrf.mxu3 }
  0xbf   : > { %3774 = vst [vmem:[#allocation30_spill] sm:$0xff] %v3032_v1  ;;  %v824_v1 = vsel %vm781_vm4, %v822_v30, %v823_v60  ;;  %v827_v30 = vrot.slane %v2642_v52, 2  ;;  %v3108_v52 = vpack.c.bf16 %v2716_v39, %v2713_v38 }
  0xc1   : > { %v3037_v59 = vpop.f32.mrf.mxu0 }
  0xc5   : > { %v3041_v0 = vpop.f32.mrf.mxu2  ;;  %v3043_v16 = vpop.f32.mrf.mxu1 }
  0xc6   : > { %v3045_v9 = vpop.f32.mrf.mxu3 }
  0xc7   : > { %3775 = vst [vmem:[#allocation31_spill] sm:$0xff] %v3045_v9 }
  0xc8   : > { %2303 = vmatmul.msk.bf16.gmra.mxu1 %vm496_vm3, %v3016_v34 }
  0xc9   : > { %v3055_v62 = vpop.f32.mrf.mxu0 }
  0xca   : > { %2320 = vmatmul.msk.bf16.gmra.mxu2 %vm496_vm3, %v3047_v31  ;;  %v826_v31 = vsel %vm781_vm4, %v823_v60, %v825_v45  ;;  %v830_v45 = vrot.slane %v2648_v54, 2  ;;  %v828_v60 = vrot.slane %v2645_v53, 2 }
  0xcb   : > { %2337 = vmatmul.msk.bf16.gmra.mxu3 %vm496_vm3, %v3051_v57 }
  0xcc   : > { %2354 = vmatmul.msk.bf16.gmra.mxu0 %vm496_vm3, %v2619_v41  ;;  %v829_v48 = vsel %vm781_vm4, %v827_v30, %v828_v60 }
  0xcd   : > { %v3063_v3 = vpop.f32.mrf.mxu2  ;;  %v3065_v4 = vpop.f32.mrf.mxu1 }
  0xce   : > { %v3067_v10 = vpop.f32.mrf.mxu3 }
  0xcf   : > { %3778 = vst [vmem:[#allocation34_spill] sm:$0xff] %v3067_v10  ;;  %v3081_v10 = vpack.c.bf16 %v826_v31, %v824_v1 }
  0xd1   : > { %v3072_v9 = vpop.f32.mrf.mxu0  ;;  %3781 = vst [vmem:[#allocation37_spill] sm:$0xff] %v3081_v10 }
  0xd5   : > { %v3076_v34 = vpop.f32.mrf.mxu2  ;;  %v701_v41 = vpop.f32.mrf.mxu1 }
  0xd6   : > { %3779 = vst [vmem:[#allocation35_spill] sm:$0xff] %v3076_v34  ;;  %v3078_v37 = vpop.f32.mrf.mxu3  ;;  %v702_v18 = vadd.f32 %v701_v41, %v2950_v13 }
  0xd7   : > { %3780 = vst [vmem:[#allocation36_spill] sm:$0xff] %v3078_v37 }
  0xd8   : > { %2304 = vmatmul.msk.bf16.gmra.mxu1 %vm496_vm3, %v3051_v57 }
  0xd9   : > { %v1242_v20 = vpop.f32.mrf.mxu0 }
  0xda   : > { %2321 = vmatmul.msk.bf16.gmra.mxu2 %vm496_vm3, %v3081_v10 }
  0xdb   : > { %2338 = vmatmul.msk.bf16.gmra.mxu3 %vm496_vm3, %v3085_v19 }
  0xdc   : > { %2355 = vmatmul.msk.bf16.gmra.mxu0 %vm496_vm3, %v2689_v24  ;;  %v831_v24 = vsel %vm781_vm4, %v828_v60, %v830_v45 }
  0xdd   : > { %v972_v22 = vpop.f32.mrf.mxu2  ;;  %v703_v41 = vpop.f32.mrf.mxu1 }
  0xde   : > { %v1052_v13 = vadd.f32 %v972_v22, %v702_v18  ;;  %v1102_v31 = vpop.f32.mrf.mxu3  ;;  %v704_v1 = vadd.f32 %v703_v41, %v2967_v32  ;;  %v3104_v41 = vpack.c.bf16 %v831_v24, %v829_v48 }
  0xe0   : > { %v1182_v37 = vadd.f32 %v1102_v31, %v1052_v13  ;;  %v832_v13 = vrot.slane %v2713_v38, 2  ;;  %v833_v31 = vrot.slane %v2716_v39, 2  ;;  %v3133_v38 = vpack.c.bf16 %v2789_v7, %v2783_v5 }
  0xe1   : > { %v1244_v10 = vpop.f32.mrf.mxu0 }
  0xe2   : > { %v3099_v57 = vadd.f32 %v1242_v20, %v1182_v37  ;;  %v835_v20 = vrot.slane %v2719_v40, 2  ;;  %v834_v30 = vsel %vm781_vm4, %v832_v13, %v833_v31 }
  0xe4   : > { %v836_v60 = vsel %vm781_vm4, %v833_v31, %v835_v20  ;;  %v3782_v20 = vld [vmem:[#allocation17_spill] sm:$0xff]  ;;  %v837_v31 = vrot.slane %v2783_v5, 2  ;;  %v3785_v5 = vld [vmem:[#allocation3_spill] sm:$0xff] }
  0xe5   : > { %v974_v34 = vpop.f32.mrf.mxu2  ;;  %v706_v56 = vpop.f32.mrf.mxu1  ;;  %v840_v13 = vrot.slane %v3782_v20, 2 }
  0xe6   : > { %v1053_v18 = vadd.f32 %v974_v34, %v704_v1  ;;  %v1104_v22 = vpop.f32.mrf.mxu3  ;;  %v707_v32 = vadd.f32 %v706_v56, %v2985_v49 }
  0xe8   : > { %v1183_v53 = vadd.f32 %v1104_v22, %v1053_v18  ;;  %2305 = vmatmul.msk.bf16.gmra.mxu1 %vm496_vm3, %v3085_v19 }
  0xe9   : > { %v1247_v54 = vpop.f32.mrf.mxu0 }
  0xea   : > { %2322 = vmatmul.msk.bf16.gmra.mxu2 %vm496_vm3, %v3104_v41  ;;  %v3114_v37 = vadd.f32 %v1244_v10, %v1183_v53 }
  0xeb   : > { %2339 = vmatmul.msk.bf16.gmra.mxu3 %vm496_vm3, %v3108_v52 }
  0xec   : > { %2356 = vmatmul.msk.bf16.gmra.mxu0 %vm496_vm3, %v2761_v27 }
  0xed   : > { %v977_v24 = vpop.f32.mrf.mxu2  ;;  %v708_v56 = vpop.f32.mrf.mxu1 }
  0xee   : > { %v1054_v48 = vadd.f32 %v977_v24, %v707_v32  ;;  %v1107_v49 = vpop.f32.mrf.mxu3  ;;  %v709_v34 = vadd.f32 %v708_v56, %v3002_v55  ;;  %v3129_v24 = vpack.c.bf16 %v836_v60, %v834_v30 }
  0xf0   : > { %v1184_v10 = vadd.f32 %v1107_v49, %v1054_v48 }
  0xf1   : > { %v1249_v1 = vpop.f32.mrf.mxu0 }
  0xf2   : > { %v3124_v45 = vadd.f32 %v1247_v54, %v1184_v10  ;;  %v838_v10 = vrot.slane %v2789_v7, 2 }
  0xf5   : > { %v979_v18 = vpop.f32.mrf.mxu2  ;;  %v711_v22 = vpop.f32.mrf.mxu1 }
  0xf6   : > { %v1055_v32 = vadd.f32 %v979_v18, %v709_v34  ;;  %v1109_v53 = vpop.f32.mrf.mxu3  ;;  %v712_v55 = vadd.f32 %v711_v22, %v3020_v35  ;;  %v839_v18 = vsel %vm781_vm4, %v837_v31, %v838_v10  ;;  %v841_v22 = vsel %vm781_vm4, %v838_v10, %v840_v13 }
  0xf8   : > { %v1185_v39 = vadd.f32 %v1109_v53, %v1055_v32  ;;  %2306 = vmatmul.msk.bf16.gmra.mxu1 %vm496_vm3, %v3108_v52 }
  0xf9   : > { %v1252_v40 = vpop.f32.mrf.mxu0 }
  0xfa   : > { %2323 = vmatmul.msk.bf16.gmra.mxu2 %vm496_vm3, %v3129_v24  ;;  %v3139_v54 = vadd.f32 %v1249_v1, %v1185_v39 }
  0xfb   : > { %2340 = vmatmul.msk.bf16.gmra.mxu3 %vm496_vm3, %v3133_v38 }
  0xfc   : > { %2357 = vmatmul.msk.bf16.gmra.mxu0 %vm496_vm3, %v2849_v6 }
  0xfd   : > { %v982_v35 = vpop.f32.mrf.mxu2  ;;  %v713_v56 = vpop.f32.mrf.mxu1 }
  0xfe   : > { %v1056_v48 = vadd.f32 %v982_v35, %v712_v55  ;;  %v1112_v49 = vpop.f32.mrf.mxu3  ;;  %v714_v34 = vadd.f32 %v713_v56, %v3037_v59  ;;  %v3154_v35 = vpack.c.bf16 %v841_v22, %v839_v18  ;;  %v3784_v56 = vld [vmem:[#allocation2_spill] sm:$0xff] }
  0xff   : > { %v3158_v20 = vpack.c.bf16 %v3785_v5, %v3784_v56  ;;  %v842_v22 = vrot.slane %v3784_v56, 2 }
 0x100   : > { %v1186_v1 = vadd.f32 %v1112_v49, %v1056_v48 }
 0x101   : > { %v1254_v30 = vpop.f32.mrf.mxu0 }
 0x102   : > { %v3149_v60 = vadd.f32 %v1252_v40, %v1186_v1  ;;  %v3788_v1 = vld [vmem:[#allocation4_spill] sm:$0xff] }
 0x103   : > { %v845_v18 = vrot.slane %v3788_v1, 2 }
 0x104   : > { %3783 = vst [vmem:[#allocation17_spill] sm:$0xff] %v3149_v60 }
 0x105   : > { %v984_v32 = vpop.f32.mrf.mxu2  ;;  %v716_v53 = vpop.f32.mrf.mxu1 }
 0x106   : > { %v1057_v55 = vadd.f32 %v984_v32, %v714_v34  ;;  %v1114_v39 = vpop.f32.mrf.mxu3  ;;  %v717_v59 = vadd.f32 %v716_v53, %v3055_v62  ;;  %v3787_v62 = vld [vmem:[#allocation6_spill] sm:$0xff]  ;;  %v843_v32 = vrot.slane %v3785_v5, 2 }
 0x108   : > { %v1187_v7 = vadd.f32 %v1114_v39, %v1057_v55  ;;  %2307 = vmatmul.msk.bf16.gmra.mxu1 %vm496_vm3, %v3133_v38  ;;  %v844_v39 = vsel %vm781_vm4, %v842_v22, %v843_v32 }
 0x109   : > { %v1257_v40 = vpop.f32.mrf.mxu0 }
 0x10a   : > { %2324 = vmatmul.msk.bf16.gmra.mxu2 %vm496_vm3, %v3154_v35  ;;  %v3164_v48 = vadd.f32 %v1254_v30, %v1187_v7  ;;  %v846_v7 = vsel %vm781_vm4, %v843_v32, %v845_v18  ;;  %v3795_v32 = vld [vmem:[#allocation9_spill] sm:$0xff] }
 0x10b   : > { %2341 = vmatmul.msk.bf16.gmra.mxu3 %vm496_vm3, %v3158_v20 }
 0x10c   : > { %3786 = vst [vmem:[#allocation2_spill] sm:$0xff] %v3164_v48  ;;  %2358 = vmatmul.msk.bf16.gmra.mxu0 %vm496_vm3, %v3787_v62  ;;  %v3178_v62 = vpack.c.bf16 %v846_v7, %v844_v39 }
 0x10d   : > { %v987_v49 = vpop.f32.mrf.mxu2  ;;  %v718_v34 = vpop.f32.mrf.mxu1 }
 0x10e   : > { %v1058_v13 = vadd.f32 %v987_v49, %v717_v59  ;;  %v1117_v31 = vpop.f32.mrf.mxu3  ;;  %v719_v10 = vadd.f32 %v718_v34, %v3072_v9  ;;  %3790 = vst [vmem:[#allocation4_spill] sm:$0xff] %v3178_v62  ;;  %v3791_v9 = vld [vmem:[#allocation7_spill] sm:$0xff]  ;;  %v3792_v34 = vld [vmem:[#allocation8_spill] sm:$0xff] }
 0x10f   : > { %v3182_v1 = vpack.c.bf16 %v3792_v34, %v3791_v9  ;;  %v847_v39 = vrot.slane %v3791_v9, 2  ;;  %v848_v7 = vrot.slane %v3792_v34, 2  ;;  %v3798_v9 = vld [vmem:[#allocation13_spill] sm:$0xff] }
 0x110   : > { %v1188_v30 = vadd.f32 %v1117_v31, %v1058_v13  ;;  %v3794_v13 = vld [vmem:[#allocation11_spill] sm:$0xff] }
 0x111   : > { %v1259_v53 = vpop.f32.mrf.mxu0 }
 0x112   : > { %v3174_v55 = vadd.f32 %v1257_v40, %v1188_v30  ;;  %v850_v30 = vrot.slane %v3795_v32, 2  ;;  %v3797_v32 = vld [vmem:[#allocation12_spill] sm:$0xff] }
 0x114   : > { %3789 = vst [vmem:[#allocation3_spill] sm:$0xff] %v3174_v55 }
 0x115   : > { %v989_v48 = vpop.f32.mrf.mxu2  ;;  %v721_v60 = vpop.f32.mrf.mxu1 }
 0x116   : > { %v1059_v59 = vadd.f32 %v989_v48, %v719_v10  ;;  %v1119_v49 = vpop.f32.mrf.mxu3  ;;  %v722_v48 = vadd.f32 %v721_v60, %v2940_v8  ;;  %v851_v8 = vsel %vm781_vm4, %v848_v7, %v850_v30 }
 0x118   : > { %v1189_v56 = vadd.f32 %v1119_v49, %v1059_v59  ;;  %2308 = vmatmul.msk.bf16.gmra.mxu1 %vm496_vm3, %v3158_v20 }
 0x119   : > { %v1262_v5 = vpop.f32.mrf.mxu0 }
 0x11a   : > { %2325 = vmatmul.msk.bf16.gmra.mxu2 %vm496_vm3, %v3178_v62  ;;  %v3188_v40 = vadd.f32 %v1259_v53, %v1189_v56  ;;  %v849_v56 = vsel %vm781_vm4, %v847_v39, %v848_v7  ;;  %v3207_v62 = vpack.c.bf16 %v3798_v9, %v3797_v32  ;;  %v3801_v7 = vld [vmem:[#allocation14_spill] sm:$0xff] }
 0x11b   : > { %2342 = vmatmul.msk.bf16.gmra.mxu3 %vm496_vm3, %v3182_v1 }
 0x11c   : > { %3793 = vst [vmem:[#allocation7_spill] sm:$0xff] %v3188_v40  ;;  %2359 = vmatmul.msk.bf16.gmra.mxu0 %vm496_vm3, %v3794_v13  ;;  %v3203_v13 = vpack.c.bf16 %v851_v8, %v849_v56  ;;  %v852_v56 = vrot.slane %v3797_v32, 2  ;;  %v853_v8 = vrot.slane %v3798_v9, 2  ;;  %v3804_v32 = vld [vmem:[#allocation19_spill] sm:$0xff] }
 0x11d   : > { %v992_v31 = vpop.f32.mrf.mxu2  ;;  %v723_v10 = vpop.f32.mrf.mxu1 }
 0x11e   : > { %v1060_v18 = vadd.f32 %v992_v31, %v722_v48  ;;  %v1122_v22 = vpop.f32.mrf.mxu3  ;;  %v724_v60 = vadd.f32 %v723_v10, %v2960_v15 }
 0x120   : > { %v1190_v53 = vadd.f32 %v1122_v22, %v1060_v18 }
 0x121   : > { %v1264_v59 = vpop.f32.mrf.mxu0 }
 0x122   : > { %v3198_v49 = vadd.f32 %v1262_v5, %v1190_v53  ;;  %v855_v53 = vrot.slane %v3801_v7, 2  ;;  %v3803_v7 = vld [vmem:[#allocation18_spill] sm:$0xff] }
 0x124   : > { %3796 = vst [vmem:[#allocation8_spill] sm:$0xff] %v3198_v49 }
 0x125   : > { %v994_v40 = vpop.f32.mrf.mxu2  ;;  %v726_v55 = vpop.f32.mrf.mxu1 }
 0x126   : > { %v1061_v48 = vadd.f32 %v994_v40, %v724_v60  ;;  %v1124_v31 = vpop.f32.mrf.mxu3  ;;  %v727_v15 = vadd.f32 %v726_v55, %v2973_v29  ;;  %v3800_v40 = vld [vmem:[#allocation16_spill] sm:$0xff]  ;;  %v856_v29 = vsel %vm781_vm4, %v853_v8, %v855_v53  ;;  %v860_v53 = vrot.slane %v2806_v23, 2 }
 0x128   : > { %v1191_v34 = vadd.f32 %v1124_v31, %v1061_v48  ;;  %2309 = vmatmul.msk.bf16.gmra.mxu1 %vm496_vm3, %v3182_v1  ;;  %v854_v31 = vsel %vm781_vm4, %v852_v56, %v853_v8 }
 0x129   : > { %v1267_v5 = vpop.f32.mrf.mxu0  ;;  %v3228_v49 = vpack.c.bf16 %v856_v29, %v854_v31  ;;  %v858_v31 = vrot.slane %v3804_v32, 2  ;;  %v3252_v29 = vld [vmem:[%s2562_s6 + $0x188] sm:$0xff] }
 0x12a   : > { %2326 = vmatmul.msk.bf16.gmra.mxu2 %vm496_vm3, %v3203_v13  ;;  %v3213_v18 = vadd.f32 %v1264_v59, %v1191_v34 }
 0x12b   : > { %2343 = vmatmul.msk.bf16.gmra.mxu3 %vm496_vm3, %v3207_v62 }
 0x12c   : > { %3799 = vst [vmem:[#allocation9_spill] sm:$0xff] %v3213_v18  ;;  %2360 = vmatmul.msk.bf16.gmra.mxu0 %vm496_vm3, %v3800_v40  ;;  %v3232_v40 = vpack.c.bf16 %v3804_v32, %v3803_v7  ;;  %v861_v32 = vsel %vm781_vm4, %v858_v31, %v860_v53 }
 0x12d   : > { %v997_v10 = vpop.f32.mrf.mxu2  ;;  %v728_v22 = vpop.f32.mrf.mxu1 }
 0x12e   : > { %v1062_v30 = vadd.f32 %v997_v10, %v727_v15  ;;  %v1127_v39 = vpop.f32.mrf.mxu3  ;;  %v729_v55 = vadd.f32 %v728_v22, %v2995_v63 }
 0x130   : > { %v1192_v59 = vadd.f32 %v1127_v39, %v1062_v30 }
 0x131   : > { %v1269_v60 = vpop.f32.mrf.mxu0 }
 0x132   : > { %v3223_v48 = vadd.f32 %v1267_v5, %v1192_v59  ;;  %v857_v59 = vrot.slane %v3803_v7, 2 }
 0x134   : > { %3802 = vst [vmem:[#allocation12_spill] sm:$0xff] %v3223_v48  ;;  %v859_v7 = vsel %vm781_vm4, %v857_v59, %v858_v31 }
 0x135   : > { %v999_v34 = vpop.f32.mrf.mxu2  ;;  %v731_v18 = vpop.f32.mrf.mxu1 }
 0x136   : > { %v1063_v15 = vadd.f32 %v999_v34, %v729_v55  ;;  %v1129_v10 = vpop.f32.mrf.mxu3  ;;  %v732_v22 = vadd.f32 %v731_v18, %v3008_v43  ;;  %v3255_v55 = vld [vmem:[%s2562_s6 + $0x190] sm:$0x3] }
 0x137   : > { %v1220_v23 = vrot.slane %v3255_v55, 1 }
 0x138   : > { %v1193_v9 = vadd.f32 %v1129_v10, %v1063_v15  ;;  %2310 = vmatmul.msk.bf16.gmra.mxu1 %vm496_vm3, %v3207_v62  ;;  %v1218_v15 = vrot.slane %v3252_v29, 1 }
 0x139   : > { %v1272_v5 = vpop.f32.mrf.mxu0 }
 0x13a   : > { %2327 = vmatmul.msk.bf16.gmra.mxu2 %vm496_vm3, %v3228_v49  ;;  %v3238_v63 = vadd.f32 %v1269_v60, %v1193_v9  ;;  %v3249_v60 = vld [vmem:[%s2562_s6 + $0x180] sm:$0xff] }
 0x13b   : > { %2344 = vmatmul.msk.bf16.gmra.mxu3 %vm496_vm3, %v3232_v40  ;;  %v1217_v34 = vrot.slane %v3249_v60, 1 }
 0x13c   : > { %3805 = vst [vmem:[#allocation13_spill] sm:$0xff] %v3238_v63  ;;  %2361 = vmatmul.msk.bf16.gmra.mxu0 %vm496_vm3, %v2853_v11  ;;  %v1221_v11 = vsel %vm365_vm2, %v1218_v15, %v1220_v23 }
 0x13d   : > { %v1002_v30 = vpop.f32.mrf.mxu2  ;;  %v733_v39 = vpop.f32.mrf.mxu1 }
 0x13e   : > { %v1064_v56 = vadd.f32 %v1002_v30, %v732_v22  ;;  %v1132_v8 = vpop.f32.mrf.mxu3  ;;  %v734_v9 = vadd.f32 %v733_v39, %v3030_v61 }
 0x140   : > { %v1194_v43 = vadd.f32 %v1132_v8, %v1064_v56  ;;  %v3265_v56 = vpack.c.bf16 %v861_v32, %v859_v7  ;;  %v1219_v8 = vsel %vm365_vm2, %v1217_v34, %v1218_v15 }
 0x141   : > { %v1274_v18 = vpop.f32.mrf.mxu0  ;;  %v3275_v53 = vpack.c.bf16 %v1221_v11, %v1219_v8 }
 0x142   : > { %v3260_v10 = vadd.f32 %v1272_v5, %v1194_v43  ;;  %v3271_v5 = vpack.c.bf16 %v3252_v29, %v3249_v60 }
 0x145   : > { %v1004_v22 = vpop.f32.mrf.mxu2  ;;  %v736_v30 = vpop.f32.mrf.mxu1 }
 0x146   : > { %v1065_v63 = vadd.f32 %v1004_v22, %v734_v9  ;;  %v1134_v48 = vpop.f32.mrf.mxu3  ;;  %v737_v59 = vadd.f32 %v736_v30, %v3043_v16 }
 0x148   : > { %v1195_v43 = vadd.f32 %v1134_v48, %v1065_v63  ;;  %2311 = vmatmul.msk.bf16.gmra.mxu1 %vm496_vm3, %v3232_v40 }
 0x149   : > { %v1277_v61 = vpop.f32.mrf.mxu0 }
 0x14a   : > { %2328 = vmatmul.msk.bf16.gmra.mxu2 %vm496_vm3, %v3265_v56  ;;  %v3279_v39 = vadd.f32 %v1274_v18, %v1195_v43 }
 0x14b   : > { %2345 = vmatmul.msk.bf16.gmra.mxu3 %vm496_vm3, %v3271_v5 }
 0x14c   : > { %2362 = vmatmul.msk.bf16.gmra.mxu0 %vm496_vm3, %v3275_v53 }
 0x14d   : > { %v1007_v48 = vpop.f32.mrf.mxu2  ;;  %v738_v63 = vpop.f32.mrf.mxu1 }
 0x14e   : > { %v1066_v31 = vadd.f32 %v1007_v48, %v737_v59  ;;  %v1137_v34 = vpop.f32.mrf.mxu3  ;;  %v739_v7 = vadd.f32 %v738_v63, %v3065_v4 }
 0x150   : > { %v1196_v11 = vadd.f32 %v1137_v34, %v1066_v31 }
 0x151   : > { %v1279_v15 = vpop.f32.mrf.mxu0 }
 0x152   : > { %v3286_v23 = vadd.f32 %v1277_v61, %v1196_v11 }
 0x155   : > { %v1009_v18 = vpop.f32.mrf.mxu2  ;;  %v741_v32 = vpop.f32.mrf.mxu1 }
 0x156   : > { %v1067_v9 = vadd.f32 %v1009_v18, %v739_v7  ;;  %v1139_v22 = vpop.f32.mrf.mxu3  ;;  %v742_v43 = vadd.f32 %v741_v32, %v2958_v14 }
 0x158   : > { %v1197_v8 = vadd.f32 %v1139_v22, %v1067_v9  ;;  %2364 = vmatmul.msk.bf16.vlgmr.msra.gmra.mxu1 %vm496_vm3, %v2884_v51 }
 0x159   : > { %v1282_v16 = vpop.f32.mrf.mxu0 }
 0x15a   : > { %2381 = vmatmul.msk.bf16.vlgmr.msra.gmra.mxu2 %vm496_vm3, %v2888_v44  ;;  %v3293_v30 = vadd.f32 %v1279_v15, %v1197_v8 }
 0x15b   : > { %2398 = vmatmul.msk.bf16.vlgmr.msra.gmra.mxu3 %vm496_vm3, %v2772_v58 }
 0x15c   : > { %2415 = vmatmul.msk.bf16.vlgmr.msra.gmra.mxu0 %vm496_vm3, %v2902_v47 }
 0x15d   : > { %v1012_v4 = vpop.f32.mrf.mxu2  ;;  %v743_v61 = vpop.f32.mrf.mxu1 }
 0x15e   : > { %v1068_v59 = vadd.f32 %v1012_v4, %v742_v43  ;;  %v1142_v48 = vpop.f32.mrf.mxu3  ;;  %v744_v44 = vadd.f32 %v743_v61, %v2971_v2 }
 0x160   : > { %v1198_v63 = vadd.f32 %v1142_v48, %v1068_v59 }
 0x161   : > { %v1284_v51 = vpop.f32.mrf.mxu0 }
 0x162   : > { %v3300_v31 = vadd.f32 %v1282_v16, %v1198_v63 }
 0x165   : > { %v1014_v34 = vpop.f32.mrf.mxu2  ;;  %v746_v11 = vpop.f32.mrf.mxu1 }
 0x166   : > { %v1069_v15 = vadd.f32 %v1014_v34, %v744_v44  ;;  %v1144_v7 = vpop.f32.mrf.mxu3  ;;  %v747_v32 = vadd.f32 %v746_v11, %v2993_v50 }
 0x168   : > { %v1199_v58 = vadd.f32 %v1144_v7, %v1069_v15  ;;  %2365 = vmatmul.msk.bf16.gmra.mxu1 %vm496_vm3, %v2902_v47 }
 0x169   : > { %v1287_v14 = vpop.f32.mrf.mxu0 }
 0x16a   : > { %2382 = vmatmul.msk.bf16.gmra.mxu2 %vm496_vm3, %v2906_v42  ;;  %v3307_v18 = vadd.f32 %v1284_v51, %v1199_v58 }
 0x16b   : > { %2399 = vmatmul.msk.bf16.gmra.mxu3 %vm496_vm3, %v2857_v46 }
 0x16c   : > { %2416 = vmatmul.msk.bf16.gmra.mxu0 %vm496_vm3, %v2921_v21 }
 0x16d   : > { %v1017_v2 = vpop.f32.mrf.mxu2  ;;  %v748_v9 = vpop.f32.mrf.mxu1 }
 0x16e   : > { %v1070_v22 = vadd.f32 %v1017_v2, %v747_v32  ;;  %v1147_v8 = vpop.f32.mrf.mxu3  ;;  %v749_v42 = vadd.f32 %v748_v9, %v3006_v28 }
 0x170   : > { %v1200_v16 = vadd.f32 %v1147_v8, %v1070_v22 }
 0x171   : > { %v1289_v47 = vpop.f32.mrf.mxu0 }
 0x172   : > { %v3314_v43 = vadd.f32 %v1287_v14, %v1200_v16 }
 0x175   : > { %v1019_v4 = vpop.f32.mrf.mxu2  ;;  %v751_v61 = vpop.f32.mrf.mxu1 }
 0x176   : > { %v1071_v59 = vadd.f32 %v1019_v4, %v749_v42  ;;  %v1149_v48 = vpop.f32.mrf.mxu3  ;;  %v752_v51 = vadd.f32 %v751_v61, %v3028_v36 }
 0x178   : > { %v1201_v46 = vadd.f32 %v1149_v48, %v1071_v59  ;;  %2366 = vmatmul.msk.bf16.gmra.mxu1 %vm496_vm3, %v2921_v21  ;;  %v3807_v59 = vld [vmem:[#allocation35_spill] sm:$0xff] }
 0x179   : > { %v1292_v50 = vpop.f32.mrf.mxu0 }
 0x17a   : > { %2383 = vmatmul.msk.bf16.gmra.mxu2 %vm496_vm3, %v2925_v25  ;;  %v3321_v63 = vadd.f32 %v1289_v47, %v1201_v46 }
 0x17b   : > { %2400 = vmatmul.msk.bf16.gmra.mxu3 %vm496_vm3, %v2606_v33 }
 0x17c   : > { %2417 = vmatmul.msk.bf16.gmra.mxu0 %vm496_vm3, %v2942_v12 }
 0x17d   : > { %v1022_v28 = vpop.f32.mrf.mxu2  ;;  %v753_v44 = vpop.f32.mrf.mxu1 }
 0x17e   : > { %v1072_v34 = vadd.f32 %v1022_v28, %v752_v51  ;;  %v1152_v11 = vpop.f32.mrf.mxu3  ;;  %v754_v25 = vadd.f32 %v753_v44, %v3041_v0  ;;  %v3806_v0 = vld [vmem:[#allocation24_spill] sm:$0xff]  ;;  %v3808_v28 = vld [vmem:[#allocation25_spill] sm:$0xff] }
 0x180   : > { %v1202_v15 = vadd.f32 %v1152_v11, %v1072_v34  ;;  %v3809_v34 = vld [vmem:[#allocation15_spill] sm:$0xff]  ;;  %v3810_v11 = vld [vmem:[#allocation22_spill] sm:$0xff] }
 0x181   : > { %v1294_v21 = vpop.f32.mrf.mxu0 }
 0x182   : > { %v3328_v7 = vadd.f32 %v1292_v50, %v1202_v15 }
 0x185   : > { %v1024_v58 = vpop.f32.mrf.mxu2  ;;  %v756_v14 = vpop.f32.mrf.mxu1 }
 0x186   : > { %v1073_v32 = vadd.f32 %v1024_v58, %v754_v25  ;;  %v1154_v2 = vpop.f32.mrf.mxu3  ;;  %v757_v22 = vadd.f32 %v756_v14, %v3063_v3 }
 0x188   : > { %v1203_v33 = vadd.f32 %v1154_v2, %v1073_v32  ;;  %2367 = vmatmul.msk.bf16.gmra.mxu1 %vm496_vm3, %v2942_v12 }
 0x189   : > { %v1297_v36 = vpop.f32.mrf.mxu0 }
 0x18a   : > { %2384 = vmatmul.msk.bf16.gmra.mxu2 %vm496_vm3, %v2946_v26  ;;  %v3335_v9 = vadd.f32 %v1294_v21, %v1203_v33  ;;  %v3811_v21 = vld [vmem:[#allocation28_spill] sm:$0xff] }
 0x18b   : > { %2401 = vmatmul.msk.bf16.gmra.mxu3 %vm496_vm3, %v2685_v17 }
 0x18c   : > { %2418 = vmatmul.msk.bf16.gmra.mxu0 %vm496_vm3, %v3806_v0 }
 0x18d   : > { %v1027_v8 = vpop.f32.mrf.mxu2  ;;  %v758_v16 = vpop.f32.mrf.mxu1 }
 0x18e   : > { %v1074_v47 = vadd.f32 %v1027_v8, %v757_v22  ;;  %v1157_v42 = vpop.f32.mrf.mxu3  ;;  %v759_v26 = vadd.f32 %v758_v16, %v3807_v59  ;;  %v3812_v22 = vld [vmem:[#allocation23_spill] sm:$0xff]  ;;  %v3813_v59 = vld [vmem:[#allocation29_spill] sm:$0xff] }
 0x190   : > { %v1204_v4 = vadd.f32 %v1157_v42, %v1074_v47 }
 0x191   : > { %v1299_v12 = vpop.f32.mrf.mxu0 }
 0x192   : > { %v3342_v61 = vadd.f32 %v1297_v36, %v1204_v4 }
 0x195   : > { %v1029_v48 = vpop.f32.mrf.mxu2  ;;  %v761_v46 = vpop.f32.mrf.mxu1 }
 0x196   : > { %v1075_v50 = vadd.f32 %v1029_v48, %v759_v26  ;;  %v1159_v51 = vpop.f32.mrf.mxu3  ;;  %v762_v15 = vadd.f32 %v761_v46, %v3810_v11  ;;  %v3814_v48 = vld [vmem:[#allocation20_spill] sm:$0xff]  ;;  %v3815_v46 = vld [vmem:[#allocation26_spill] sm:$0xff] }
 0x198   : > { %v1205_v17 = vadd.f32 %v1159_v51, %v1075_v50  ;;  %2368 = vmatmul.msk.bf16.gmra.mxu1 %vm496_vm3, %v3806_v0  ;;  %v3816_v51 = vld [vmem:[#allocation32_spill] sm:$0xff] }
 0x199   : > { %v1302_v3 = vpop.f32.mrf.mxu0 }
 0x19a   : > { %2385 = vmatmul.msk.bf16.gmra.mxu2 %vm496_vm3, %v3808_v28  ;;  %v3349_v44 = vadd.f32 %v1299_v12, %v1205_v17 }
 0x19b   : > { %2402 = vmatmul.msk.bf16.gmra.mxu3 %vm496_vm3, %v3809_v34 }
 0x19c   : > { %2419 = vmatmul.msk.bf16.gmra.mxu0 %vm496_vm3, %v3811_v21 }
 0x19d   : > { %v1032_v25 = vpop.f32.mrf.mxu2  ;;  %v763_v58 = vpop.f32.mrf.mxu1 }
 0x19e   : > { %v1076_v14 = vadd.f32 %v1032_v25, %v762_v15  ;;  %v1162_v32 = vpop.f32.mrf.mxu3  ;;  %v764_v0 = vadd.f32 %v763_v58, %v3812_v22  ;;  %v3817_v25 = vld [vmem:[#allocation27_spill] sm:$0xff] }
 0x1a0   : > { %v1206_v2 = vadd.f32 %v1162_v32, %v1076_v14 }
 0x1a1   : > { %v1304_v33 = vpop.f32.mrf.mxu0 }
 0x1a2   : > { %v3356_v36 = vadd.f32 %v1302_v3, %v1206_v2 }
 0x1a5   : > { %v1034_v8 = vpop.f32.mrf.mxu2  ;;  %v766_v16 = vpop.f32.mrf.mxu1 }
 0x1a6   : > { %v1077_v47 = vadd.f32 %v1034_v8, %v764_v0  ;;  %v1164_v42 = vpop.f32.mrf.mxu3  ;;  %v767_v50 = vadd.f32 %v766_v16, %v3815_v46  ;;  %v3818_v8 = vld [vmem:[#allocation33_spill] sm:$0xff] }
 0x1a8   : > { %v1207_v4 = vadd.f32 %v1164_v42, %v1077_v47  ;;  %2369 = vmatmul.msk.bf16.gmra.mxu1 %vm496_vm3, %v3811_v21  ;;  %v3819_v47 = vld [vmem:[#allocation5_spill] sm:$0xff]  ;;  %v3820_v42 = vld [vmem:[#allocation30_spill] sm:$0xff] }
 0x1a9   : > { %v1307_v12 = vpop.f32.mrf.mxu0 }
 0x1aa   : > { %2386 = vmatmul.msk.bf16.gmra.mxu2 %vm496_vm3, %v3813_v59  ;;  %v3363_v26 = vadd.f32 %v1304_v33, %v1207_v4 }
 0x1ab   : > { %2403 = vmatmul.msk.bf16.gmra.mxu3 %vm496_vm3, %v3814_v48 }
 0x1ac   : > { %2420 = vmatmul.msk.bf16.gmra.mxu0 %vm496_vm3, %v3816_v51 }
 0x1ad   : > { %v1037_v17 = vpop.f32.mrf.mxu2  ;;  %v768_v3 = vpop.f32.mrf.mxu1 }
 0x1ae   : > { %v1078_v28 = vadd.f32 %v1037_v17, %v767_v50  ;;  %v1167_v34 = vpop.f32.mrf.mxu3  ;;  %v769_v58 = vadd.f32 %v768_v3, %v3817_v25 }
 0x1b0   : > { %v1208_v11 = vadd.f32 %v1167_v34, %v1078_v28  ;;  %v3822_v28 = vld [vmem:[#allocation31_spill] sm:$0xff] }
 0x1b1   : > { %v1309_v15 = vpop.f32.mrf.mxu0 }
 0x1b2   : > { %v3370_v21 = vadd.f32 %v1307_v12, %v1208_v11  ;;  %v3821_v12 = vld [vmem:[#allocation37_spill] sm:$0xff] }
 0x1b5   : > { %v1039_v14 = vpop.f32.mrf.mxu2  ;;  %v771_v32 = vpop.f32.mrf.mxu1 }
 0x1b6   : > { %v1079_v2 = vadd.f32 %v1039_v14, %v769_v58  ;;  %v1169_v33 = vpop.f32.mrf.mxu3  ;;  %v772_v4 = vadd.f32 %v771_v32, %v3820_v42 }
 0x1b8   : > { %v1209_v22 = vadd.f32 %v1169_v33, %v1079_v2  ;;  %2370 = vmatmul.msk.bf16.gmra.mxu1 %vm496_vm3, %v3816_v51  ;;  %v3823_v33 = vld [vmem:[#allocation10_spill] sm:$0xff] }
 0x1b9   : > { %v1312_v0 = vpop.f32.mrf.mxu0 }
 0x1ba   : > { %2387 = vmatmul.msk.bf16.gmra.mxu2 %vm496_vm3, %v3818_v8  ;;  %v3377_v16 = vadd.f32 %v1309_v15, %v1209_v22  ;;  %v3824_v22 = vld [vmem:[#allocation34_spill] sm:$0xff] }
 0x1bb   : > { %2404 = vmatmul.msk.bf16.gmra.mxu3 %vm496_vm3, %v3819_v47 }
 0x1bc   : > { %2421 = vmatmul.msk.bf16.gmra.mxu0 %vm496_vm3, %v3821_v12 }
 0x1bd   : > { %v1042_v59 = vpop.f32.mrf.mxu2  ;;  %v773_v48 = vpop.f32.mrf.mxu1 }
 0x1be   : > { %v1080_v46 = vadd.f32 %v1042_v59, %v772_v4  ;;  %v1172_v50 = vpop.f32.mrf.mxu3  ;;  %v774_v34 = vadd.f32 %v773_v48, %v3822_v28 }
 0x1c0   : > { %v1210_v17 = vadd.f32 %v1172_v50, %v1080_v46  ;;  %v3825_v46 = vld [vmem:[#allocation36_spill] sm:$0xff] }
 0x1c1   : > { %v1314_v51 = vpop.f32.mrf.mxu0 }
 0x1c2   : > { %v3384_v3 = vadd.f32 %v1312_v0, %v1210_v17 }
 0x1c5   : > { %v1044_v11 = vpop.f32.mrf.mxu2  ;;  %v776_v15 = vpop.f32.mrf.mxu1 }
 0x1c6   : > { %v1081_v25 = vadd.f32 %v1044_v11, %v774_v34  ;;  %v1174_v58 = vpop.f32.mrf.mxu3  ;;  %v777_v0 = vadd.f32 %v776_v15, %v3824_v22 }
 0x1c8   : > { %v1211_v14 = vadd.f32 %v1174_v58, %v1081_v25  ;;  %2371 = vmatmul.msk.bf16.gmra.mxu1 %vm496_vm3, %v3821_v12 }
 0x1c9   : > { %v1317_v32 = vpop.f32.mrf.mxu0 }
 0x1ca   : > { %2388 = vmatmul.msk.bf16.gmra.mxu2 %vm496_vm3, %v3085_v19  ;;  %v3391_v2 = vadd.f32 %v1314_v51, %v1211_v14 }
 0x1cb   : > { %2405 = vmatmul.msk.bf16.gmra.mxu3 %vm496_vm3, %v3823_v33 }
 0x1cc   : > { %2422 = vmatmul.msk.bf16.gmra.mxu0 %vm496_vm3, %v3104_v41 }
 0x1cd   : > { %v1047_v8 = vpop.f32.mrf.mxu2  ;;  %v778_v47 = vpop.f32.mrf.mxu1 }
 0x1ce   : > { %v1082_v42 = vadd.f32 %v1047_v8, %v777_v0  ;;  %v1177_v4 = vpop.f32.mrf.mxu3  ;;  %v779_v19 = vadd.f32 %v778_v47, %v3825_v46 }
 0x1d0   : > { %v1212_v59 = vadd.f32 %v1177_v4, %v1082_v42 }
 0x1d1   : > { %v1319_v12 = vpop.f32.mrf.mxu0 }
 0x1d2   : > { %v3398_v48 = vadd.f32 %v1317_v32, %v1212_v59 }
 0x1d5   : > { %v1049_v50 = vpop.f32.mrf.mxu2  ;;  %v1379_v17 = vpop.f32.mrf.mxu1 }
 0x1d6   : > { %v1083_v51 = vadd.f32 %v1049_v50, %v779_v19  ;;  %v1179_v28 = vpop.f32.mrf.mxu3  ;;  %v1459_v25 = vadd.f32 %v1379_v17, %v3099_v57 }
 0x1d8   : > { %v1213_v34 = vadd.f32 %v1179_v28, %v1083_v51  ;;  %2372 = vmatmul.msk.bf16.gmra.mxu1 %vm496_vm3, %v3104_v41 }
 0x1d9   : > { %v1786_v11 = vpop.f32.mrf.mxu0 }
 0x1da   : > { %2389 = vmatmul.msk.bf16.gmra.mxu2 %vm496_vm3, %v3108_v52  ;;  %v3405_v15 = vadd.f32 %v1319_v12, %v1213_v34  ;;  %v3416_v52 = vld [vmem:[%s3699_s2] ss:$0 sm:$0xff] }
 0x1db   : > { %2406 = vmatmul.msk.bf16.gmra.mxu3 %vm496_vm3, %v2761_v27 }
 0x1dc   : > { %2423 = vmatmul.msk.bf16.gmra.mxu0 %vm496_vm3, %v3129_v24 }
 0x1dd   : > { %v1509_v58 = vpop.f32.mrf.mxu2  ;;  %v1381_v14 = vpop.f32.mrf.mxu1 }
 0x1de   : > { %v1589_v32 = vadd.f32 %v1509_v58, %v1459_v25  ;;  %v1649_v33 = vpop.f32.mrf.mxu3  ;;  %v1460_v57 = vadd.f32 %v1381_v14, %v3114_v37 }
 0x1e0   : > { %v1729_v41 = vadd.f32 %v1649_v33, %v1589_v32 }
 0x1e1   : > { %v1788_v0 = vpop.f32.mrf.mxu0 }
 0x1e2   : > { %v1866_v22 = vadd.f32 %v1786_v11, %v1729_v41 }
 0x1e4   : > { %v1902_v27 = vadd.f32 %v3416_v52, %v1866_v22 }
 0x1e5   : > { %v1511_v8 = vpop.f32.mrf.mxu2  ;;  %v1384_v47 = vpop.f32.mrf.mxu1 }
 0x1e6   : > { %2108 = vst.msk [vmem:[%s3421_s24] sm:$0xff] %vm1934_vm5, %v1902_v27  ;;  %v1590_v42 = vadd.f32 %v1511_v8, %v1460_v57  ;;  %v1651_v4 = vpop.f32.mrf.mxu3  ;;  %v2004_v37 = vmul.f32 %v1902_v27, %v1902_v27  ;;  %v1461_v50 = vadd.f32 %v1384_v47, %v3124_v45 }
 0x1e8   : > { %v1730_v59 = vadd.f32 %v1651_v4, %v1590_v42  ;;  %2373 = vmatmul.msk.bf16.gmra.mxu1 %vm496_vm3, %v3129_v24  ;;  %v1935_v24 = vsel %vm1934_vm5, %v1902_v27, 0.0  ;;  %v2036_v25 = vsel %vm1934_vm5, %v2004_v37, 0.0 }
 0x1e9   : > { %v1791_v46 = vpop.f32.mrf.mxu0 }
 0x1ea   : > { %v1867_v12 = vadd.f32 %v1788_v0, %v1730_v59  ;;  %2390 = vmatmul.msk.bf16.gmra.mxu2 %vm496_vm3, %v3133_v38 }
 0x1eb   : > { %2407 = vmatmul.msk.bf16.gmra.mxu3 %vm496_vm3, %v2849_v6 }
 0x1ec   : > { %v1903_v19 = vadd.f32 %v3416_v52, %v1867_v12  ;;  %2424 = vmatmul.msk.bf16.gmra.mxu0 %vm496_vm3, %v3154_v35 }
 0x1ed   : > { %v1514_v17 = vpop.f32.mrf.mxu2  ;;  %v1386_v51 = vpop.f32.mrf.mxu1 }
 0x1ee   : > { %v1936_v28 = vsel %vm1934_vm5, %v1903_v19, 0.0  ;;  %v2005_v34 = vmul.f32 %v1903_v19, %v1903_v19  ;;  %2109 = vst.msk [vmem:[%s3421_s24 + $0x8] sm:$0xff] %vm1934_vm5, %v1903_v19  ;;  %v1591_v38 = vadd.f32 %v1514_v17, %v1461_v50  ;;  %v1654_v6 = vpop.f32.mrf.mxu3  ;;  %v1462_v22 = vadd.f32 %v1386_v51, %v3139_v54  ;;  %v3826_v19 = vld [vmem:[#allocation6_spill] sm:$0xff]  ;;  %v3827_v17 = vld [vmem:[#allocation17_spill] sm:$0xff] }
 0x1ef   : > { %v1937_v11 = vadd.f32 %v1936_v28, %v1935_v24  ;;  %v3828_v24 = vld [vmem:[#allocation4_spill] sm:$0xff] }
 0x1f0   : > { %v2037_v45 = vsel %vm1934_vm5, %v2005_v34, 0.0  ;;  %v1731_v58 = vadd.f32 %v1654_v6, %v1591_v38 }
 0x1f1   : > { %v2038_v14 = vadd.f32 %v2037_v45, %v2036_v25  ;;  %v1793_v33 = vpop.f32.mrf.mxu0 }
 0x1f2   : > { %v1868_v32 = vadd.f32 %v1791_v46, %v1731_v58 }
 0x1f4   : > { %v1904_v41 = vadd.f32 %v3416_v52, %v1868_v32 }
 0x1f5   : > { %v1516_v0 = vpop.f32.mrf.mxu2  ;;  %v1389_v27 = vpop.f32.mrf.mxu1 }
 0x1f6   : > { %v1938_v57 = vsel %vm1934_vm5, %v1904_v41, 0.0  ;;  %v2006_v8 = vmul.f32 %v1904_v41, %v1904_v41  ;;  %2110 = vst.msk [vmem:[%s3421_s24 + $0x10] sm:$0xff] %vm1934_vm5, %v1904_v41  ;;  %v1592_v47 = vadd.f32 %v1516_v0, %v1462_v22  ;;  %v1656_v42 = vpop.f32.mrf.mxu3  ;;  %v1463_v51 = vadd.f32 %v1389_v27, %v3827_v17  ;;  %v3829_v41 = vld [vmem:[#allocation2_spill] sm:$0xff]  ;;  %v3831_v17 = vld [vmem:[#allocation3_spill] sm:$0xff] }
 0x1f7   : > { %v1939_v4 = vadd.f32 %v1938_v57, %v1937_v11 }
 0x1f8   : > { %v2039_v59 = vsel %vm1934_vm5, %v2006_v8, 0.0  ;;  %v1732_v12 = vadd.f32 %v1656_v42, %v1592_v47  ;;  %2374 = vmatmul.msk.bf16.gmra.mxu1 %vm496_vm3, %v3154_v35 }
 0x1f9   : > { %v2040_v46 = vadd.f32 %v2039_v59, %v2038_v14  ;;  %v1796_v54 = vpop.f32.mrf.mxu0 }
 0x1fa   : > { %v1869_v37 = vadd.f32 %v1793_v33, %v1732_v12  ;;  %2391 = vmatmul.msk.bf16.gmra.mxu2 %vm496_vm3, %v3158_v20 }
 0x1fb   : > { %2408 = vmatmul.msk.bf16.gmra.mxu3 %vm496_vm3, %v3826_v19  ;;  %v3830_v19 = vld [vmem:[#allocation11_spill] sm:$0xff] }
 0x1fc   : > { %v1905_v50 = vadd.f32 %v3416_v52, %v1869_v37  ;;  %2425 = vmatmul.msk.bf16.gmra.mxu0 %vm496_vm3, %v3828_v24 }
 0x1fd   : > { %v1519_v28 = vpop.f32.mrf.mxu2  ;;  %v1391_v34 = vpop.f32.mrf.mxu1 }
 0x1fe   : > { %v1940_v35 = vsel %vm1934_vm5, %v1905_v50, 0.0  ;;  %v2007_v38 = vmul.f32 %v1905_v50, %v1905_v50  ;;  %2111 = vst.msk [vmem:[%s3421_s24 + $0x18] sm:$0xff] %vm1934_vm5, %v1905_v50  ;;  %v1593_v6 = vadd.f32 %v1519_v28, %v1463_v51  ;;  %v1659_v20 = vpop.f32.mrf.mxu3  ;;  %v1464_v22 = vadd.f32 %v1391_v34, %v3829_v41 }
 0x1ff   : > { %v1941_v11 = vadd.f32 %v1940_v35, %v1939_v4  ;;  %v1354_v41 = vrot.slane %v3249_v60, 2  ;;  %v1357_v60 = vrot.slane %v3255_v55, 2 }
 0x200   : > { %v2041_v25 = vsel %vm1934_vm5, %v2007_v38, 0.0  ;;  %v1733_v45 = vadd.f32 %v1659_v20, %v1593_v6 }
 0x201   : > { %v2042_v58 = vadd.f32 %v2041_v25, %v2040_v46  ;;  %v1798_v32 = vpop.f32.mrf.mxu0 }
 0x202   : > { %v1870_v14 = vadd.f32 %v1796_v54, %v1733_v45 }
 0x204   : > { %v1906_v33 = vadd.f32 %v3416_v52, %v1870_v14 }
 0x205   : > { %v1521_v0 = vpop.f32.mrf.mxu2  ;;  %v1394_v27 = vpop.f32.mrf.mxu1 }
 0x206   : > { %v1942_v57 = vsel %vm1934_vm5, %v1906_v33, 0.0  ;;  %v2008_v8 = vmul.f32 %v1906_v33, %v1906_v33  ;;  %2112 = vst.msk [vmem:[%s3421_s24 + $0x20] sm:$0xff] %vm1934_vm5, %v1906_v33  ;;  %v1594_v47 = vadd.f32 %v1521_v0, %v1464_v22  ;;  %v1661_v42 = vpop.f32.mrf.mxu3  ;;  %v1465_v51 = vadd.f32 %v1394_v27, %v3831_v17 }
 0x207   : > { %v1943_v4 = vadd.f32 %v1942_v57, %v1941_v11  ;;  %v1355_v27 = vrot.slane %v3252_v29, 2 }
 0x208   : > { %v2043_v59 = vsel %vm1934_vm5, %v2008_v8, 0.0  ;;  %v1734_v12 = vadd.f32 %v1661_v42, %v1594_v47  ;;  %2375 = vmatmul.msk.bf16.gmra.mxu1 %vm496_vm3, %v3828_v24 }
 0x209   : > { %v2044_v46 = vadd.f32 %v2043_v59, %v2042_v58  ;;  %v1801_v54 = vpop.f32.mrf.mxu0 }
 0x20a   : > { %v1871_v37 = vadd.f32 %v1798_v32, %v1734_v12  ;;  %2392 = vmatmul.msk.bf16.gmra.mxu2 %vm496_vm3, %v3182_v1  ;;  %v3832_v32 = vld [vmem:[#allocation7_spill] sm:$0xff] }
 0x20b   : > { %2409 = vmatmul.msk.bf16.gmra.mxu3 %vm496_vm3, %v3830_v19  ;;  %v1358_v19 = vsel %vm781_vm4, %v1355_v27, %v1357_v60  ;;  %v3836_v60 = vld [vmem:[#allocation21_spill] sm:$0xff] }
 0x20c   : > { %v1907_v50 = vadd.f32 %v3416_v52, %v1871_v37  ;;  %2426 = vmatmul.msk.bf16.gmra.mxu0 %vm496_vm3, %v3203_v13 }
 0x20d   : > { %v1524_v28 = vpop.f32.mrf.mxu2  ;;  %v1396_v34 = vpop.f32.mrf.mxu1 }
 0x20e   : > { %v1944_v24 = vsel %vm1934_vm5, %v1907_v50, 0.0  ;;  %v2009_v35 = vmul.f32 %v1907_v50, %v1907_v50  ;;  %2113 = vst.msk [vmem:[%s3421_s24 + $0x28] sm:$0xff] %vm1934_vm5, %v1907_v50  ;;  %v1595_v38 = vadd.f32 %v1524_v28, %v1465_v51  ;;  %v1664_v1 = vpop.f32.mrf.mxu3  ;;  %v1466_v33 = vadd.f32 %v1396_v34, %v3832_v32  ;;  %v3833_v50 = vld [vmem:[#allocation16_spill] sm:$0xff] }
 0x20f   : > { %v1945_v6 = vadd.f32 %v1944_v24, %v1943_v4  ;;  %v3834_v51 = vld [vmem:[#allocation8_spill] sm:$0xff] }
 0x210   : > { %v2045_v20 = vsel %vm1934_vm5, %v2009_v35, 0.0  ;;  %v1735_v11 = vadd.f32 %v1664_v1, %v1595_v38 }
 0x211   : > { %v2046_v25 = vadd.f32 %v2045_v20, %v2044_v46  ;;  %v1803_v58 = vpop.f32.mrf.mxu0 }
 0x212   : > { %v1872_v45 = vadd.f32 %v1801_v54, %v1735_v11  ;;  %v1356_v54 = vsel %vm781_vm4, %v1354_v41, %v1355_v27 }
 0x213   : > { %v3500_v17 = vpack.c.bf16 %v1358_v19, %v1356_v54 }
 0x214   : > { %v1908_v14 = vadd.f32 %v3416_v52, %v1872_v45 }
 0x215   : > { %v1526_v22 = vpop.f32.mrf.mxu2  ;;  %v1399_v0 = vpop.f32.mrf.mxu1 }
 0x216   : > { %v1946_v57 = vsel %vm1934_vm5, %v1908_v14, 0.0  ;;  %v2010_v8 = vmul.f32 %v1908_v14, %v1908_v14  ;;  %2114 = vst.msk [vmem:[%s3421_s24 + $0x30] sm:$0xff] %vm1934_vm5, %v1908_v14  ;;  %v1596_v47 = vadd.f32 %v1526_v22, %v1466_v33  ;;  %v1666_v42 = vpop.f32.mrf.mxu3  ;;  %v1467_v55 = vadd.f32 %v1399_v0, %v3834_v51  ;;  %v3835_v14 = vld [vmem:[#allocation9_spill] sm:$0xff] }
 0x217   : > { %v1947_v4 = vadd.f32 %v1946_v57, %v1945_v6 }
 0x218   : > { %v2047_v59 = vsel %vm1934_vm5, %v2010_v8, 0.0  ;;  %v1736_v12 = vadd.f32 %v1666_v42, %v1596_v47  ;;  %2376 = vmatmul.msk.bf16.gmra.mxu1 %vm496_vm3, %v3203_v13 }
 0x219   : > { %v2048_v46 = vadd.f32 %v2047_v59, %v2046_v25  ;;  %v1806_v29 = vpop.f32.mrf.mxu0 }
 0x21a   : > { %v1873_v37 = vadd.f32 %v1803_v58, %v1736_v12  ;;  %2393 = vmatmul.msk.bf16.gmra.mxu2 %vm496_vm3, %v3207_v62 }
 0x21b   : > { %2410 = vmatmul.msk.bf16.gmra.mxu3 %vm496_vm3, %v3833_v50 }
 0x21c   : > { %v1909_v13 = vadd.f32 %v3416_v52, %v1873_v37  ;;  %2427 = vmatmul.msk.bf16.gmra.mxu0 %vm496_vm3, %v3228_v49  ;;  %v3837_v37 = vld [vmem:[#allocation12_spill] sm:$0xff] }
 0x21d   : > { %v1529_v28 = vpop.f32.mrf.mxu2  ;;  %v1401_v34 = vpop.f32.mrf.mxu1 }
 0x21e   : > { %v1948_v62 = vsel %vm1934_vm5, %v1909_v13, 0.0  ;;  %v2011_v24 = vmul.f32 %v1909_v13, %v1909_v13  ;;  %2115 = vst.msk [vmem:[%s3421_s24 + $0x38] sm:$0xff] %vm1934_vm5, %v1909_v13  ;;  %v1597_v35 = vadd.f32 %v1529_v28, %v1467_v55  ;;  %v1669_v38 = vpop.f32.mrf.mxu3  ;;  %v1468_v32 = vadd.f32 %v1401_v34, %v3835_v14 }
 0x21f   : > { %v1949_v1 = vadd.f32 %v1948_v62, %v1947_v4 }
 0x220   : > { %v2049_v6 = vsel %vm1934_vm5, %v2011_v24, 0.0  ;;  %v1737_v20 = vadd.f32 %v1669_v38, %v1597_v35  ;;  %v3838_v38 = vld [vmem:[#allocation13_spill] sm:$0xff] }
 0x221   : > { %v2050_v11 = vadd.f32 %v2049_v6, %v2048_v46  ;;  %v1808_v45 = vpop.f32.mrf.mxu0 }
 0x222   : > { %v1874_v25 = vadd.f32 %v1806_v29, %v1737_v20 }
 0x224   : > { %v1910_v58 = vadd.f32 %v3416_v52, %v1874_v25 }
 0x225   : > { %v1531_v33 = vpop.f32.mrf.mxu2  ;;  %v1404_v41 = vpop.f32.mrf.mxu1 }
 0x226   : > { %v1950_v22 = vsel %vm1934_vm5, %v1910_v58, 0.0  ;;  %v2012_v0 = vmul.f32 %v1910_v58, %v1910_v58  ;;  %2116 = vst.msk [vmem:[%s3421_s24 + $0x40] sm:$0xff] %vm1934_vm5, %v1910_v58  ;;  %v1598_v27 = vadd.f32 %v1531_v33, %v1468_v32  ;;  %v1671_v57 = vpop.f32.mrf.mxu3  ;;  %v1469_v29 = vadd.f32 %v1404_v41, %v3837_v37 }
 0x227   : > { %v1951_v8 = vadd.f32 %v1950_v22, %v1949_v1 }
 0x228   : > { %v2051_v47 = vsel %vm1934_vm5, %v2012_v0, 0.0  ;;  %v1738_v42 = vadd.f32 %v1671_v57, %v1598_v27  ;;  %2377 = vmatmul.msk.bf16.gmra.mxu1 %vm496_vm3, %v3228_v49 }
 0x229   : > { %v2052_v4 = vadd.f32 %v2051_v47, %v2050_v11  ;;  %v1811_v12 = vpop.f32.mrf.mxu0 }
 0x22a   : > { %v1875_v59 = vadd.f32 %v1808_v45, %v1738_v42  ;;  %2394 = vmatmul.msk.bf16.gmra.mxu2 %vm496_vm3, %v3232_v40  ;;  %v298_v42 = vld [vmem:[%s2562_s6 + $0x1a0] sm:$0xff] }
 0x22b   : > { %2411 = vmatmul.msk.bf16.gmra.mxu3 %vm496_vm3, %v3836_v60 }
 0x22c   : > { %v1911_v46 = vadd.f32 %v3416_v52, %v1875_v59  ;;  %2428 = vmatmul.msk.bf16.gmra.mxu0 %vm496_vm3, %v3265_v56 }
 0x22d   : > { %v1534_v54 = vpop.f32.mrf.mxu2  ;;  %v1406_v19 = vpop.f32.mrf.mxu1 }
 0x22e   : > { %v1952_v49 = vsel %vm1934_vm5, %v1911_v46, 0.0  ;;  %v2013_v50 = vmul.f32 %v1911_v46, %v1911_v46  ;;  %2117 = vst.msk [vmem:[%s3421_s24 + $0x48] sm:$0xff] %vm1934_vm5, %v1911_v46  ;;  %v1599_v13 = vadd.f32 %v1534_v54, %v1469_v29  ;;  %v1674_v40 = vpop.f32.mrf.mxu3  ;;  %v1470_v1 = vadd.f32 %v1406_v19, %v3838_v38 }
 0x22f   : > { %v1953_v51 = vadd.f32 %v1952_v49, %v1951_v8  ;;  %v297_v8 = vld [vmem:[%s2562_s6 + $0x198] sm:$0xff]  ;;  %v1625_v29 = vrot.slane %v298_v42, 1 }
 0x230   : > { %v2053_v55 = vsel %vm1934_vm5, %v2013_v50, 0.0  ;;  %v1739_v28 = vadd.f32 %v1674_v40, %v1599_v13  ;;  %v1624_v46 = vrot.slane %v297_v8, 1  ;;  %v1761_v49 = vrot.slane %v297_v8, 2 }
 0x231   : > { %v2054_v34 = vadd.f32 %v2053_v55, %v2052_v4  ;;  %v1813_v24 = vpop.f32.mrf.mxu0  ;;  %v299_v4 = vld [vmem:[%s2562_s6 + $0x1a8] sm:$0x3]  ;;  %v1762_v50 = vrot.slane %v298_v42, 2  ;;  %v1491_v38 = vpack.c.bf16 %v298_v42, %v297_v8 }
 0x232   : > { %v1876_v62 = vadd.f32 %v1811_v12, %v1739_v28  ;;  %v1627_v54 = vrot.slane %v299_v4, 1 }
 0x234   : > { %v1912_v35 = vadd.f32 %v3416_v52, %v1876_v62  ;;  %v1628_v62 = vsel %vm365_vm2, %v1625_v29, %v1627_v54 }
 0x235   : > { %v1536_v6 = vpop.f32.mrf.mxu2  ;;  %v1409_v20 = vpop.f32.mrf.mxu1 }
 0x236   : > { %v1954_v11 = vsel %vm1934_vm5, %v1912_v35, 0.0  ;;  %v2014_v25 = vmul.f32 %v1912_v35, %v1912_v35  ;;  %2118 = vst.msk [vmem:[%s3421_s24 + $0x50] sm:$0xff] %vm1934_vm5, %v1912_v35  ;;  %v1600_v45 = vadd.f32 %v1536_v6, %v1470_v1  ;;  %v1676_v58 = vpop.f32.mrf.mxu3  ;;  %v1471_v57 = vadd.f32 %v1409_v20, %v3260_v10 }
 0x237   : > { %v1955_v14 = vadd.f32 %v1954_v11, %v1953_v51  ;;  %v1764_v51 = vrot.slane %v299_v4, 2  ;;  %v1763_v1 = vsel %vm781_vm4, %v1761_v49, %v1762_v50 }
 0x238   : > { %v2055_v32 = vsel %vm1934_vm5, %v2014_v25, 0.0  ;;  %v1740_v33 = vadd.f32 %v1676_v58, %v1600_v45  ;;  %2378 = vmatmul.msk.bf16.gmra.mxu1 %vm496_vm3, %v3265_v56 }
 0x239   : > { %v2056_v41 = vadd.f32 %v2055_v32, %v2054_v34  ;;  %v1816_v0 = vpop.f32.mrf.mxu0  ;;  %v1626_v34 = vsel %vm365_vm2, %v1624_v46, %v1625_v29  ;;  %v1765_v45 = vsel %vm781_vm4, %v1762_v50, %v1764_v51 }
 0x23a   : > { %v1877_v22 = vadd.f32 %v1813_v24, %v1740_v33  ;;  %2395 = vmatmul.msk.bf16.gmra.mxu2 %vm496_vm3, %v3271_v5 }
 0x23b   : > { %2412 = vmatmul.msk.bf16.gmra.mxu3 %vm496_vm3, %v3275_v53 }
 0x23c   : > { %v1913_v27 = vadd.f32 %v3416_v52, %v1877_v22  ;;  %2429 = vmatmul.msk.bf16.gmra.mxu0 %vm496_vm3, %v3500_v17 }
 0x23d   : > { %v1539_v47 = vpop.f32.mrf.mxu2  ;;  %v1411_v56 = vpop.f32.mrf.mxu1 }
 0x23e   : > { %v1956_v59 = vsel %vm1934_vm5, %v1913_v27, 0.0  ;;  %v2015_v12 = vmul.f32 %v1913_v27, %v1913_v27  ;;  %2119 = vst.msk [vmem:[%s3421_s24 + $0x58] sm:$0xff] %vm1934_vm5, %v1913_v27  ;;  %v1601_v5 = vadd.f32 %v1539_v47, %v1471_v57  ;;  %v1679_v60 = vpop.f32.mrf.mxu3  ;;  %v1472_v28 = vadd.f32 %v1411_v56, %v3279_v39 }
 0x23f   : > { %v1957_v53 = vadd.f32 %v1956_v59, %v1955_v14  ;;  %v1631_v39 = vpack.c.bf16 %v1628_v62, %v1626_v34 }
 0x240   : > { %v2057_v37 = vsel %vm1934_vm5, %v2015_v12, 0.0  ;;  %v1741_v10 = vadd.f32 %v1679_v60, %v1601_v5 }
 0x241   : > { %v2058_v19 = vadd.f32 %v2057_v37, %v2056_v41  ;;  %v1818_v40 = vpop.f32.mrf.mxu0  ;;  %v1768_v41 = vpack.c.bf16 %v1765_v45, %v1763_v1 }
 0x242   : > { %v1878_v13 = vadd.f32 %v1816_v0, %v1741_v10 }
 0x244   : > { %v1914_v55 = vadd.f32 %v3416_v52, %v1878_v13 }
 0x245   : > { %v1541_v24 = vpop.f32.mrf.mxu2  ;;  %v1414_v35 = vpop.f32.mrf.mxu1 }
 0x246   : > { %v1958_v6 = vsel %vm1934_vm5, %v1914_v55, 0.0  ;;  %v2016_v20 = vmul.f32 %v1914_v55, %v1914_v55  ;;  %2120 = vst.msk [vmem:[%s3421_s24 + $0x60] sm:$0xff] %vm1934_vm5, %v1914_v55  ;;  %v1602_v11 = vadd.f32 %v1541_v24, %v1472_v28  ;;  %v1681_v25 = vpop.f32.mrf.mxu3  ;;  %v1473_v57 = vadd.f32 %v1414_v35, %v3286_v23 }
 0x247   : > { %v1959_v58 = vadd.f32 %v1958_v6, %v1957_v53 }
 0x248   : > { %v2059_v14 = vsel %vm1934_vm5, %v2016_v20, 0.0  ;;  %v1742_v32 = vadd.f32 %v1681_v25, %v1602_v11  ;;  %2379 = vmatmul.msk.bf16.gmra.mxu1 %vm496_vm3, %v3500_v17 }
 0x249   : > { %v2060_v33 = vadd.f32 %v2059_v14, %v2058_v19  ;;  %v1821_v0 = vpop.f32.mrf.mxu0 }
 0x24a   : > { %v1879_v22 = vadd.f32 %v1818_v40, %v1742_v32  ;;  %2396 = vmatmul.msk.bf16.gmra.mxu2 %vm496_vm3, %v1491_v38 }
 0x24b   : > { %2413 = vmatmul.msk.bf16.gmra.mxu3 %vm496_vm3, %v1631_v39 }
 0x24c   : > { %v1915_v27 = vadd.f32 %v3416_v52, %v1879_v22  ;;  %2430 = vmatmul.msk.bf16.gmra.mxu0 %vm496_vm3, %v1768_v41 }
 0x24d   : > { %v1544_v8 = vpop.f32.mrf.mxu2  ;;  %v1416_v47 = vpop.f32.mrf.mxu1 }
 0x24e   : > { %v1960_v56 = vsel %vm1934_vm5, %v1915_v27, 0.0  ;;  %v2017_v42 = vmul.f32 %v1915_v27, %v1915_v27  ;;  %2121 = vst.msk [vmem:[%s3421_s24 + $0x68] sm:$0xff] %vm1934_vm5, %v1915_v27  ;;  %v1603_v17 = vadd.f32 %v1544_v8, %v1473_v57  ;;  %v1684_v4 = vpop.f32.mrf.mxu3  ;;  %v1474_v37 = vadd.f32 %v1416_v47, %v3293_v30 }
 0x24f   : > { %v1961_v59 = vadd.f32 %v1960_v56, %v1959_v58 }
 0x250   : > { %v2061_v12 = vsel %vm1934_vm5, %v2017_v42, 0.0  ;;  %v1743_v5 = vadd.f32 %v1684_v4, %v1603_v17 }
 0x251   : > { %v2062_v60 = vadd.f32 %v2061_v12, %v2060_v33  ;;  %v1823_v46 = vpop.f32.mrf.mxu0 }
 0x252   : > { %v1880_v53 = vadd.f32 %v1821_v0, %v1743_v5 }
 0x254   : > { %v1916_v23 = vadd.f32 %v3416_v52, %v1880_v53 }
 0x255   : > { %v1546_v10 = vpop.f32.mrf.mxu2  ;;  %v1419_v29 = vpop.f32.mrf.mxu1 }
 0x256   : > { %v1962_v54 = vsel %vm1934_vm5, %v1916_v23, 0.0  ;;  %v2018_v19 = vmul.f32 %v1916_v23, %v1916_v23  ;;  %2122 = vst.msk [vmem:[%s3421_s24 + $0x70] sm:$0xff] %vm1934_vm5, %v1916_v23  ;;  %v1604_v49 = vadd.f32 %v1546_v10, %v1474_v37  ;;  %v1686_v50 = vpop.f32.mrf.mxu3  ;;  %v1475_v30 = vadd.f32 %v1419_v29, %v3300_v31 }
 0x257   : > { %v1963_v13 = vadd.f32 %v1962_v54, %v1961_v59 }
 0x258   : > { %v2063_v40 = vsel %vm1934_vm5, %v2018_v19, 0.0  ;;  %v1744_v51 = vadd.f32 %v1686_v50, %v1604_v49 }
 0x259   : > { %v2064_v55 = vadd.f32 %v2063_v40, %v2062_v60  ;;  %v1826_v34 = vpop.f32.mrf.mxu0 }
 0x25a   : > { %v1881_v28 = vadd.f32 %v1823_v46, %v1744_v51 }
 0x25c   : > { %v1917_v62 = vadd.f32 %v3416_v52, %v1881_v28 }
 0x25d   : > { %v1549_v24 = vpop.f32.mrf.mxu2  ;;  %v1421_v35 = vpop.f32.mrf.mxu1 }
 0x25e   : > { %v1964_v38 = vsel %vm1934_vm5, %v1917_v62, 0.0  ;;  %v2019_v1 = vmul.f32 %v1917_v62, %v1917_v62  ;;  %2123 = vst.msk [vmem:[%s3421_s24 + $0x78] sm:$0xff] %vm1934_vm5, %v1917_v62  ;;  %v1605_v6 = vadd.f32 %v1549_v24, %v1475_v30  ;;  %v1689_v20 = vpop.f32.mrf.mxu3  ;;  %v1476_v31 = vadd.f32 %v1421_v35, %v3307_v18 }
 0x25f   : > { %v1965_v11 = vadd.f32 %v1964_v38, %v1963_v13 }
 0x260   : > { %v2065_v25 = vsel %vm1934_vm5, %v2019_v1, 0.0  ;;  %v1745_v45 = vadd.f32 %v1689_v20, %v1605_v6 }
 0x261   : > { %v2066_v58 = vadd.f32 %v2065_v25, %v2064_v55  ;;  %v1828_v14 = vpop.f32.mrf.mxu0 }
 0x262   : > { %v1882_v39 = vadd.f32 %v1826_v34, %v1745_v45 }
 0x264   : > { %v1918_v32 = vadd.f32 %v3416_v52, %v1882_v39 }
 0x265   : > { %v1551_v33 = vpop.f32.mrf.mxu2  ;;  %v1424_v41 = vpop.f32.mrf.mxu1 }
 0x266   : > { %v1966_v22 = vsel %vm1934_vm5, %v1918_v32, 0.0  ;;  %v2020_v0 = vmul.f32 %v1918_v32, %v1918_v32  ;;  %2124 = vst.msk [vmem:[%s3421_s24 + $0x80] sm:$0xff] %vm1934_vm5, %v1918_v32  ;;  %v1606_v27 = vadd.f32 %v1551_v33, %v1476_v31  ;;  %v1691_v57 = vpop.f32.mrf.mxu3  ;;  %v1477_v18 = vadd.f32 %v1424_v41, %v3314_v43 }
 0x267   : > { %v1967_v8 = vadd.f32 %v1966_v22, %v1965_v11 }
 0x268   : > { %v2067_v47 = vsel %vm1934_vm5, %v2020_v0, 0.0  ;;  %v1746_v56 = vadd.f32 %v1691_v57, %v1606_v27 }
 0x269   : > { %v2068_v42 = vadd.f32 %v2067_v47, %v2066_v58  ;;  %v1831_v4 = vpop.f32.mrf.mxu0 }
 0x26a   : > { %v1883_v17 = vadd.f32 %v1828_v14, %v1746_v56 }
 0x26c   : > { %v1919_v59 = vadd.f32 %v3416_v52, %v1883_v17 }
 0x26d   : > { %v1554_v12 = vpop.f32.mrf.mxu2  ;;  %v1426_v5 = vpop.f32.mrf.mxu1 }
 0x26e   : > { %v1968_v60 = vsel %vm1934_vm5, %v1919_v59, 0.0  ;;  %v2021_v53 = vmul.f32 %v1919_v59, %v1919_v59  ;;  %2125 = vst.msk [vmem:[%s3421_s24 + $0x88] sm:$0xff] %vm1934_vm5, %v1919_v59  ;;  %v1607_v46 = vadd.f32 %v1554_v12, %v1477_v18  ;;  %v1694_v23 = vpop.f32.mrf.mxu3  ;;  %v1478_v43 = vadd.f32 %v1426_v5, %v3321_v63 }
 0x26f   : > { %v1969_v37 = vadd.f32 %v1968_v60, %v1967_v8 }
 0x270   : > { %v2069_v10 = vsel %vm1934_vm5, %v2021_v53, 0.0  ;;  %v1747_v29 = vadd.f32 %v1694_v23, %v1607_v46 }
 0x271   : > { %v2070_v54 = vadd.f32 %v2069_v10, %v2068_v42  ;;  %v1833_v49 = vpop.f32.mrf.mxu0 }
 0x272   : > { %v1884_v19 = vadd.f32 %v1831_v4, %v1747_v29 }
 0x274   : > { %v1920_v50 = vadd.f32 %v3416_v52, %v1884_v19 }
 0x275   : > { %v1556_v13 = vpop.f32.mrf.mxu2  ;;  %v1429_v40 = vpop.f32.mrf.mxu1 }
 0x276   : > { %v1970_v51 = vsel %vm1934_vm5, %v1920_v50, 0.0  ;;  %v2022_v55 = vmul.f32 %v1920_v50, %v1920_v50  ;;  %2126 = vst.msk [vmem:[%s3421_s24 + $0x90] sm:$0xff] %vm1934_vm5, %v1920_v50  ;;  %v1608_v28 = vadd.f32 %v1556_v13, %v1478_v43  ;;  %v1696_v34 = vpop.f32.mrf.mxu3  ;;  %v1479_v63 = vadd.f32 %v1429_v40, %v3328_v7 }
 0x277   : > { %v1971_v62 = vadd.f32 %v1970_v51, %v1969_v37 }
 0x278   : > { %v2071_v30 = vsel %vm1934_vm5, %v2022_v55, 0.0  ;;  %v1748_v24 = vadd.f32 %v1696_v34, %v1608_v28 }
 0x279   : > { %v2072_v35 = vadd.f32 %v2071_v30, %v2070_v54  ;;  %v1836_v1 = vpop.f32.mrf.mxu0 }
 0x27a   : > { %v1885_v38 = vadd.f32 %v1833_v49, %v1748_v24 }
 0x27c   : > { %v1921_v6 = vadd.f32 %v3416_v52, %v1885_v38 }
 0x27d   : > { %v1559_v20 = vpop.f32.mrf.mxu2  ;;  %v1431_v11 = vpop.f32.mrf.mxu1 }
 0x27e   : > { %v1972_v25 = vsel %vm1934_vm5, %v1921_v6, 0.0  ;;  %v2023_v45 = vmul.f32 %v1921_v6, %v1921_v6  ;;  %2127 = vst.msk [vmem:[%s3421_s24 + $0x98] sm:$0xff] %vm1934_vm5, %v1921_v6  ;;  %v1609_v58 = vadd.f32 %v1559_v20, %v1479_v63  ;;  %v1699_v39 = vpop.f32.mrf.mxu3  ;;  %v1480_v7 = vadd.f32 %v1431_v11, %v3335_v9 }
 0x27f   : > { %v1973_v14 = vadd.f32 %v1972_v25, %v1971_v62 }
 0x280   : > { %v2073_v32 = vsel %vm1934_vm5, %v2023_v45, 0.0  ;;  %v1749_v31 = vadd.f32 %v1699_v39, %v1609_v58 }
 0x281   : > { %v2074_v33 = vadd.f32 %v2073_v32, %v2072_v35  ;;  %v1838_v22 = vpop.f32.mrf.mxu0 }
 0x282   : > { %v1886_v41 = vadd.f32 %v1836_v1, %v1749_v31 }
 0x284   : > { %v1922_v0 = vadd.f32 %v3416_v52, %v1886_v41 }
 0x285   : > { %v1561_v27 = vpop.f32.mrf.mxu2  ;;  %v1434_v57 = vpop.f32.mrf.mxu1 }
 0x286   : > { %v1974_v8 = vsel %vm1934_vm5, %v1922_v0, 0.0  ;;  %v2024_v47 = vmul.f32 %v1922_v0, %v1922_v0  ;;  %2128 = vst.msk [vmem:[%s3421_s24 + $0xa0] sm:$0xff] %vm1934_vm5, %v1922_v0  ;;  %v1610_v56 = vadd.f32 %v1561_v27, %v1480_v7  ;;  %v1701_v42 = vpop.f32.mrf.mxu3  ;;  %v1481_v9 = vadd.f32 %v1434_v57, %v3342_v61 }
 0x287   : > { %v1975_v17 = vadd.f32 %v1974_v8, %v1973_v14 }
 0x288   : > { %v2075_v4 = vsel %vm1934_vm5, %v2024_v47, 0.0  ;;  %v1750_v59 = vadd.f32 %v1701_v42, %v1610_v56 }
 0x289   : > { %v2076_v18 = vadd.f32 %v2075_v4, %v2074_v33  ;;  %v1841_v5 = vpop.f32.mrf.mxu0 }
 0x28a   : > { %v1887_v12 = vadd.f32 %v1838_v22, %v1750_v59 }
 0x28c   : > { %v1923_v60 = vadd.f32 %v3416_v52, %v1887_v12 }
 0x28d   : > { %v1564_v53 = vpop.f32.mrf.mxu2  ;;  %v1436_v46 = vpop.f32.mrf.mxu1 }
 0x28e   : > { %v1976_v23 = vsel %vm1934_vm5, %v1923_v60, 0.0  ;;  %v2025_v37 = vmul.f32 %v1923_v60, %v1923_v60  ;;  %2129 = vst.msk [vmem:[%s3421_s24 + $0xa8] sm:$0xff] %vm1934_vm5, %v1923_v60  ;;  %v1611_v10 = vadd.f32 %v1564_v53, %v1481_v9  ;;  %v1704_v29 = vpop.f32.mrf.mxu3  ;;  %v1482_v61 = vadd.f32 %v1436_v46, %v3349_v44 }
 0x28f   : > { %v1977_v54 = vadd.f32 %v1976_v23, %v1975_v17 }
 0x290   : > { %v2077_v19 = vsel %vm1934_vm5, %v2025_v37, 0.0  ;;  %v1751_v49 = vadd.f32 %v1704_v29, %v1611_v10 }
 0x291   : > { %v2078_v50 = vadd.f32 %v2077_v19, %v2076_v18  ;;  %v1843_v13 = vpop.f32.mrf.mxu0 }
 0x292   : > { %v1888_v43 = vadd.f32 %v1841_v5, %v1751_v49 }
 0x294   : > { %v1924_v40 = vadd.f32 %v3416_v52, %v1888_v43 }
 0x295   : > { %v1566_v51 = vpop.f32.mrf.mxu2  ;;  %v1439_v55 = vpop.f32.mrf.mxu1 }
 0x296   : > { %v1978_v28 = vsel %vm1934_vm5, %v1924_v40, 0.0  ;;  %v2026_v34 = vmul.f32 %v1924_v40, %v1924_v40  ;;  %2130 = vst.msk [vmem:[%s3421_s24 + $0xb0] sm:$0xff] %vm1934_vm5, %v1924_v40  ;;  %v1612_v62 = vadd.f32 %v1566_v51, %v1482_v61  ;;  %v1706_v30 = vpop.f32.mrf.mxu3  ;;  %v1483_v44 = vadd.f32 %v1439_v55, %v3356_v36 }
 0x297   : > { %v1979_v24 = vadd.f32 %v1978_v28, %v1977_v54 }
 0x298   : > { %v2079_v35 = vsel %vm1934_vm5, %v2026_v34, 0.0  ;;  %v1752_v38 = vadd.f32 %v1706_v30, %v1612_v62 }
 0x299   : > { %v2080_v1 = vadd.f32 %v2079_v35, %v2078_v50  ;;  %v1846_v63 = vpop.f32.mrf.mxu0 }
 0x29a   : > { %v1889_v6 = vadd.f32 %v1843_v13, %v1752_v38 }
 0x29c   : > { %v1925_v20 = vadd.f32 %v3416_v52, %v1889_v6 }
 0x29d   : > { %v1569_v11 = vpop.f32.mrf.mxu2  ;;  %v1441_v25 = vpop.f32.mrf.mxu1 }
 0x29e   : > { %v1980_v45 = vsel %vm1934_vm5, %v1925_v20, 0.0  ;;  %v2027_v58 = vmul.f32 %v1925_v20, %v1925_v20  ;;  %2131 = vst.msk [vmem:[%s3421_s24 + $0xb8] sm:$0xff] %vm1934_vm5, %v1925_v20  ;;  %v1613_v39 = vadd.f32 %v1569_v11, %v1483_v44  ;;  %v1709_v14 = vpop.f32.mrf.mxu3  ;;  %v1484_v36 = vadd.f32 %v1441_v25, %v3363_v26 }
 0x29f   : > { %v1981_v32 = vadd.f32 %v1980_v45, %v1979_v24 }
 0x2a0   : > { %v2081_v31 = vsel %vm1934_vm5, %v2027_v58, 0.0  ;;  %v1753_v33 = vadd.f32 %v1709_v14, %v1613_v39 }
 0x2a1   : > { %v2082_v41 = vadd.f32 %v2081_v31, %v2080_v1  ;;  %v1848_v0 = vpop.f32.mrf.mxu0 }
 0x2a2   : > { %v1890_v22 = vadd.f32 %v1846_v63, %v1753_v33 }
 0x2a4   : > { %v1926_v7 = vadd.f32 %v3416_v52, %v1890_v22 }
 0x2a5   : > { %v1571_v27 = vpop.f32.mrf.mxu2  ;;  %v1444_v57 = vpop.f32.mrf.mxu1 }
 0x2a6   : > { %v1982_v8 = vsel %vm1934_vm5, %v1926_v7, 0.0  ;;  %v2028_v47 = vmul.f32 %v1926_v7, %v1926_v7  ;;  %2132 = vst.msk [vmem:[%s3421_s24 + $0xc0] sm:$0xff] %vm1934_vm5, %v1926_v7  ;;  %v1614_v56 = vadd.f32 %v1571_v27, %v1484_v36  ;;  %v1711_v42 = vpop.f32.mrf.mxu3  ;;  %v1485_v26 = vadd.f32 %v1444_v57, %v3370_v21 }
 0x2a7   : > { %v1983_v17 = vadd.f32 %v1982_v8, %v1981_v32 }
 0x2a8   : > { %v2083_v4 = vsel %vm1934_vm5, %v2028_v47, 0.0  ;;  %v1754_v59 = vadd.f32 %v1711_v42, %v1614_v56 }
 0x2a9   : > { %v2084_v18 = vadd.f32 %v2083_v4, %v2082_v41  ;;  %v1851_v5 = vpop.f32.mrf.mxu0 }
 0x2aa   : > { %v1891_v12 = vadd.f32 %v1848_v0, %v1754_v59 }
 0x2ac   : > { %v1927_v60 = vadd.f32 %v3416_v52, %v1891_v12 }
 0x2ad   : > { %v1574_v9 = vpop.f32.mrf.mxu2  ;;  %v1446_v53 = vpop.f32.mrf.mxu1 }
 0x2ae   : > { %v1984_v46 = vsel %vm1934_vm5, %v1927_v60, 0.0  ;;  %v2029_v23 = vmul.f32 %v1927_v60, %v1927_v60  ;;  %2133 = vst.msk [vmem:[%s3421_s24 + $0xc8] sm:$0xff] %vm1934_vm5, %v1927_v60  ;;  %v1615_v37 = vadd.f32 %v1574_v9, %v1485_v26  ;;  %v1714_v10 = vpop.f32.mrf.mxu3  ;;  %v1486_v21 = vadd.f32 %v1446_v53, %v3377_v16 }
 0x2af   : > { %v1985_v29 = vadd.f32 %v1984_v46, %v1983_v17 }
 0x2b0   : > { %v2085_v54 = vsel %vm1934_vm5, %v2029_v23, 0.0  ;;  %v1755_v19 = vadd.f32 %v1714_v10, %v1615_v37 }
 0x2b1   : > { %v2086_v49 = vadd.f32 %v2085_v54, %v2084_v18  ;;  %v1853_v43 = vpop.f32.mrf.mxu0 }
 0x2b2   : > { %v1892_v50 = vadd.f32 %v1851_v5, %v1755_v19 }
 0x2b4   : > { %v1928_v13 = vadd.f32 %v3416_v52, %v1892_v50 }
 0x2b5   : > { %v1576_v40 = vpop.f32.mrf.mxu2  ;;  %v1449_v61 = vpop.f32.mrf.mxu1 }
 0x2b6   : > { %v1986_v51 = vsel %vm1934_vm5, %v1928_v13, 0.0  ;;  %v2030_v55 = vmul.f32 %v1928_v13, %v1928_v13  ;;  %2134 = vst.msk [vmem:[%s3421_s24 + $0xd0] sm:$0xff] %vm1934_vm5, %v1928_v13  ;;  %v1616_v28 = vadd.f32 %v1576_v40, %v1486_v21  ;;  %v1716_v34 = vpop.f32.mrf.mxu3  ;;  %v1487_v16 = vadd.f32 %v1449_v61, %v3384_v3 }
 0x2b7   : > { %v1987_v62 = vadd.f32 %v1986_v51, %v1985_v29 }
 0x2b8   : > { %v2087_v30 = vsel %vm1934_vm5, %v2030_v55, 0.0  ;;  %v1756_v24 = vadd.f32 %v1716_v34, %v1616_v28 }
 0x2b9   : > { %v2088_v35 = vadd.f32 %v2087_v30, %v2086_v49  ;;  %v1856_v1 = vpop.f32.mrf.mxu0 }
 0x2ba   : > { %v1893_v38 = vadd.f32 %v1853_v43, %v1756_v24 }
 0x2bc   : > { %v1929_v6 = vadd.f32 %v3416_v52, %v1893_v38 }
 0x2bd   : > { %v1579_v63 = vpop.f32.mrf.mxu2  ;;  %v1451_v20 = vpop.f32.mrf.mxu1 }
 0x2be   : > { %v1988_v44 = vsel %vm1934_vm5, %v1929_v6, 0.0  ;;  %v2031_v11 = vmul.f32 %v1929_v6, %v1929_v6  ;;  %2135 = vst.msk [vmem:[%s3421_s24 + $0xd8] sm:$0xff] %vm1934_vm5, %v1929_v6  ;;  %v1617_v25 = vadd.f32 %v1579_v63, %v1487_v16  ;;  %v1719_v45 = vpop.f32.mrf.mxu3  ;;  %v1488_v3 = vadd.f32 %v1451_v20, %v3391_v2 }
 0x2bf   : > { %v1989_v58 = vadd.f32 %v1988_v44, %v1987_v62 }
 0x2c0   : > { %v2089_v39 = vsel %vm1934_vm5, %v2031_v11, 0.0  ;;  %v1757_v14 = vadd.f32 %v1719_v45, %v1617_v25 }
 0x2c1   : > { %v2090_v32 = vadd.f32 %v2089_v39, %v2088_v35  ;;  %v1858_v41 = vpop.f32.mrf.mxu0 }
 0x2c2   : > { %v1894_v31 = vadd.f32 %v1856_v1, %v1757_v14 }
 0x2c4   : > { %v1930_v33 = vadd.f32 %v3416_v52, %v1894_v31 }
 0x2c5   : > { %v1581_v22 = vpop.f32.mrf.mxu2  ;;  %v1454_v8 = vpop.f32.mrf.mxu1 }
 0x2c6   : > { %v1990_v0 = vsel %vm1934_vm5, %v1930_v33, 0.0  ;;  %v2032_v7 = vmul.f32 %v1930_v33, %v1930_v33  ;;  %2136 = vst.msk [vmem:[%s3421_s24 + $0xe0] sm:$0xff] %vm1934_vm5, %v1930_v33  ;;  %v1618_v36 = vadd.f32 %v1581_v22, %v1488_v3  ;;  %v1721_v27 = vpop.f32.mrf.mxu3  ;;  %v1489_v2 = vadd.f32 %v1454_v8, %v3398_v48 }
 0x2c7   : > { %v1991_v57 = vadd.f32 %v1990_v0, %v1989_v58 }
 0x2c8   : > { %v2091_v47 = vsel %vm1934_vm5, %v2032_v7, 0.0  ;;  %v1758_v56 = vadd.f32 %v1721_v27, %v1618_v36 }
 0x2c9   : > { %v2092_v42 = vadd.f32 %v2091_v47, %v2090_v32  ;;  %v1861_v9 = vpop.f32.mrf.mxu0 }
 0x2ca   : > { %v1895_v17 = vadd.f32 %v1858_v41, %v1758_v56 }
 0x2cc   : > { %v1931_v4 = vadd.f32 %v3416_v52, %v1895_v17 }
 0x2cd   : > { %v1584_v59 = vpop.f32.mrf.mxu2  ;;  %v1456_v37 = vpop.f32.mrf.mxu1 }
 0x2ce   : > { %v1992_v18 = vsel %vm1934_vm5, %v1931_v4, 0.0  ;;  %v2033_v12 = vmul.f32 %v1931_v4, %v1931_v4  ;;  %2137 = vst.msk [vmem:[%s3421_s24 + $0xe8] sm:$0xff] %vm1934_vm5, %v1931_v4  ;;  %v1619_v5 = vadd.f32 %v1584_v59, %v1489_v2  ;;  %v1724_v60 = vpop.f32.mrf.mxu3  ;;  %v1490_v48 = vadd.f32 %v1456_v37, %v3405_v15  ;;  %v2464_v15 = vld [vmem:[%s3699_s2] ss:$0 sm:$0xff] }
 0x2cf   : > { %v1993_v26 = vadd.f32 %v1992_v18, %v1991_v57 }
 0x2d0   : > { %v2093_v53 = vsel %vm1934_vm5, %v2033_v12, 0.0  ;;  %v1759_v46 = vadd.f32 %v1724_v60, %v1619_v5 }
 0x2d1   : > { %v2094_v23 = vadd.f32 %v2093_v53, %v2092_v42  ;;  %v1863_v51 = vpop.f32.mrf.mxu0 }
 0x2d2   : > { %v1896_v10 = vadd.f32 %v1861_v9, %v1759_v46 }
 0x2d4   : > { %v1932_v29 = vadd.f32 %v3416_v52, %v1896_v10 }
 0x2d5   : > { %v1586_v54 = vpop.f32.mrf.mxu2 }
 0x2d6   : > { %v1994_v19 = vsel %vm1934_vm5, %v1932_v29, 0.0  ;;  %v2034_v49 = vmul.f32 %v1932_v29, %v1932_v29  ;;  %2138 = vst.msk [vmem:[%s3421_s24 + $0xf0] sm:$0xff] %vm1934_vm5, %v1932_v29  ;;  %v1620_v50 = vadd.f32 %v1586_v54, %v1490_v48  ;;  %v1726_v13 = vpop.f32.mrf.mxu3 }
 0x2d7   : > { %v1995_v43 = vadd.f32 %v1994_v19, %v1993_v26 }
 0x2d8   : > { %v2095_v21 = vsel %vm1934_vm5, %v2034_v49, 0.0  ;;  %v1760_v40 = vadd.f32 %v1726_v13, %v1620_v50 }
 0x2d9   : > { %v2096_v61 = vadd.f32 %v2095_v21, %v2094_v23 }
 0x2da   : > { %v1897_v55 = vadd.f32 %v1863_v51, %v1760_v40 }
 0x2dc   : > { %v1933_v52 = vadd.f32 %v2464_v15, %v1897_v55 }
 0x2de   : > { %v1996_v28 = vsel %vm1934_vm5, %v1933_v52, 0.0  ;;  %v2035_v34 = vmul.f32 %v1933_v52, %v1933_v52  ;;  %2139 = vst.msk [vmem:[%s3421_s24 + $0xf8] sm:$0xff] %vm1934_vm5, %v1933_v52 }
 0x2df   : > { %v1997_v62 = vadd.f32 %v1996_v28, %v1995_v43 }
 0x2e0   : > { %v2097_v30 = vsel %vm1934_vm5, %v2035_v34, 0.0 }
 0x2e1   : > { %v1998_v24 = vrot.slane %v1997_v62, 4  ;;  %v2098_v35 = vadd.f32 %v2097_v30, %v2096_v61 }
 0x2e3   : > { %v1999_v38 = vadd.f32 %v1998_v24, %v1997_v62  ;;  %v2099_v1 = vrot.slane %v2098_v35, 4 }
 0x2e5   : > { %v2000_v6 = vrot.slane %v1999_v38, 2  ;;  %v2100_v16 = vadd.f32 %v2099_v1, %v2098_v35 }
 0x2e7   : > { %v2001_v63 = vadd.f32 %v2000_v6, %v1999_v38  ;;  %v2101_v20 = vrot.slane %v2100_v16, 2 }
 0x2e9   : > { %v2002_v44 = vrot.slane %v2001_v63, 1  ;;  %v2102_v11 = vadd.f32 %v2101_v20, %v2100_v16 }
 0x2eb   : > { %v2103_v25 = vrot.slane %v2102_v11, 1  ;;  %v2003_v45 = vadd.f32 %v2002_v44, %v2001_v63 }
 0x2ed   : > { %v2104_v58 = vadd.f32 %v2103_v25, %v2102_v11 }
 0x2ef   : > { %v2105_v39 = vsel %vm545_vm0, %v2003_v45, %v2104_v58 }
 0x2f0   : > { %2107 = vst.msk [vmem:[%s241_s30] sm:$0x3] %vm2106_vm6, %v2105_v39 }
 0x2f1 PF: > { %s15_s17 = sadd.s32 1, %s2487_s17   ;;  %s3839_s15 = smov %s2483_s16 }
 0x2f2   : > { %p12_p5 = scmp.ge.s32.totalorder %s15_s17, 4   ;;  %s3840_s16 = smov %s3842_s18 }
 0x2f4   :  { %14 = sbr.rel (!%p12_p5) target bundleno = 2 (0x2), region = 83 }

// kernel: encoder_decoder_forward.9
= control target key start
LH: loop header
LB: loop body
LE: loop exit
PB: predicated region body
PF: predicated region fallthrough
CT: control target
= control target key end

     0   :  { %s2563_s12 = smov 0   ;;  %s2565_s13 = smov 0   ;;  %s3689_s0 = inlined_call_operand.vmem [shape: f32[2,18,18,32], index: 0, kind: input, shape index: {}]   ;;  %s3690_s1 = inlined_call_operand.vmem [shape: bf16[9,32,3], index: 1, kind: input, shape index: {}]   ;;  %s3691_s2 = inlined_call_operand.vmem [shape: f32[1,3], index: 2, kind: input, shape index: {}]   ;;  %s3692_s3 = inlined_call_operand.vmem [shape: f32[2,16,16,3], index: 3, kind: output, shape index: {}]  }
   0x1   :  { %s2567_s14 = smov 0  }
   0x2 LB: > { %s25_s15 = sadd.s32 1, %s2537_s13  ;;  %p2150_p0 = scmp.ge.s32.totalorder %s2541_s14, 1  ;;  %s2541_s14 = sphi %s2567_s14, %s13_s14   ;;  %s2537_s13 = sphi %s2565_s13, %s3834_s13   ;;  %s2533_s12 = sphi %s2563_s12, %s3833_s12  }
   0x3   : > { %p27_p1 = scmp.ge.s32.totalorder %s25_s15, 2  ;;  %p151_p2 = scmp.lt.s32.totalorder %s2541_s14, 3 }
   0x5   : > { %s3836_s15 = smov (%p27_p1, %s25_s15), 0  ;;  %p152_p3 = pnand %p2150_p0, %p151_p2 }
   0x7   : > { %155 = sbr.rel (%p152_p3) target bundleno = 742 (0x2e6), region = 32 }
   0xc   : > { %v2408_v0 = vld [vmem:[%s3690_s1 + $0x18] sm:$0xff]  ;;  %p180_p4 = scmp.lt.s32.totalorder %s2533_s12, 1  ;;  %v2407_v1 = vld [vmem:[%s3690_s1 + $0x10] sm:$0xff]  ;;  %v2410_v2 = vld [vmem:[%s3690_s1 + $0x28] sm:$0xff]  ;;  %vm322_vm0 = vcmask 1046528   ;;  %vm468_vm1 = vcmask 261120  }
   0xd   : > { %2423 = vmatpush.bf16.msra.mxu1 %v2408_v0  ;;  %2424 = vmatpush.bf16.msra.mxu2 %v2408_v0  ;;  %v2412_v3 = vld [vmem:[%s3690_s1 + $0x38] sm:$0xff]  ;;  %v2406_v4 = vld [vmem:[%s3690_s1 + $0x8] sm:$0xff]  ;;  %v2409_v56 = vld [vmem:[%s3690_s1 + $0x20] sm:$0xff]  ;;  %vm755_vm2 = vcmask 1045504   ;;  %vm2024_vm3 = vcmask 23552  }
   0xe   : > { %s3838_s12 = smov (!%p180_p4, %s2533_s12), 1  ;;  %2425 = vmatpush.bf16.msra.mxu3 %v2408_v0  ;;  %523 = vmatpush.bf16.msra.mxu0 %v2408_v0  ;;  %v2414_v5 = vld [vmem:[%s3690_s1 + $0x48] sm:$0xff]  ;;  %v2411_v61 = vld [vmem:[%s3690_s1 + $0x30] sm:$0xff] }
   0xf   : > { %s2429_s20 = smul.u32 432, %s3838_s12  ;;  %s2404_s9 = sshll.u32 %s3838_s12, 8 }
  0x10   : > { %s3488_s16 = scalar_lea.vmem %s3692_s3, %s2404_s9 }
  0x11   : > { %2426 = vmatpush.bf16.msra.mxu1 %v2407_v1  ;;  %2427 = vmatpush.bf16.msra.mxu2 %v2407_v1  ;;  %s2605_s4 = scalar_lea.vmem %s3689_s0, %s2429_s20 }
  0x12   : > { %2428 = vmatpush.bf16.msra.mxu3 %v2407_v1  ;;  %524 = vmatpush.bf16.msra.mxu0 %v2407_v1  ;;  %v2608_v6 = vld [vmem:[%s2605_s4 + $0x60] sm:$0xff]  ;;  %v2611_v7 = vld [vmem:[%s2605_s4 + $0x68] sm:$0xff]  ;;  %v2614_v8 = vld [vmem:[%s2605_s4 + $0x70] sm:$0x3] }
  0x13   : > { %v343_v9 = vrot.slane %v2608_v6, 1  ;;  %v344_v10 = vrot.slane %v2611_v7, 1  ;;  %v346_v11 = vrot.slane %v2614_v8, 1  ;;  %v2620_v12 = vld [vmem:[%s2605_s4 + $0xc0] sm:$0xff]  ;;  %v2623_v13 = vld [vmem:[%s2605_s4 + $0xc8] sm:$0xff]  ;;  %v2674_v41 = vld [vmem:[%s2605_s4 + $0x78] sm:$0xff] }
  0x14   : > { %v2626_v14 = vld [vmem:[%s2605_s4 + $0x120] sm:$0xff]  ;;  %v2629_v15 = vld [vmem:[%s2605_s4 + $0xd0] sm:$0x3]  ;;  %v363_v16 = vrot.slane %v2620_v12, 1  ;;  %v364_v17 = vrot.slane %v2623_v13, 1  ;;  %v2634_v18 = vld [vmem:[%s2605_s4 + $0x128] sm:$0xff] }
  0x15   : > { %3739 = vst [vmem:[#allocation2_spill] sm:$0xff] %v2626_v14  ;;  %955 = vmatpush.bf16.msrb.mxu2 %v2410_v2  ;;  %v383_v19 = vrot.slane %v2626_v14, 1  ;;  %672 = vmatpush.bf16.msrb.mxu1 %v2406_v4  ;;  %v345_v20 = vsel %vm322_vm0, %v343_v9, %v344_v10  ;;  %v347_v21 = vsel %vm322_vm0, %v344_v10, %v346_v11  ;;  %v366_v22 = vrot.slane %v2629_v15, 1  ;;  %v2641_v23 = vld [vmem:[%s2605_s4 + $0x130] sm:$0x3]  ;;  %v2644_v24 = vld [vmem:[%s2605_s4] sm:$0xff] }
  0x16   : > { %1097 = vmatpush.bf16.msrb.mxu3 %v2412_v3  ;;  %3740 = vst [vmem:[#allocation3_spill] sm:$0xff] %v2634_v18  ;;  %1249 = vmatpush.bf16.msrb.mxu0 %v2414_v5  ;;  %v2647_v25 = vld [vmem:[%s2605_s4 + $0x8] sm:$0xff]  ;;  %v2649_v26 = vpack.c.bf16 %v347_v21, %v345_v20  ;;  %v365_v27 = vsel %vm322_vm0, %v363_v16, %v364_v17  ;;  %v384_v28 = vrot.slane %v2634_v18, 1  ;;  %v386_v29 = vrot.slane %v2641_v23, 1  ;;  %v2655_v30 = vld [vmem:[%s2605_s4 + $0x10] sm:$0x3] }
  0x17   : > { %3741 = vst [vmem:[#allocation4_spill] sm:$0xff] %v2641_v23  ;;  %v367_v31 = vsel %vm322_vm0, %v364_v17, %v366_v22  ;;  %v323_v32 = vrot.slane %v2644_v24, 1  ;;  %v324_v33 = vrot.slane %v2647_v25, 1  ;;  %v326_v37 = vrot.slane %v2655_v30, 1  ;;  %v2677_v42 = vld [vmem:[%s2605_s4 + $0x80] sm:$0xff]  ;;  %v2685_v45 = vld [vmem:[%s2605_s4 + $0xd8] sm:$0xff] }
  0x18   : > { %2170 = vmatmul.msk.bf16.vlgmr.msra.gmra.mxu1 %vm468_vm1, %v2649_v26  ;;  %v2662_v34 = vpack.c.bf16 %v367_v31, %v365_v27  ;;  %v385_v35 = vsel %vm322_vm0, %v383_v19, %v384_v28  ;;  %v387_v36 = vsel %vm322_vm0, %v384_v28, %v386_v29  ;;  %v2680_v43 = vld [vmem:[%s2605_s4 + $0x88] sm:$0x3]  ;;  %v2688_v46 = vld [vmem:[%s2605_s4 + $0xe0] sm:$0xff]  ;;  %v2694_v48 = vld [vmem:[%s2605_s4 + $0x138] sm:$0xff]  ;;  %v348_v49 = vrot.slane %v2674_v41, 1 }
  0x19   : > { %v2667_v38 = vpack.c.bf16 %v387_v36, %v385_v35  ;;  %v325_v39 = vsel %vm322_vm0, %v323_v32, %v324_v33  ;;  %v327_v40 = vsel %vm322_vm0, %v324_v33, %v326_v37  ;;  %v2691_v47 = vld [vmem:[%s2605_s4 + $0xe8] sm:$0x3]  ;;  %3744 = vst [vmem:[#allocation7_spill] sm:$0xff] %v2694_v48  ;;  %v349_v50 = vrot.slane %v2677_v42, 1  ;;  %v2701_v52 = vld [vmem:[%s2605_s4 + $0x140] sm:$0xff]  ;;  %v2708_v55 = vld [vmem:[%s2605_s4 + $0x18] sm:$0xff]  ;;  %956 = vmatpush.bf16.msrb.mxu2 %v2409_v56 }
  0x1a   : > { %3742 = vst [vmem:[#allocation5_spill] sm:$0xff] %v2662_v34  ;;  %2174 = vmatmul.msk.bf16.vlgmr.msra.gmra.mxu2 %vm468_vm1, %v2662_v34  ;;  %v435_v44 = vpack.c.bf16 %v327_v40, %v325_v39  ;;  %v351_v51 = vrot.slane %v2680_v43, 1  ;;  %v2704_v53 = vld [vmem:[%s2605_s4 + $0x148] sm:$0x3]  ;;  %v368_v54 = vrot.slane %v2685_v45, 1  ;;  %v369_v57 = vrot.slane %v2688_v46, 1  ;;  %1098 = vmatpush.bf16.msrb.mxu3 %v2411_v61 }
  0x1b   : > { %3743 = vst [vmem:[#allocation6_spill] sm:$0xff] %v2667_v38  ;;  %2178 = vmatmul.msk.bf16.vlgmr.msra.gmra.mxu3 %vm468_vm1, %v2667_v38  ;;  %v371_v58 = vrot.slane %v2691_v47, 1  ;;  %v2716_v59 = vld [vmem:[%s2605_s4 + $0x20] sm:$0xff]  ;;  %v2719_v60 = vld [vmem:[%s2605_s4 + $0x28] sm:$0x3]  ;;  %v388_v62 = vrot.slane %v2694_v48, 1  ;;  %v350_v3 = vsel %vm322_vm0, %v348_v49, %v349_v50 }
  0x1c   : > { %2166 = vmatmul.msk.bf16.vlgmr.msra.gmra.mxu0 %vm468_vm1, %v435_v44  ;;  %3745 = vst [vmem:[#allocation8_spill] sm:$0xff] %v2701_v52  ;;  %v389_v63 = vrot.slane %v2701_v52, 1  ;;  %v391_v0 = vrot.slane %v2704_v53, 1  ;;  %v2405_v1 = vld [vmem:[%s3690_s1] sm:$0xff]  ;;  %v352_v4 = vsel %vm322_vm0, %v349_v50, %v351_v51  ;;  %v328_v5 = vrot.slane %v2708_v55, 1  ;;  %v2757_v31 = vld [vmem:[%s2605_s4 + $0x90] sm:$0xff] }
  0x1d   : > { %3746 = vst [vmem:[#allocation9_spill] sm:$0xff] %v2704_v53  ;;  %v2413_v2 = vld [vmem:[%s3690_s1 + $0x40] sm:$0xff]  ;;  %v329_v9 = vrot.slane %v2716_v59, 1  ;;  %v331_v10 = vrot.slane %v2719_v60, 1  ;;  %673 = vmatpush.bf16.msrb.mxu1 %v2405_v1  ;;  %v370_v11 = vsel %vm322_vm0, %v368_v54, %v369_v57  ;;  %v372_v16 = vsel %vm322_vm0, %v369_v57, %v371_v58  ;;  %v2760_v32 = vld [vmem:[%s2605_s4 + $0x98] sm:$0xff]  ;;  %v2768_v35 = vld [vmem:[%s2605_s4 + $0xf0] sm:$0xff] }
  0x1e   : > { %1250 = vmatpush.bf16.msrb.mxu0 %v2413_v2  ;;  %v2740_v17 = vpack.c.bf16 %v352_v4, %v350_v3  ;;  %v390_v19 = vsel %vm322_vm0, %v388_v62, %v389_v63  ;;  %v392_v20 = vsel %vm322_vm0, %v389_v63, %v391_v0  ;;  %v2744_v21 = vpack.c.bf16 %v372_v16, %v370_v11  ;;  %v2763_v33 = vld [vmem:[%s2605_s4 + $0xa0] sm:$0x3]  ;;  %v2771_v36 = vld [vmem:[%s2605_s4 + $0xf8] sm:$0xff]  ;;  %v2777_v39 = vld [vmem:[%s2605_s4 + $0x150] sm:$0xff] }
  0x1f   : > { %v330_v22 = vsel %vm322_vm0, %v328_v5, %v329_v9  ;;  %v332_v27 = vsel %vm322_vm0, %v329_v9, %v331_v10  ;;  %v2748_v28 = vpack.c.bf16 %v392_v20, %v390_v19  ;;  %v2774_v37 = vld [vmem:[%s2605_s4 + $0x100] sm:$0x3]  ;;  %3749 = vst [vmem:[#allocation12_spill] sm:$0xff] %v2777_v39  ;;  %v353_v40 = vrot.slane %v2757_v31, 1  ;;  %v2785_v50 = vld [vmem:[%s2605_s4 + $0x158] sm:$0xff]  ;;  %v2791_v54 = vld [vmem:[%s2605_s4 + $0x30] sm:$0xff] }
  0x20   : > { %3747 = vst [vmem:[#allocation10_spill] sm:$0xff] %v2744_v21  ;;  %v2752_v29 = vpack.c.bf16 %v332_v27, %v330_v22  ;;  %v354_v44 = vrot.slane %v2760_v32, 1  ;;  %v356_v49 = vrot.slane %v2763_v33, 1  ;;  %v2788_v51 = vld [vmem:[%s2605_s4 + $0x160] sm:$0x3]  ;;  %v373_v56 = vrot.slane %v2768_v35, 1 }
  0x21   : > { %3748 = vst [vmem:[#allocation11_spill] sm:$0xff] %v2748_v28  ;;  %v374_v57 = vrot.slane %v2771_v36, 1  ;;  %v376_v58 = vrot.slane %v2774_v37, 1  ;;  %v2797_v61 = vld [vmem:[%s2605_s4 + $0x38] sm:$0xff]  ;;  %v2800_v62 = vld [vmem:[%s2605_s4 + $0x40] sm:$0x3] }
  0x22   : > { %3750 = vst [vmem:[#allocation13_spill] sm:$0xff] %v2785_v50  ;;  %v393_v63 = vrot.slane %v2777_v39, 1  ;;  %v394_v0 = vrot.slane %v2785_v50, 1  ;;  %v396_v1 = vrot.slane %v2788_v51, 1  ;;  %v355_v2 = vsel %vm322_vm0, %v353_v40, %v354_v44  ;;  %v2878_v50 = vld [vmem:[%s2605_s4 + $0x48] sm:$0xff] }
  0x23   : > { %3751 = vst [vmem:[#allocation14_spill] sm:$0xff] %v2788_v51  ;;  %v357_v3 = vsel %vm322_vm0, %v354_v44, %v356_v49  ;;  %v333_v4 = vrot.slane %v2791_v54, 1  ;;  %v334_v5 = vrot.slane %v2797_v61, 1  ;;  %v336_v9 = vrot.slane %v2800_v62, 1  ;;  %v2884_v39 = vld [vmem:[%s2605_s4 + $0x58] sm:$0x3] }
  0x24   : > { %v375_v10 = vsel %vm322_vm0, %v373_v56, %v374_v57  ;;  %v377_v11 = vsel %vm322_vm0, %v374_v57, %v376_v58  ;;  %v2812_v16 = vpack.c.bf16 %v357_v3, %v355_v2  ;;  %v395_v19 = vsel %vm322_vm0, %v393_v63, %v394_v0  ;;  %v2827_v56 = vld [vmem:[%s2605_s4 + $0xa8] sm:$0xff]  ;;  %v2832_v57 = vld [vmem:[%s2605_s4 + $0xb0] sm:$0xff]  ;;  %v2835_v58 = vld [vmem:[%s2605_s4 + $0xb8] sm:$0x3] }
  0x25   : > { %v397_v20 = vsel %vm322_vm0, %v394_v0, %v396_v1  ;;  %v2816_v22 = vpack.c.bf16 %v377_v11, %v375_v10  ;;  %v335_v27 = vsel %vm322_vm0, %v333_v4, %v334_v5  ;;  %v337_v40 = vsel %vm322_vm0, %v334_v5, %v336_v9  ;;  %v2838_v63 = vld [vmem:[%s2605_s4 + $0x108] sm:$0xff]  ;;  %v2843_v0 = vld [vmem:[%s2605_s4 + $0x110] sm:$0xff]  ;;  %v2846_v1 = vld [vmem:[%s2605_s4 + $0x118] sm:$0x3] }
  0x26   : > { %3752 = vst [vmem:[#allocation15_spill] sm:$0xff] %v2812_v16  ;;  %v2820_v44 = vpack.c.bf16 %v397_v20, %v395_v19  ;;  %v2824_v49 = vpack.c.bf16 %v337_v40, %v335_v27  ;;  %v2418_v2 = vld [vmem:[%s3690_s1 + $0x68] sm:$0xff]  ;;  %v2855_v4 = vld [vmem:[%s2605_s4 + $0x170] sm:$0xff]  ;;  %v2858_v5 = vld [vmem:[%s2605_s4 + $0x178] sm:$0x3]  ;;  %v358_v9 = vrot.slane %v2827_v56, 1 }
  0x27   : > { %v2852_v3 = vld [vmem:[%s2605_s4 + $0x168] sm:$0xff]  ;;  %3755 = vst [vmem:[#allocation18_spill] sm:$0xff] %v2855_v4  ;;  %v359_v10 = vrot.slane %v2832_v57, 1  ;;  %v361_v11 = vrot.slane %v2835_v58, 1  ;;  %1540 = vmatpush.bf16.msra.mxu2 %v2418_v2  ;;  %v2420_v19 = vld [vmem:[%s3690_s1 + $0x78] sm:$0xff]  ;;  %v378_v40 = vrot.slane %v2838_v63, 1 }
  0x28   : > { %2171 = vmatmul.msk.bf16.gmra.mxu1 %vm468_vm1, %v2740_v17  ;;  %3753 = vst [vmem:[#allocation16_spill] sm:$0xff] %v2820_v44  ;;  %v2416_v20 = vld [vmem:[%s3690_s1 + $0x58] sm:$0xff]  ;;  %v2422_v27 = vld [vmem:[%s3690_s1 + $0x88] sm:$0xff]  ;;  %v379_v51 = vrot.slane %v2843_v0, 1  ;;  %v2881_v2 = vld [vmem:[%s2605_s4 + $0x50] sm:$0xff]  ;;  %1692 = vmatpush.bf16.msra.mxu3 %v2420_v19  ;;  %v398_v53 = vrot.slane %v2852_v3, 1 }
  0x29   : > { %3754 = vst [vmem:[#allocation17_spill] sm:$0xff] %v2852_v3  ;;  %1398 = vmatpush.bf16.msra.mxu1 %v2416_v20  ;;  %v401_v52 = vrot.slane %v2858_v5, 1  ;;  %1841 = vmatpush.bf16.msra.mxu0 %v2422_v27  ;;  %v360_v48 = vsel %vm322_vm0, %v358_v9, %v359_v10  ;;  %v362_v23 = vsel %vm322_vm0, %v359_v10, %v361_v11  ;;  %v338_v38 = vrot.slane %v2878_v50, 1 }
  0x2a   : > { %2175 = vmatmul.msk.bf16.gmra.mxu2 %vm468_vm1, %v2744_v21  ;;  %3756 = vst [vmem:[#allocation19_spill] sm:$0xff] %v2858_v5  ;;  %v339_v18 = vrot.slane %v2881_v2, 1  ;;  %v341_v14 = vrot.slane %v2884_v39, 1  ;;  %v380_v19 = vsel %vm322_vm0, %v378_v40, %v379_v51  ;;  %v2896_v3 = vpack.c.bf16 %v362_v23, %v360_v48 }
  0x2b   : > { %2179 = vmatmul.msk.bf16.gmra.mxu3 %vm468_vm1, %v2748_v28  ;;  %v399_v28 = vrot.slane %v2855_v4, 1  ;;  %v759_v23 = vrot.slane %v2655_v30, 2  ;;  %v761_v30 = vrot.slane %v2708_v55, 2 }
  0x2c   : > { %2167 = vmatmul.msk.bf16.gmra.mxu0 %vm468_vm1, %v2752_v29  ;;  %3757 = vst [vmem:[#allocation20_spill] sm:$0xff] %v2896_v3  ;;  %v340_v9 = vsel %vm322_vm0, %v338_v38, %v339_v18  ;;  %v342_v10 = vsel %vm322_vm0, %v339_v18, %v341_v14  ;;  %v756_v14 = vrot.slane %v2644_v24, 2  ;;  %v757_v18 = vrot.slane %v2647_v25, 2 }
  0x2d   : > { %v400_v4 = vsel %vm322_vm0, %v398_v53, %v399_v28  ;;  %v402_v27 = vsel %vm322_vm0, %v399_v28, %v401_v52  ;;  %v2908_v40 = vpack.c.bf16 %v342_v10, %v340_v9  ;;  %v254_v52 = vpack.c.bf16 %v2647_v25, %v2644_v24 }
  0x2e   : > { %v2904_v11 = vpack.c.bf16 %v402_v27, %v400_v4  ;;  %v758_v38 = vsel %vm755_vm2, %v756_v14, %v757_v18  ;;  %v760_v48 = vsel %vm755_vm2, %v757_v18, %v759_v23  ;;  %v255_v28 = vpack.c.bf16 %v2716_v59, %v2708_v55 }
  0x2f   : > { %v868_v53 = vpack.c.bf16 %v760_v48, %v758_v38  ;;  %v766_v55 = vrot.slane %v2791_v54, 2  ;;  %v2957_v9 = vpack.c.bf16 %v2881_v2, %v2878_v50  ;;  %v2976_v18 = vpack.c.bf16 %v2611_v7, %v2608_v6 }
  0x30   : > { %3758 = vst [vmem:[#allocation21_spill] sm:$0xff] %v2904_v11 }
  0x38   : > { %2172 = vmatmul.msk.bf16.gmra.mxu1 %vm468_vm1, %v2812_v16 }
  0x3a   : > { %2176 = vmatmul.msk.bf16.gmra.mxu2 %vm468_vm1, %v2816_v22 }
  0x3b   : > { %2180 = vmatmul.msk.bf16.gmra.mxu3 %vm468_vm1, %v2820_v44  ;;  %v381_v44 = vrot.slane %v2846_v1, 1 }
  0x3c   : > { %2168 = vmatmul.msk.bf16.gmra.mxu0 %vm468_vm1, %v2824_v49 }
  0x3d   : > { %v382_v20 = vsel %vm322_vm0, %v379_v51, %v381_v44  ;;  %v762_v51 = vrot.slane %v2716_v59, 2  ;;  %v764_v44 = vrot.slane %v2719_v60, 2  ;;  %v767_v59 = vrot.slane %v2797_v61, 2 }
  0x3e   : > { %v2900_v5 = vpack.c.bf16 %v382_v20, %v380_v19  ;;  %v2939_v19 = vpack.c.bf16 %v2797_v61, %v2791_v54  ;;  %v769_v60 = vrot.slane %v2800_v62, 2  ;;  %v771_v54 = vrot.slane %v2878_v50, 2 }
  0x3f   : > { %v763_v24 = vsel %vm755_vm2, %v761_v30, %v762_v51  ;;  %v765_v25 = vsel %vm755_vm2, %v762_v51, %v764_v44  ;;  %v772_v61 = vrot.slane %v2881_v2, 2  ;;  %v774_v62 = vrot.slane %v2884_v39, 2 }
  0x40   : > { %v2935_v4 = vpack.c.bf16 %v765_v25, %v763_v24  ;;  %v770_v20 = vsel %vm755_vm2, %v767_v59, %v769_v60  ;;  %v776_v39 = vrot.slane %v2608_v6, 2  ;;  %v777_v50 = vrot.slane %v2611_v7, 2 }
  0x41   : > { %v773_v10 = vsel %vm755_vm2, %v771_v54, %v772_v61  ;;  %v775_v23 = vsel %vm755_vm2, %v772_v61, %v774_v62  ;;  %v779_v2 = vrot.slane %v2614_v8, 2  ;;  %v781_v51 = vrot.slane %v2674_v41, 2 }
  0x42   : > { %v2972_v14 = vpack.c.bf16 %v775_v23, %v773_v10  ;;  %v778_v38 = vsel %vm755_vm2, %v776_v39, %v777_v50  ;;  %v782_v44 = vrot.slane %v2677_v42, 2  ;;  %v784_v24 = vrot.slane %v2680_v43, 2 }
  0x43   : > { %v780_v48 = vsel %vm755_vm2, %v777_v50, %v779_v2  ;;  %v786_v10 = vrot.slane %v2757_v31, 2  ;;  %v787_v23 = vrot.slane %v2760_v32, 2  ;;  %v789_v39 = vrot.slane %v2763_v33, 2  ;;  %v2417_v33 = vld [vmem:[%s3690_s1 + $0x60] sm:$0xff] }
  0x44   : > { %1541 = vmatpush.bf16.msra.mxu2 %v2417_v33  ;;  %v2421_v33 = vld [vmem:[%s3690_s1 + $0x80] sm:$0xff] }
  0x45   : > { %v788_v2 = vsel %vm755_vm2, %v786_v10, %v787_v23  ;;  %v2419_v10 = vld [vmem:[%s3690_s1 + $0x70] sm:$0xff]  ;;  %1842 = vmatpush.bf16.msra.mxu0 %v2421_v33  ;;  %v796_v33 = vrot.slane %v2620_v12, 2 }
  0x46   : > { %1693 = vmatpush.bf16.msra.mxu3 %v2419_v10 }
  0x48   : > { %2173 = vmatmul.msk.bf16.gmra.mxu1 %vm468_vm1, %v2896_v3 }
  0x4a   : > { %2177 = vmatmul.msk.bf16.gmra.mxu2 %vm468_vm1, %v2900_v5 }
  0x4b   : > { %2181 = vmatmul.msk.bf16.gmra.mxu3 %vm468_vm1, %v2904_v11 }
  0x4c   : > { %2169 = vmatmul.msk.bf16.gmra.mxu0 %vm468_vm1, %v2908_v40 }
  0x58   : > { %2190 = vmatmul.msk.bf16.vlgmr.msrb.gmra.mxu1 %vm468_vm1, %v254_v52 }
  0x5a   : > { %2218 = vmatmul.msk.bf16.vlgmr.msrb.gmra.mxu2 %vm468_vm1, %v868_v53  ;;  %v2993_v53 = vpack.c.bf16 %v780_v48, %v778_v38  ;;  %v790_v38 = vsel %vm755_vm2, %v787_v23, %v789_v39  ;;  %v791_v39 = vrot.slane %v2827_v56, 2 }
  0x5b   : > { %2246 = vmatmul.msk.bf16.vlgmr.msrb.gmra.mxu3 %vm468_vm1, %v255_v28 }
  0x5c   : > { %2274 = vmatmul.msk.bf16.vlgmr.msrb.gmra.mxu0 %vm468_vm1, %v2752_v29  ;;  %v768_v29 = vsel %vm755_vm2, %v766_v55, %v767_v59  ;;  %v783_v55 = vsel %vm755_vm2, %v781_v51, %v782_v44  ;;  %v785_v59 = vsel %vm755_vm2, %v782_v44, %v784_v24  ;;  %v3063_v24 = vpack.c.bf16 %v790_v38, %v788_v2 }
  0x5d   : > { %v2953_v27 = vpack.c.bf16 %v770_v20, %v768_v29  ;;  %v3028_v54 = vpack.c.bf16 %v785_v59, %v783_v55  ;;  %v792_v2 = vrot.slane %v2832_v57, 2  ;;  %v794_v38 = vrot.slane %v2835_v58, 2 }
  0x5e   : > { %3765 = vst [vmem:[#allocation28_spill] sm:$0xff] %v3063_v24 }
  0x5f   : > { %3761 = vst [vmem:[#allocation24_spill] sm:$0xff] %v3028_v54 }
  0x68   : > { %2191 = vmatmul.msk.bf16.gmra.mxu1 %vm468_vm1, %v255_v28  ;;  %v2997_v28 = vpack.c.bf16 %v2677_v42, %v2674_v41  ;;  %v3032_v41 = vpack.c.bf16 %v2760_v32, %v2757_v31  ;;  %v3067_v31 = vpack.c.bf16 %v2832_v57, %v2827_v56  ;;  %v795_v56 = vsel %vm755_vm2, %v792_v2, %v794_v38 }
  0x69   : > { %v799_v38 = vrot.slane %v2629_v15, 2 }
  0x6a   : > { %2219 = vmatmul.msk.bf16.gmra.mxu2 %vm468_vm1, %v2935_v4  ;;  %3762 = vst [vmem:[#allocation25_spill] sm:$0xff] %v3032_v41 }
  0x6b   : > { %2247 = vmatmul.msk.bf16.gmra.mxu3 %vm468_vm1, %v2939_v19  ;;  %3766 = vst [vmem:[#allocation29_spill] sm:$0xff] %v3067_v31 }
  0x6c   : > { %2275 = vmatmul.msk.bf16.gmra.mxu0 %vm468_vm1, %v2824_v49 }
  0x78   : > { %2192 = vmatmul.msk.bf16.gmra.mxu1 %vm468_vm1, %v2939_v19 }
  0x7a   : > { %2220 = vmatmul.msk.bf16.gmra.mxu2 %vm468_vm1, %v2953_v27 }
  0x7b   : > { %2248 = vmatmul.msk.bf16.gmra.mxu3 %vm468_vm1, %v2957_v9 }
  0x7c   : > { %2276 = vmatmul.msk.bf16.gmra.mxu0 %vm468_vm1, %v2908_v40 }
  0x88   : > { %2193 = vmatmul.msk.bf16.gmra.mxu1 %vm468_vm1, %v2957_v9 }
  0x8a   : > { %2221 = vmatmul.msk.bf16.gmra.mxu2 %vm468_vm1, %v2972_v14 }
  0x8b   : > { %2249 = vmatmul.msk.bf16.gmra.mxu3 %vm468_vm1, %v2976_v18 }
  0x8c   : > { %2277 = vmatmul.msk.bf16.gmra.mxu0 %vm468_vm1, %v2649_v26 }
  0x95   : > { %v2991_v52 = vpop.f32.mrf.mxu1 }
  0x98   : > { %2194 = vmatmul.msk.bf16.gmra.mxu1 %vm468_vm1, %v2976_v18 }
  0x99   : > { %v3001_v6 = vpop.f32.mrf.mxu0 }
  0x9a   : > { %2222 = vmatmul.msk.bf16.gmra.mxu2 %vm468_vm1, %v2993_v53 }
  0x9b   : > { %2250 = vmatmul.msk.bf16.gmra.mxu3 %vm468_vm1, %v2997_v28 }
  0x9c   : > { %2278 = vmatmul.msk.bf16.gmra.mxu0 %vm468_vm1, %v2740_v17 }
  0x9d   : > { %v3009_v7 = vpop.f32.mrf.mxu2  ;;  %v3011_v8 = vpop.f32.mrf.mxu1 }
  0x9e   : > { %v3013_v30 = vpop.f32.mrf.mxu3 }
  0x9f   : > { %3759 = vst [vmem:[#allocation22_spill] sm:$0xff] %v3013_v30 }
  0xa1   : > { %v3018_v25 = vpop.f32.mrf.mxu0 }
  0xa5   : > { %v3022_v60 = vpop.f32.mrf.mxu2  ;;  %v3024_v29 = vpop.f32.mrf.mxu1 }
  0xa6   : > { %v3026_v20 = vpop.f32.mrf.mxu3 }
  0xa7   : > { %3760 = vst [vmem:[#allocation23_spill] sm:$0xff] %v3026_v20 }
  0xa8   : > { %2195 = vmatmul.msk.bf16.gmra.mxu1 %vm468_vm1, %v2997_v28 }
  0xa9   : > { %v3036_v42 = vpop.f32.mrf.mxu0 }
  0xaa   : > { %2223 = vmatmul.msk.bf16.gmra.mxu2 %vm468_vm1, %v3028_v54 }
  0xab   : > { %2251 = vmatmul.msk.bf16.gmra.mxu3 %vm468_vm1, %v3032_v41 }
  0xac   : > { %2279 = vmatmul.msk.bf16.gmra.mxu0 %vm468_vm1, %v2812_v16 }
  0xad   : > { %v3044_v43 = vpop.f32.mrf.mxu2  ;;  %v3046_v61 = vpop.f32.mrf.mxu1 }
  0xae   : > { %v3048_v62 = vpop.f32.mrf.mxu3 }
  0xaf   : > { %3763 = vst [vmem:[#allocation26_spill] sm:$0xff] %v3048_v62 }
  0xb1   : > { %v3053_v50 = vpop.f32.mrf.mxu0 }
  0xb5   : > { %v3057_v48 = vpop.f32.mrf.mxu2  ;;  %v3059_v51 = vpop.f32.mrf.mxu1 }
  0xb6   : > { %v3061_v44 = vpop.f32.mrf.mxu3 }
  0xb7   : > { %3764 = vst [vmem:[#allocation27_spill] sm:$0xff] %v3061_v44  ;;  %v2415_v44 = vld [vmem:[%s3690_s1 + $0x50] sm:$0xff] }
  0xb8   : > { %2196 = vmatmul.msk.bf16.gmra.mxu1 %vm468_vm1, %v3032_v41 }
  0xb9   : > { %v3071_v32 = vpop.f32.mrf.mxu0  ;;  %1399 = vmatpush.bf16.msra.mxu1 %v2415_v44  ;;  %v3114_v44 = vpack.c.bf16 %v2623_v13, %v2620_v12  ;;  %v3148_v12 = vpack.c.bf16 %v2688_v46, %v2685_v45 }
  0xba   : > { %2224 = vmatmul.msk.bf16.gmra.mxu2 %vm468_vm1, %v3063_v24 }
  0xbb   : > { %2252 = vmatmul.msk.bf16.gmra.mxu3 %vm468_vm1, %v3067_v31  ;;  %3770 = vst [vmem:[#allocation33_spill] sm:$0xff] %v3114_v44 }
  0xbc   : > { %2280 = vmatmul.msk.bf16.gmra.mxu0 %vm468_vm1, %v2896_v3 }
  0xbd   : > { %v3082_v55 = vpop.f32.mrf.mxu2  ;;  %v3084_v59 = vpop.f32.mrf.mxu1 }
  0xbe   : > { %v3089_v23 = vpop.f32.mrf.mxu3 }
  0xbf   : > { %3767 = vst [vmem:[#allocation30_spill] sm:$0xff] %v3089_v23  ;;  %v793_v23 = vsel %vm755_vm2, %v791_v39, %v792_v2 }
  0xc0   : > { %v3110_v3 = vpack.c.bf16 %v795_v56, %v793_v23  ;;  %v797_v56 = vrot.slane %v2623_v13, 2 }
  0xc1   : > { %v3097_v62 = vpop.f32.mrf.mxu0 }
  0xc2   : > { %3769 = vst [vmem:[#allocation32_spill] sm:$0xff] %v3110_v3 }
  0xc5   : > { %v3104_v57 = vpop.f32.mrf.mxu2  ;;  %v3106_v58 = vpop.f32.mrf.mxu1 }
  0xc6   : > { %v3108_v10 = vpop.f32.mrf.mxu3 }
  0xc7   : > { %3768 = vst [vmem:[#allocation31_spill] sm:$0xff] %v3108_v10 }
  0xc8   : > { %2197 = vmatmul.msk.bf16.gmra.mxu1 %vm468_vm1, %v3067_v31  ;;  %v800_v31 = vsel %vm755_vm2, %v797_v56, %v799_v38  ;;  %v804_v38 = vrot.slane %v2691_v47, 2 }
  0xc9   : > { %v3118_v20 = vpop.f32.mrf.mxu0 }
  0xca   : > { %2225 = vmatmul.msk.bf16.gmra.mxu2 %vm468_vm1, %v3110_v3  ;;  %v798_v3 = vsel %vm755_vm2, %v796_v33, %v797_v56  ;;  %v801_v33 = vrot.slane %v2685_v45, 2  ;;  %v802_v56 = vrot.slane %v2688_v46, 2  ;;  %v3171_v45 = vpack.c.bf16 %v2771_v36, %v2768_v35 }
  0xcb   : > { %2253 = vmatmul.msk.bf16.gmra.mxu3 %vm468_vm1, %v3114_v44 }
  0xcc   : > { %2281 = vmatmul.msk.bf16.gmra.mxu0 %vm468_vm1, %v2662_v34  ;;  %v803_v41 = vsel %vm755_vm2, %v801_v33, %v802_v56 }
  0xcd   : > { %v3126_v23 = vpop.f32.mrf.mxu2  ;;  %v3128_v39 = vpop.f32.mrf.mxu1 }
  0xce   : > { %v3130_v2 = vpop.f32.mrf.mxu3 }
  0xcf   : > { %3771 = vst [vmem:[#allocation34_spill] sm:$0xff] %v3130_v2  ;;  %v3144_v2 = vpack.c.bf16 %v800_v31, %v798_v3 }
  0xd1   : > { %v3135_v10 = vpop.f32.mrf.mxu0  ;;  %3774 = vst [vmem:[#allocation37_spill] sm:$0xff] %v3144_v2 }
  0xd5   : > { %v3139_v24 = vpop.f32.mrf.mxu2  ;;  %v675_v34 = vpop.f32.mrf.mxu1 }
  0xd6   : > { %3772 = vst [vmem:[#allocation35_spill] sm:$0xff] %v3139_v24  ;;  %v3141_v30 = vpop.f32.mrf.mxu3  ;;  %v676_v16 = vadd.f32 %v675_v34, %v3001_v6 }
  0xd7   : > { %3773 = vst [vmem:[#allocation36_spill] sm:$0xff] %v3141_v30 }
  0xd8   : > { %2198 = vmatmul.msk.bf16.gmra.mxu1 %vm468_vm1, %v3114_v44 }
  0xd9   : > { %v1252_v13 = vpop.f32.mrf.mxu0 }
  0xda   : > { %2226 = vmatmul.msk.bf16.gmra.mxu2 %vm468_vm1, %v3144_v2 }
  0xdb   : > { %2254 = vmatmul.msk.bf16.gmra.mxu3 %vm468_vm1, %v3148_v12 }
  0xdc   : > { %2282 = vmatmul.msk.bf16.gmra.mxu0 %vm468_vm1, %v2744_v21  ;;  %v805_v21 = vsel %vm755_vm2, %v802_v56, %v804_v38 }
  0xdd   : > { %v958_v15 = vpop.f32.mrf.mxu2  ;;  %v677_v34 = vpop.f32.mrf.mxu1 }
  0xde   : > { %v1038_v3 = vadd.f32 %v958_v15, %v676_v16  ;;  %v1100_v6 = vpop.f32.mrf.mxu3  ;;  %v678_v31 = vadd.f32 %v677_v34, %v3018_v25  ;;  %v3167_v34 = vpack.c.bf16 %v805_v21, %v803_v41 }
  0xe0   : > { %v1180_v30 = vadd.f32 %v1100_v6, %v1038_v3  ;;  %v806_v3 = vrot.slane %v2768_v35, 2  ;;  %v807_v6 = vrot.slane %v2771_v36, 2  ;;  %v3196_v35 = vpack.c.bf16 %v2843_v0, %v2838_v63 }
  0xe1   : > { %v1254_v2 = vpop.f32.mrf.mxu0 }
  0xe2   : > { %v3162_v44 = vadd.f32 %v1252_v13, %v1180_v30  ;;  %v809_v13 = vrot.slane %v2774_v37, 2  ;;  %v808_v33 = vsel %vm755_vm2, %v806_v3, %v807_v6  ;;  %v811_v3 = vrot.slane %v2838_v63, 2  ;;  %v3777_v63 = vld [vmem:[#allocation3_spill] sm:$0xff] }
  0xe4   : > { %v810_v56 = vsel %vm755_vm2, %v807_v6, %v809_v13  ;;  %v814_v13 = vrot.slane %v2846_v1, 2  ;;  %v812_v6 = vrot.slane %v2843_v0, 2  ;;  %v3776_v1 = vld [vmem:[#allocation2_spill] sm:$0xff] }
  0xe5   : > { %v960_v24 = vpop.f32.mrf.mxu2  ;;  %v680_v54 = vpop.f32.mrf.mxu1 }
  0xe6   : > { %v1039_v16 = vadd.f32 %v960_v24, %v678_v31  ;;  %v1102_v15 = vpop.f32.mrf.mxu3  ;;  %v681_v25 = vadd.f32 %v680_v54, %v3036_v42 }
  0xe8   : > { %v1181_v46 = vadd.f32 %v1102_v15, %v1039_v16  ;;  %2199 = vmatmul.msk.bf16.gmra.mxu1 %vm468_vm1, %v3148_v12 }
  0xe9   : > { %v1257_v47 = vpop.f32.mrf.mxu0 }
  0xea   : > { %2227 = vmatmul.msk.bf16.gmra.mxu2 %vm468_vm1, %v3167_v34  ;;  %v3177_v30 = vadd.f32 %v1254_v2, %v1181_v46 }
  0xeb   : > { %2255 = vmatmul.msk.bf16.gmra.mxu3 %vm468_vm1, %v3171_v45 }
  0xec   : > { %2283 = vmatmul.msk.bf16.gmra.mxu0 %vm468_vm1, %v2816_v22 }
  0xed   : > { %v963_v21 = vpop.f32.mrf.mxu2  ;;  %v682_v54 = vpop.f32.mrf.mxu1 }
  0xee   : > { %v1040_v41 = vadd.f32 %v963_v21, %v681_v25  ;;  %v1105_v42 = vpop.f32.mrf.mxu3  ;;  %v683_v24 = vadd.f32 %v682_v54, %v3053_v50  ;;  %v3192_v21 = vpack.c.bf16 %v810_v56, %v808_v33  ;;  %v813_v56 = vsel %vm755_vm2, %v811_v3, %v812_v6 }
  0xf0   : > { %v1182_v2 = vadd.f32 %v1105_v42, %v1040_v41 }
  0xf1   : > { %v1259_v31 = vpop.f32.mrf.mxu0 }
  0xf2   : > { %v3187_v38 = vadd.f32 %v1257_v47, %v1182_v2 }
  0xf5   : > { %v965_v16 = vpop.f32.mrf.mxu2  ;;  %v685_v15 = vpop.f32.mrf.mxu1 }
  0xf6   : > { %v1041_v25 = vadd.f32 %v965_v16, %v683_v24  ;;  %v1107_v46 = vpop.f32.mrf.mxu3  ;;  %v686_v50 = vadd.f32 %v685_v15, %v3071_v32  ;;  %v815_v16 = vsel %vm755_vm2, %v812_v6, %v814_v13  ;;  %v3780_v6 = vld [vmem:[#allocation4_spill] sm:$0xff] }
  0xf8   : > { %v1183_v36 = vadd.f32 %v1107_v46, %v1041_v25  ;;  %2200 = vmatmul.msk.bf16.gmra.mxu1 %vm468_vm1, %v3171_v45 }
  0xf9   : > { %v1262_v37 = vpop.f32.mrf.mxu0 }
  0xfa   : > { %2228 = vmatmul.msk.bf16.gmra.mxu2 %vm468_vm1, %v3192_v21  ;;  %v3202_v47 = vadd.f32 %v1259_v31, %v1183_v36  ;;  %v3217_v36 = vpack.c.bf16 %v815_v16, %v813_v56  ;;  %v816_v56 = vrot.slane %v3776_v1, 2  ;;  %v817_v16 = vrot.slane %v3777_v63, 2 }
  0xfb   : > { %2256 = vmatmul.msk.bf16.gmra.mxu3 %vm468_vm1, %v3196_v35 }
  0xfc   : > { %2284 = vmatmul.msk.bf16.gmra.mxu0 %vm468_vm1, %v2900_v5 }
  0xfd   : > { %v968_v32 = vpop.f32.mrf.mxu2  ;;  %v687_v54 = vpop.f32.mrf.mxu1 }
  0xfe   : > { %v1042_v41 = vadd.f32 %v968_v32, %v686_v50  ;;  %v1110_v42 = vpop.f32.mrf.mxu3  ;;  %v688_v24 = vadd.f32 %v687_v54, %v3097_v62  ;;  %v3221_v32 = vpack.c.bf16 %v3777_v63, %v3776_v1 }
 0x100   : > { %v1184_v2 = vadd.f32 %v1110_v42, %v1042_v41 }
 0x101   : > { %v1264_v31 = vpop.f32.mrf.mxu0 }
 0x102   : > { %v3212_v33 = vadd.f32 %v1262_v37, %v1184_v2  ;;  %v819_v2 = vrot.slane %v3780_v6, 2 }
 0x104   : > { %3775 = vst [vmem:[#allocation38_spill] sm:$0xff] %v3212_v33 }
 0x105   : > { %v970_v15 = vpop.f32.mrf.mxu2  ;;  %v690_v25 = vpop.f32.mrf.mxu1 }
 0x106   : > { %v1043_v46 = vadd.f32 %v970_v15, %v688_v24  ;;  %v1112_v50 = vpop.f32.mrf.mxu3  ;;  %v691_v62 = vadd.f32 %v690_v25, %v3118_v20  ;;  %v3779_v20 = vld [vmem:[#allocation6_spill] sm:$0xff] }
 0x108   : > { %v1185_v0 = vadd.f32 %v1112_v50, %v1043_v46  ;;  %2201 = vmatmul.msk.bf16.gmra.mxu1 %vm468_vm1, %v3196_v35  ;;  %v818_v46 = vsel %vm755_vm2, %v816_v56, %v817_v16  ;;  %v820_v50 = vsel %vm755_vm2, %v817_v16, %v819_v2 }
 0x109   : > { %v1267_v37 = vpop.f32.mrf.mxu0  ;;  %v3241_v33 = vpack.c.bf16 %v820_v50, %v818_v46 }
 0x10a   : > { %2229 = vmatmul.msk.bf16.gmra.mxu2 %vm468_vm1, %v3217_v36  ;;  %v3227_v54 = vadd.f32 %v1264_v31, %v1185_v0 }
 0x10b   : > { %2257 = vmatmul.msk.bf16.gmra.mxu3 %vm468_vm1, %v3221_v32  ;;  %3782 = vst [vmem:[#allocation6_spill] sm:$0xff] %v3241_v33 }
 0x10c   : > { %3778 = vst [vmem:[#allocation2_spill] sm:$0xff] %v3227_v54  ;;  %2285 = vmatmul.msk.bf16.gmra.mxu0 %vm468_vm1, %v3779_v20 }
 0x10d   : > { %v973_v41 = vpop.f32.mrf.mxu2  ;;  %v692_v42 = vpop.f32.mrf.mxu1 }
 0x10e   : > { %v1044_v24 = vadd.f32 %v973_v41, %v691_v62  ;;  %v1115_v13 = vpop.f32.mrf.mxu3  ;;  %v693_v3 = vadd.f32 %v692_v42, %v3135_v10  ;;  %v3783_v10 = vld [vmem:[#allocation7_spill] sm:$0xff]  ;;  %v3784_v42 = vld [vmem:[#allocation8_spill] sm:$0xff] }
 0x10f   : > { %v3245_v6 = vpack.c.bf16 %v3784_v42, %v3783_v10  ;;  %v821_v50 = vrot.slane %v3783_v10, 2  ;;  %v3790_v10 = vld [vmem:[#allocation13_spill] sm:$0xff] }
 0x110   : > { %v1186_v31 = vadd.f32 %v1115_v13, %v1044_v24  ;;  %v3786_v13 = vld [vmem:[#allocation11_spill] sm:$0xff] }
 0x111   : > { %v1269_v15 = vpop.f32.mrf.mxu0 }
 0x112   : > { %v3237_v25 = vadd.f32 %v1267_v37, %v1186_v31  ;;  %v3787_v31 = vld [vmem:[#allocation9_spill] sm:$0xff] }
 0x113   : > { %v824_v46 = vrot.slane %v3787_v31, 2  ;;  %v3789_v31 = vld [vmem:[#allocation12_spill] sm:$0xff] }
 0x114   : > { %3781 = vst [vmem:[#allocation3_spill] sm:$0xff] %v3237_v25 }
 0x115   : > { %v975_v0 = vpop.f32.mrf.mxu2  ;;  %v695_v54 = vpop.f32.mrf.mxu1 }
 0x116   : > { %v1045_v62 = vadd.f32 %v975_v0, %v693_v3  ;;  %v1117_v41 = vpop.f32.mrf.mxu3  ;;  %v696_v24 = vadd.f32 %v695_v54, %v2991_v52  ;;  %v822_v0 = vrot.slane %v3784_v42, 2 }
 0x118   : > { %v1187_v1 = vadd.f32 %v1117_v41, %v1045_v62  ;;  %2202 = vmatmul.msk.bf16.gmra.mxu1 %vm468_vm1, %v3221_v32  ;;  %v825_v52 = vsel %vm755_vm2, %v822_v0, %v824_v46 }
 0x119   : > { %v1272_v63 = vpop.f32.mrf.mxu0 }
 0x11a   : > { %2230 = vmatmul.msk.bf16.gmra.mxu2 %vm468_vm1, %v3241_v33  ;;  %v3251_v37 = vadd.f32 %v1269_v15, %v1187_v1  ;;  %v823_v1 = vsel %vm755_vm2, %v821_v50, %v822_v0  ;;  %v3270_v33 = vpack.c.bf16 %v3790_v10, %v3789_v31  ;;  %v3793_v0 = vld [vmem:[#allocation14_spill] sm:$0xff] }
 0x11b   : > { %2258 = vmatmul.msk.bf16.gmra.mxu3 %vm468_vm1, %v3245_v6 }
 0x11c   : > { %3785 = vst [vmem:[#allocation4_spill] sm:$0xff] %v3251_v37  ;;  %2286 = vmatmul.msk.bf16.gmra.mxu0 %vm468_vm1, %v3786_v13  ;;  %v3266_v13 = vpack.c.bf16 %v825_v52, %v823_v1  ;;  %v826_v1 = vrot.slane %v3789_v31, 2  ;;  %v827_v52 = vrot.slane %v3790_v10, 2  ;;  %v3797_v31 = vld [vmem:[#allocation18_spill] sm:$0xff] }
 0x11d   : > { %v978_v3 = vpop.f32.mrf.mxu2  ;;  %v697_v2 = vpop.f32.mrf.mxu1 }
 0x11e   : > { %v1046_v56 = vadd.f32 %v978_v3, %v696_v24  ;;  %v1120_v16 = vpop.f32.mrf.mxu3  ;;  %v698_v54 = vadd.f32 %v697_v2, %v3011_v8 }
 0x120   : > { %v1188_v15 = vadd.f32 %v1120_v16, %v1046_v56 }
 0x121   : > { %v1274_v62 = vpop.f32.mrf.mxu0 }
 0x122   : > { %v3261_v41 = vadd.f32 %v1272_v63, %v1188_v15  ;;  %v829_v15 = vrot.slane %v3793_v0, 2  ;;  %v3796_v0 = vld [vmem:[#allocation17_spill] sm:$0xff] }
 0x124   : > { %3788 = vst [vmem:[#allocation7_spill] sm:$0xff] %v3261_v41 }
 0x125   : > { %v980_v37 = vpop.f32.mrf.mxu2  ;;  %v700_v25 = vpop.f32.mrf.mxu1 }
 0x126   : > { %v1047_v24 = vadd.f32 %v980_v37, %v698_v54  ;;  %v1122_v3 = vpop.f32.mrf.mxu3  ;;  %v701_v8 = vadd.f32 %v700_v25, %v3024_v29  ;;  %v3792_v37 = vld [vmem:[#allocation16_spill] sm:$0xff]  ;;  %v830_v29 = vsel %vm755_vm2, %v827_v52, %v829_v15  ;;  %v3799_v15 = vld [vmem:[#allocation19_spill] sm:$0xff] }
 0x128   : > { %v1189_v42 = vadd.f32 %v1122_v3, %v1047_v24  ;;  %2203 = vmatmul.msk.bf16.gmra.mxu1 %vm468_vm1, %v3245_v6  ;;  %v828_v3 = vsel %vm755_vm2, %v826_v1, %v827_v52  ;;  %v834_v1 = vrot.slane %v3799_v15, 2 }
 0x129   : > { %v1277_v63 = vpop.f32.mrf.mxu0  ;;  %v3291_v41 = vpack.c.bf16 %v830_v29, %v828_v3  ;;  %v831_v3 = vrot.slane %v3796_v0, 2  ;;  %v832_v29 = vrot.slane %v3797_v31, 2 }
 0x12a   : > { %2231 = vmatmul.msk.bf16.gmra.mxu2 %vm468_vm1, %v3266_v13  ;;  %v3276_v56 = vadd.f32 %v1274_v62, %v1189_v42 }
 0x12b   : > { %2259 = vmatmul.msk.bf16.gmra.mxu3 %vm468_vm1, %v3270_v33  ;;  %3795 = vst [vmem:[#allocation12_spill] sm:$0xff] %v3291_v41 }
 0x12c   : > { %3791 = vst [vmem:[#allocation8_spill] sm:$0xff] %v3276_v56  ;;  %2287 = vmatmul.msk.bf16.gmra.mxu0 %vm468_vm1, %v3792_v37  ;;  %v3295_v37 = vpack.c.bf16 %v3797_v31, %v3796_v0  ;;  %v833_v0 = vsel %vm755_vm2, %v831_v3, %v832_v29  ;;  %v835_v31 = vsel %vm755_vm2, %v832_v29, %v834_v1 }
 0x12d   : > { %v983_v2 = vpop.f32.mrf.mxu2  ;;  %v702_v16 = vpop.f32.mrf.mxu1 }
 0x12e   : > { %v1048_v46 = vadd.f32 %v983_v2, %v701_v8  ;;  %v1125_v50 = vpop.f32.mrf.mxu3  ;;  %v703_v25 = vadd.f32 %v702_v16, %v3046_v61 }
 0x130   : > { %v1190_v62 = vadd.f32 %v1125_v50, %v1048_v46 }
 0x131   : > { %v1279_v54 = vpop.f32.mrf.mxu0 }
 0x132   : > { %v3286_v24 = vadd.f32 %v1277_v63, %v1190_v62 }
 0x134   : > { %3794 = vst [vmem:[#allocation9_spill] sm:$0xff] %v3286_v24 }
 0x135   : > { %v985_v42 = vpop.f32.mrf.mxu2  ;;  %v705_v56 = vpop.f32.mrf.mxu1 }
 0x136   : > { %v1049_v8 = vadd.f32 %v985_v42, %v703_v25  ;;  %v1127_v2 = vpop.f32.mrf.mxu3  ;;  %v706_v16 = vadd.f32 %v705_v56, %v3059_v51  ;;  %v3315_v25 = vld [vmem:[%s2605_s4 + $0x188] sm:$0xff]  ;;  %v3318_v42 = vld [vmem:[%s2605_s4 + $0x190] sm:$0x3] }
 0x138   : > { %v1191_v10 = vadd.f32 %v1127_v2, %v1049_v8  ;;  %2204 = vmatmul.msk.bf16.gmra.mxu1 %vm468_vm1, %v3270_v33  ;;  %v1216_v2 = vrot.slane %v3315_v25, 1 }
 0x139   : > { %v1282_v63 = vpop.f32.mrf.mxu0 }
 0x13a   : > { %2232 = vmatmul.msk.bf16.gmra.mxu2 %vm468_vm1, %v3291_v41  ;;  %v3301_v61 = vadd.f32 %v1279_v54, %v1191_v10  ;;  %v3312_v54 = vld [vmem:[%s2605_s4 + $0x180] sm:$0xff]  ;;  %v1218_v10 = vrot.slane %v3318_v42, 1 }
 0x13b   : > { %2260 = vmatmul.msk.bf16.gmra.mxu3 %vm468_vm1, %v3295_v37  ;;  %v1215_v8 = vrot.slane %v3312_v54, 1 }
 0x13c   : > { %3798 = vst [vmem:[#allocation13_spill] sm:$0xff] %v3301_v61  ;;  %2288 = vmatmul.msk.bf16.gmra.mxu0 %vm468_vm1, %v2904_v11  ;;  %v1219_v41 = vsel %vm322_vm0, %v1216_v2, %v1218_v10 }
 0x13d   : > { %v988_v46 = vpop.f32.mrf.mxu2  ;;  %v707_v50 = vpop.f32.mrf.mxu1 }
 0x13e   : > { %v1050_v52 = vadd.f32 %v988_v46, %v706_v16  ;;  %v1130_v62 = vpop.f32.mrf.mxu3  ;;  %v708_v46 = vadd.f32 %v707_v50, %v3084_v59 }
 0x140   : > { %v1192_v51 = vadd.f32 %v1130_v62, %v1050_v52  ;;  %v3328_v52 = vpack.c.bf16 %v835_v31, %v833_v0  ;;  %v1217_v62 = vsel %vm322_vm0, %v1215_v8, %v1216_v2 }
 0x141   : > { %v1284_v56 = vpop.f32.mrf.mxu0  ;;  %v3338_v1 = vpack.c.bf16 %v1219_v41, %v1217_v62 }
 0x142   : > { %v3323_v16 = vadd.f32 %v1282_v63, %v1192_v51  ;;  %v3334_v63 = vpack.c.bf16 %v3315_v25, %v3312_v54 }
 0x145   : > { %v990_v15 = vpop.f32.mrf.mxu2  ;;  %v710_v61 = vpop.f32.mrf.mxu1 }
 0x146   : > { %v1051_v24 = vadd.f32 %v990_v15, %v708_v46  ;;  %v1132_v11 = vpop.f32.mrf.mxu3  ;;  %v711_v3 = vadd.f32 %v710_v61, %v3106_v58 }
 0x148   : > { %v1193_v51 = vadd.f32 %v1132_v11, %v1051_v24  ;;  %2205 = vmatmul.msk.bf16.gmra.mxu1 %vm468_vm1, %v3295_v37 }
 0x149   : > { %v1287_v59 = vpop.f32.mrf.mxu0 }
 0x14a   : > { %2233 = vmatmul.msk.bf16.gmra.mxu2 %vm468_vm1, %v3328_v52  ;;  %v3342_v50 = vadd.f32 %v1284_v56, %v1193_v51 }
 0x14b   : > { %2261 = vmatmul.msk.bf16.gmra.mxu3 %vm468_vm1, %v3334_v63 }
 0x14c   : > { %2289 = vmatmul.msk.bf16.gmra.mxu0 %vm468_vm1, %v3338_v1 }
 0x14d   : > { %v993_v11 = vpop.f32.mrf.mxu2  ;;  %v712_v24 = vpop.f32.mrf.mxu1 }
 0x14e   : > { %v1052_v29 = vadd.f32 %v993_v11, %v711_v3  ;;  %v1135_v8 = vpop.f32.mrf.mxu3  ;;  %v713_v0 = vadd.f32 %v712_v24, %v3128_v39 }
 0x150   : > { %v1194_v41 = vadd.f32 %v1135_v8, %v1052_v29 }
 0x151   : > { %v1289_v2 = vpop.f32.mrf.mxu0 }
 0x152   : > { %v3349_v10 = vadd.f32 %v1287_v59, %v1194_v41 }
 0x155   : > { %v995_v56 = vpop.f32.mrf.mxu2  ;;  %v715_v31 = vpop.f32.mrf.mxu1 }
 0x156   : > { %v1053_v46 = vadd.f32 %v995_v56, %v713_v0  ;;  %v1137_v15 = vpop.f32.mrf.mxu3  ;;  %v716_v51 = vadd.f32 %v715_v31, %v3009_v7 }
 0x158   : > { %v1195_v62 = vadd.f32 %v1137_v15, %v1053_v46  ;;  %2302 = vmatmul.msk.bf16.vlgmr.msra.gmra.mxu1 %vm468_vm1, %v2935_v4 }
 0x159   : > { %v1292_v58 = vpop.f32.mrf.mxu0 }
 0x15a   : > { %2330 = vmatmul.msk.bf16.vlgmr.msra.gmra.mxu2 %vm468_vm1, %v2939_v19  ;;  %v3356_v61 = vadd.f32 %v1289_v2, %v1195_v62 }
 0x15b   : > { %2358 = vmatmul.msk.bf16.vlgmr.msra.gmra.mxu3 %vm468_vm1, %v2824_v49 }
 0x15c   : > { %2386 = vmatmul.msk.bf16.vlgmr.msra.gmra.mxu0 %vm468_vm1, %v2953_v27 }
 0x15d   : > { %v998_v39 = vpop.f32.mrf.mxu2  ;;  %v717_v59 = vpop.f32.mrf.mxu1 }
 0x15e   : > { %v1054_v3 = vadd.f32 %v998_v39, %v716_v51  ;;  %v1140_v11 = vpop.f32.mrf.mxu3  ;;  %v718_v19 = vadd.f32 %v717_v59, %v3022_v60 }
 0x160   : > { %v1196_v24 = vadd.f32 %v1140_v11, %v1054_v3 }
 0x161   : > { %v1294_v4 = vpop.f32.mrf.mxu0 }
 0x162   : > { %v3363_v29 = vadd.f32 %v1292_v58, %v1196_v24 }
 0x165   : > { %v1000_v8 = vpop.f32.mrf.mxu2  ;;  %v720_v41 = vpop.f32.mrf.mxu1 }
 0x166   : > { %v1055_v2 = vadd.f32 %v1000_v8, %v718_v19  ;;  %v1142_v0 = vpop.f32.mrf.mxu3  ;;  %v721_v31 = vadd.f32 %v720_v41, %v3044_v43 }
 0x168   : > { %v1197_v49 = vadd.f32 %v1142_v0, %v1055_v2  ;;  %2303 = vmatmul.msk.bf16.gmra.mxu1 %vm468_vm1, %v2953_v27 }
 0x169   : > { %v1297_v7 = vpop.f32.mrf.mxu0 }
 0x16a   : > { %2331 = vmatmul.msk.bf16.gmra.mxu2 %vm468_vm1, %v2957_v9  ;;  %v3370_v56 = vadd.f32 %v1294_v4, %v1197_v49 }
 0x16b   : > { %2359 = vmatmul.msk.bf16.gmra.mxu3 %vm468_vm1, %v2908_v40 }
 0x16c   : > { %2387 = vmatmul.msk.bf16.gmra.mxu0 %vm468_vm1, %v2972_v14 }
 0x16d   : > { %v1003_v60 = vpop.f32.mrf.mxu2  ;;  %v722_v46 = vpop.f32.mrf.mxu1 }
 0x16e   : > { %v1056_v15 = vadd.f32 %v1003_v60, %v721_v31  ;;  %v1145_v62 = vpop.f32.mrf.mxu3  ;;  %v723_v9 = vadd.f32 %v722_v46, %v3057_v48 }
 0x170   : > { %v1198_v58 = vadd.f32 %v1145_v62, %v1056_v15 }
 0x171   : > { %v1299_v27 = vpop.f32.mrf.mxu0 }
 0x172   : > { %v3377_v51 = vadd.f32 %v1297_v7, %v1198_v58 }
 0x175   : > { %v1005_v39 = vpop.f32.mrf.mxu2  ;;  %v725_v59 = vpop.f32.mrf.mxu1 }
 0x176   : > { %v1057_v3 = vadd.f32 %v1005_v39, %v723_v9  ;;  %v1147_v11 = vpop.f32.mrf.mxu3  ;;  %v726_v4 = vadd.f32 %v725_v59, %v3082_v55 }
 0x178   : > { %v1199_v40 = vadd.f32 %v1147_v11, %v1057_v3  ;;  %2304 = vmatmul.msk.bf16.gmra.mxu1 %vm468_vm1, %v2972_v14  ;;  %v3801_v3 = vld [vmem:[#allocation35_spill] sm:$0xff] }
 0x179   : > { %v1302_v43 = vpop.f32.mrf.mxu0 }
 0x17a   : > { %2332 = vmatmul.msk.bf16.gmra.mxu2 %vm468_vm1, %v2976_v18  ;;  %v3384_v24 = vadd.f32 %v1299_v27, %v1199_v40 }
 0x17b   : > { %2360 = vmatmul.msk.bf16.gmra.mxu3 %vm468_vm1, %v2649_v26 }
 0x17c   : > { %2388 = vmatmul.msk.bf16.gmra.mxu0 %vm468_vm1, %v2993_v53 }
 0x17d   : > { %v1008_v48 = vpop.f32.mrf.mxu2  ;;  %v727_v19 = vpop.f32.mrf.mxu1 }
 0x17e   : > { %v1058_v8 = vadd.f32 %v1008_v48, %v726_v4  ;;  %v1150_v41 = vpop.f32.mrf.mxu3  ;;  %v728_v18 = vadd.f32 %v727_v19, %v3104_v57  ;;  %v3800_v57 = vld [vmem:[#allocation24_spill] sm:$0xff]  ;;  %v3802_v48 = vld [vmem:[#allocation25_spill] sm:$0xff] }
 0x180   : > { %v1200_v2 = vadd.f32 %v1150_v41, %v1058_v8  ;;  %v3803_v8 = vld [vmem:[#allocation15_spill] sm:$0xff]  ;;  %v3804_v41 = vld [vmem:[#allocation22_spill] sm:$0xff] }
 0x181   : > { %v1304_v14 = vpop.f32.mrf.mxu0 }
 0x182   : > { %v3391_v0 = vadd.f32 %v1302_v43, %v1200_v2 }
 0x185   : > { %v1010_v49 = vpop.f32.mrf.mxu2  ;;  %v730_v7 = vpop.f32.mrf.mxu1 }
 0x186   : > { %v1059_v31 = vadd.f32 %v1010_v49, %v728_v18  ;;  %v1152_v60 = vpop.f32.mrf.mxu3  ;;  %v731_v15 = vadd.f32 %v730_v7, %v3126_v23 }
 0x188   : > { %v1201_v26 = vadd.f32 %v1152_v60, %v1059_v31  ;;  %2305 = vmatmul.msk.bf16.gmra.mxu1 %vm468_vm1, %v2993_v53 }
 0x189   : > { %v1307_v55 = vpop.f32.mrf.mxu0 }
 0x18a   : > { %2333 = vmatmul.msk.bf16.gmra.mxu2 %vm468_vm1, %v2997_v28  ;;  %v3398_v46 = vadd.f32 %v1304_v14, %v1201_v26  ;;  %v3805_v14 = vld [vmem:[#allocation28_spill] sm:$0xff] }
 0x18b   : > { %2361 = vmatmul.msk.bf16.gmra.mxu3 %vm468_vm1, %v2740_v17 }
 0x18c   : > { %2389 = vmatmul.msk.bf16.gmra.mxu0 %vm468_vm1, %v3800_v57 }
 0x18d   : > { %v1013_v62 = vpop.f32.mrf.mxu2  ;;  %v732_v58 = vpop.f32.mrf.mxu1 }
 0x18e   : > { %v1060_v27 = vadd.f32 %v1013_v62, %v731_v15  ;;  %v1155_v9 = vpop.f32.mrf.mxu3  ;;  %v733_v28 = vadd.f32 %v732_v58, %v3801_v3  ;;  %v3806_v15 = vld [vmem:[#allocation23_spill] sm:$0xff]  ;;  %v3807_v3 = vld [vmem:[#allocation29_spill] sm:$0xff] }
 0x190   : > { %v1202_v39 = vadd.f32 %v1155_v9, %v1060_v27 }
 0x191   : > { %v1309_v53 = vpop.f32.mrf.mxu0 }
 0x192   : > { %v3405_v59 = vadd.f32 %v1307_v55, %v1202_v39 }
 0x195   : > { %v1015_v11 = vpop.f32.mrf.mxu2  ;;  %v735_v40 = vpop.f32.mrf.mxu1 }
 0x196   : > { %v1061_v43 = vadd.f32 %v1015_v11, %v733_v28  ;;  %v1157_v4 = vpop.f32.mrf.mxu3  ;;  %v736_v2 = vadd.f32 %v735_v40, %v3804_v41  ;;  %v3808_v11 = vld [vmem:[#allocation20_spill] sm:$0xff]  ;;  %v3809_v40 = vld [vmem:[#allocation26_spill] sm:$0xff] }
 0x198   : > { %v1203_v17 = vadd.f32 %v1157_v4, %v1061_v43  ;;  %2306 = vmatmul.msk.bf16.gmra.mxu1 %vm468_vm1, %v3800_v57  ;;  %v3810_v4 = vld [vmem:[#allocation32_spill] sm:$0xff] }
 0x199   : > { %v1312_v23 = vpop.f32.mrf.mxu0 }
 0x19a   : > { %2334 = vmatmul.msk.bf16.gmra.mxu2 %vm468_vm1, %v3802_v48  ;;  %v3412_v19 = vadd.f32 %v1309_v53, %v1203_v17 }
 0x19b   : > { %2362 = vmatmul.msk.bf16.gmra.mxu3 %vm468_vm1, %v3803_v8 }
 0x19c   : > { %2390 = vmatmul.msk.bf16.gmra.mxu0 %vm468_vm1, %v3805_v14 }
 0x19d   : > { %v1018_v18 = vpop.f32.mrf.mxu2  ;;  %v737_v49 = vpop.f32.mrf.mxu1 }
 0x19e   : > { %v1062_v7 = vadd.f32 %v1018_v18, %v736_v2  ;;  %v1160_v31 = vpop.f32.mrf.mxu3  ;;  %v738_v57 = vadd.f32 %v737_v49, %v3806_v15  ;;  %v3811_v18 = vld [vmem:[#allocation27_spill] sm:$0xff] }
 0x1a0   : > { %v1204_v60 = vadd.f32 %v1160_v31, %v1062_v7 }
 0x1a1   : > { %v1314_v26 = vpop.f32.mrf.mxu0 }
 0x1a2   : > { %v3419_v55 = vadd.f32 %v1312_v23, %v1204_v60 }
 0x1a5   : > { %v1020_v62 = vpop.f32.mrf.mxu2  ;;  %v740_v58 = vpop.f32.mrf.mxu1 }
 0x1a6   : > { %v1063_v27 = vadd.f32 %v1020_v62, %v738_v57  ;;  %v1162_v9 = vpop.f32.mrf.mxu3  ;;  %v741_v43 = vadd.f32 %v740_v58, %v3809_v40  ;;  %v3812_v62 = vld [vmem:[#allocation33_spill] sm:$0xff] }
 0x1a8   : > { %v1205_v39 = vadd.f32 %v1162_v9, %v1063_v27  ;;  %2307 = vmatmul.msk.bf16.gmra.mxu1 %vm468_vm1, %v3805_v14  ;;  %v3813_v27 = vld [vmem:[#allocation5_spill] sm:$0xff]  ;;  %v3814_v9 = vld [vmem:[#allocation30_spill] sm:$0xff] }
 0x1a9   : > { %v1317_v53 = vpop.f32.mrf.mxu0 }
 0x1aa   : > { %2335 = vmatmul.msk.bf16.gmra.mxu2 %vm468_vm1, %v3807_v3  ;;  %v3426_v28 = vadd.f32 %v1314_v26, %v1205_v39 }
 0x1ab   : > { %2363 = vmatmul.msk.bf16.gmra.mxu3 %vm468_vm1, %v3808_v11 }
 0x1ac   : > { %2391 = vmatmul.msk.bf16.gmra.mxu0 %vm468_vm1, %v3810_v4 }
 0x1ad   : > { %v1023_v17 = vpop.f32.mrf.mxu2  ;;  %v742_v23 = vpop.f32.mrf.mxu1 }
 0x1ae   : > { %v1064_v48 = vadd.f32 %v1023_v17, %v741_v43  ;;  %v1165_v8 = vpop.f32.mrf.mxu3  ;;  %v743_v49 = vadd.f32 %v742_v23, %v3811_v18 }
 0x1b0   : > { %v1206_v41 = vadd.f32 %v1165_v8, %v1064_v48  ;;  %v3816_v48 = vld [vmem:[#allocation31_spill] sm:$0xff] }
 0x1b1   : > { %v1319_v2 = vpop.f32.mrf.mxu0 }
 0x1b2   : > { %v3433_v14 = vadd.f32 %v1317_v53, %v1206_v41  ;;  %v3815_v53 = vld [vmem:[#allocation37_spill] sm:$0xff] }
 0x1b5   : > { %v1025_v7 = vpop.f32.mrf.mxu2  ;;  %v745_v31 = vpop.f32.mrf.mxu1 }
 0x1b6   : > { %v1065_v60 = vadd.f32 %v1025_v7, %v743_v49  ;;  %v1167_v26 = vpop.f32.mrf.mxu3  ;;  %v746_v39 = vadd.f32 %v745_v31, %v3814_v9 }
 0x1b8   : > { %v1207_v15 = vadd.f32 %v1167_v26, %v1065_v60  ;;  %2308 = vmatmul.msk.bf16.gmra.mxu1 %vm468_vm1, %v3810_v4  ;;  %v3817_v26 = vld [vmem:[#allocation10_spill] sm:$0xff] }
 0x1b9   : > { %v1322_v57 = vpop.f32.mrf.mxu0 }
 0x1ba   : > { %2336 = vmatmul.msk.bf16.gmra.mxu2 %vm468_vm1, %v3812_v62  ;;  %v3440_v58 = vadd.f32 %v1319_v2, %v1207_v15  ;;  %v3818_v15 = vld [vmem:[#allocation34_spill] sm:$0xff] }
 0x1bb   : > { %2364 = vmatmul.msk.bf16.gmra.mxu3 %vm468_vm1, %v3813_v27 }
 0x1bc   : > { %2392 = vmatmul.msk.bf16.gmra.mxu0 %vm468_vm1, %v3815_v53 }
 0x1bd   : > { %v1028_v3 = vpop.f32.mrf.mxu2  ;;  %v747_v11 = vpop.f32.mrf.mxu1 }
 0x1be   : > { %v1066_v40 = vadd.f32 %v1028_v3, %v746_v39  ;;  %v1170_v43 = vpop.f32.mrf.mxu3  ;;  %v748_v8 = vadd.f32 %v747_v11, %v3816_v48 }
 0x1c0   : > { %v1208_v17 = vadd.f32 %v1170_v43, %v1066_v40  ;;  %v3819_v40 = vld [vmem:[#allocation36_spill] sm:$0xff] }
 0x1c1   : > { %v1324_v4 = vpop.f32.mrf.mxu0 }
 0x1c2   : > { %v3447_v23 = vadd.f32 %v1322_v57, %v1208_v17 }
 0x1c5   : > { %v1030_v41 = vpop.f32.mrf.mxu2  ;;  %v750_v2 = vpop.f32.mrf.mxu1 }
 0x1c6   : > { %v1067_v18 = vadd.f32 %v1030_v41, %v748_v8  ;;  %v1172_v49 = vpop.f32.mrf.mxu3  ;;  %v751_v57 = vadd.f32 %v750_v2, %v3818_v15 }
 0x1c8   : > { %v1209_v7 = vadd.f32 %v1172_v49, %v1067_v18  ;;  %2309 = vmatmul.msk.bf16.gmra.mxu1 %vm468_vm1, %v3815_v53 }
 0x1c9   : > { %v1327_v31 = vpop.f32.mrf.mxu0 }
 0x1ca   : > { %2337 = vmatmul.msk.bf16.gmra.mxu2 %vm468_vm1, %v3148_v12  ;;  %v3454_v60 = vadd.f32 %v1324_v4, %v1209_v7 }
 0x1cb   : > { %2365 = vmatmul.msk.bf16.gmra.mxu3 %vm468_vm1, %v3817_v26 }
 0x1cc   : > { %2393 = vmatmul.msk.bf16.gmra.mxu0 %vm468_vm1, %v3167_v34 }
 0x1cd   : > { %v1033_v62 = vpop.f32.mrf.mxu2  ;;  %v752_v27 = vpop.f32.mrf.mxu1 }
 0x1ce   : > { %v1068_v9 = vadd.f32 %v1033_v62, %v751_v57  ;;  %v1175_v39 = vpop.f32.mrf.mxu3  ;;  %v753_v12 = vadd.f32 %v752_v27, %v3819_v40 }
 0x1d0   : > { %v1210_v3 = vadd.f32 %v1175_v39, %v1068_v9 }
 0x1d1   : > { %v1329_v53 = vpop.f32.mrf.mxu0 }
 0x1d2   : > { %v3461_v11 = vadd.f32 %v1327_v31, %v1210_v3 }
 0x1d5   : > { %v1035_v43 = vpop.f32.mrf.mxu2  ;;  %v1401_v17 = vpop.f32.mrf.mxu1 }
 0x1d6   : > { %v1069_v4 = vadd.f32 %v1035_v43, %v753_v12  ;;  %v1177_v48 = vpop.f32.mrf.mxu3  ;;  %v1481_v18 = vadd.f32 %v1401_v17, %v3162_v44 }
 0x1d8   : > { %v1211_v8 = vadd.f32 %v1177_v48, %v1069_v4  ;;  %2310 = vmatmul.msk.bf16.gmra.mxu1 %vm468_vm1, %v3167_v34 }
 0x1d9   : > { %v1844_v41 = vpop.f32.mrf.mxu0 }
 0x1da   : > { %2338 = vmatmul.msk.bf16.gmra.mxu2 %vm468_vm1, %v3171_v45  ;;  %v3468_v2 = vadd.f32 %v1329_v53, %v1211_v8  ;;  %v3478_v45 = vld [vmem:[%s3691_s2] ss:$0 sm:$0xff] }
 0x1db   : > { %2366 = vmatmul.msk.bf16.gmra.mxu3 %vm468_vm1, %v2816_v22 }
 0x1dc   : > { %2394 = vmatmul.msk.bf16.gmra.mxu0 %vm468_vm1, %v3192_v21 }
 0x1dd   : > { %v1543_v49 = vpop.f32.mrf.mxu2  ;;  %v1403_v7 = vpop.f32.mrf.mxu1 }
 0x1de   : > { %v1623_v31 = vadd.f32 %v1543_v49, %v1481_v18  ;;  %v1695_v26 = vpop.f32.mrf.mxu3  ;;  %v1482_v44 = vadd.f32 %v1403_v7, %v3177_v30 }
 0x1e0   : > { %v1775_v34 = vadd.f32 %v1695_v26, %v1623_v31 }
 0x1e1   : > { %v1846_v57 = vpop.f32.mrf.mxu0 }
 0x1e2   : > { %v1924_v15 = vadd.f32 %v1844_v41, %v1775_v34 }
 0x1e4   : > { %v1960_v22 = vadd.f32 %v3478_v45, %v1924_v15 }
 0x1e5   : > { %v1545_v62 = vpop.f32.mrf.mxu2  ;;  %v1406_v27 = vpop.f32.mrf.mxu1 }
 0x1e6   : > { %2455 = vtanh.f32 %v1960_v22  ;;  %v1624_v9 = vadd.f32 %v1545_v62, %v1482_v44  ;;  %v1697_v39 = vpop.f32.mrf.mxu3  ;;  %v3820_v44 = vld [vmem:[#allocation38_spill] sm:$0xff] }
 0x1e8   : > { %v1776_v3 = vadd.f32 %v1697_v39, %v1624_v9  ;;  %2311 = vmatmul.msk.bf16.gmra.mxu1 %vm468_vm1, %v3192_v21  ;;  %v1483_v21 = vadd.f32 %v1406_v27, %v3187_v38  ;;  %v3821_v27 = vld [vmem:[#allocation6_spill] sm:$0xff] }
 0x1e9   : > { %v1849_v40 = vpop.f32.mrf.mxu0 }
 0x1ea   : > { %v1925_v53 = vadd.f32 %v1846_v57, %v1776_v3  ;;  %2339 = vmatmul.msk.bf16.gmra.mxu2 %vm468_vm1, %v3196_v35 }
 0x1eb   : > { %2367 = vmatmul.msk.bf16.gmra.mxu3 %vm468_vm1, %v2900_v5 }
 0x1ec   : > { %v2456_v30 = vpop.eup %2455  ;;  %v1961_v12 = vadd.f32 %v3478_v45, %v1925_v53  ;;  %2395 = vmatmul.msk.bf16.gmra.mxu0 %vm468_vm1, %v3217_v36 }
 0x1ed   : > { %2025 = vst.msk [vmem:[%s3488_s16] sm:$0xff] %vm2024_vm3, %v2456_v30  ;;  %v1548_v43 = vpop.f32.mrf.mxu2  ;;  %v1408_v17 = vpop.f32.mrf.mxu1 }
 0x1ee   : > { %2457 = vtanh.f32 %v1961_v12  ;;  %v1625_v4 = vadd.f32 %v1548_v43, %v1483_v21  ;;  %v1700_v48 = vpop.f32.mrf.mxu3  ;;  %v1484_v49 = vadd.f32 %v1408_v17, %v3202_v47  ;;  %v3822_v12 = vld [vmem:[#allocation2_spill] sm:$0xff] }
 0x1f0   : > { %v1777_v35 = vadd.f32 %v1700_v48, %v1625_v4 }
 0x1f1   : > { %v1851_v41 = vpop.f32.mrf.mxu0 }
 0x1f2   : > { %v1926_v8 = vadd.f32 %v1849_v40, %v1777_v35 }
 0x1f4   : > { %v2458_v5 = vpop.eup %2457  ;;  %v1962_v18 = vadd.f32 %v3478_v45, %v1926_v8 }
 0x1f5   : > { %2026 = vst.msk [vmem:[%s3488_s16 + $0x8] sm:$0xff] %vm2024_vm3, %v2458_v5  ;;  %v1550_v38 = vpop.f32.mrf.mxu2  ;;  %v1411_v7 = vpop.f32.mrf.mxu1  ;;  %v3823_v5 = vld [vmem:[#allocation11_spill] sm:$0xff] }
 0x1f6   : > { %2459 = vtanh.f32 %v1962_v18  ;;  %v1626_v31 = vadd.f32 %v1550_v38, %v1484_v49  ;;  %v1702_v26 = vpop.f32.mrf.mxu3  ;;  %v1485_v62 = vadd.f32 %v1411_v7, %v3820_v44  ;;  %v3824_v38 = vld [vmem:[#allocation3_spill] sm:$0xff] }
 0x1f8   : > { %v1778_v34 = vadd.f32 %v1702_v26, %v1626_v31  ;;  %2312 = vmatmul.msk.bf16.gmra.mxu1 %vm468_vm1, %v3217_v36 }
 0x1f9   : > { %v1854_v57 = vpop.f32.mrf.mxu0 }
 0x1fa   : > { %v1927_v15 = vadd.f32 %v1851_v41, %v1778_v34  ;;  %2340 = vmatmul.msk.bf16.gmra.mxu2 %vm468_vm1, %v3221_v32 }
 0x1fb   : > { %2368 = vmatmul.msk.bf16.gmra.mxu3 %vm468_vm1, %v3779_v20 }
 0x1fc   : > { %v2460_v47 = vpop.eup %2459  ;;  %v1963_v22 = vadd.f32 %v3478_v45, %v1927_v15  ;;  %2396 = vmatmul.msk.bf16.gmra.mxu0 %vm468_vm1, %v3821_v27 }
 0x1fd   : > { %2027 = vst.msk [vmem:[%s3488_s16 + $0x10] sm:$0xff] %vm2024_vm3, %v2460_v47  ;;  %v1553_v36 = vpop.f32.mrf.mxu2  ;;  %v1413_v9 = vpop.f32.mrf.mxu1 }
 0x1fe   : > { %2461 = vtanh.f32 %v1963_v22  ;;  %v1627_v39 = vadd.f32 %v1553_v36, %v1485_v62  ;;  %v1705_v3 = vpop.f32.mrf.mxu3  ;;  %v1486_v21 = vadd.f32 %v1413_v9, %v3822_v12  ;;  %v3825_v62 = vld [vmem:[#allocation4_spill] sm:$0xff] }
 0x200   : > { %v1779_v32 = vadd.f32 %v1705_v3, %v1627_v39  ;;  %v1364_v39 = vrot.slane %v3312_v54, 2  ;;  %v1365_v3 = vrot.slane %v3315_v25, 2  ;;  %v3826_v25 = vld [vmem:[#allocation16_spill] sm:$0xff] }
 0x201   : > { %v1856_v40 = vpop.f32.mrf.mxu0 }
 0x202   : > { %v1928_v53 = vadd.f32 %v1854_v57, %v1779_v32 }
 0x204   : > { %v2462_v20 = vpop.eup %2461  ;;  %v1964_v30 = vadd.f32 %v3478_v45, %v1928_v53 }
 0x205   : > { %2028 = vst.msk [vmem:[%s3488_s16 + $0x18] sm:$0xff] %vm2024_vm3, %v2462_v20  ;;  %v1555_v43 = vpop.f32.mrf.mxu2  ;;  %v1416_v17 = vpop.f32.mrf.mxu1  ;;  %v1367_v20 = vrot.slane %v3318_v42, 2 }
 0x206   : > { %2463 = vtanh.f32 %v1964_v30  ;;  %v1628_v4 = vadd.f32 %v1555_v43, %v1486_v21  ;;  %v1707_v48 = vpop.f32.mrf.mxu3  ;;  %v1487_v7 = vadd.f32 %v1416_v17, %v3824_v38  ;;  %v1366_v21 = vsel %vm755_vm2, %v1364_v39, %v1365_v3 }
 0x207   : > { %v1368_v54 = vsel %vm755_vm2, %v1365_v3, %v1367_v20 }
 0x208   : > { %v1780_v35 = vadd.f32 %v1707_v48, %v1628_v4  ;;  %2313 = vmatmul.msk.bf16.gmra.mxu1 %vm468_vm1, %v3821_v27  ;;  %v3547_v43 = vpack.c.bf16 %v1368_v54, %v1366_v21  ;;  %v3827_v4 = vld [vmem:[#allocation7_spill] sm:$0xff]  ;;  %v3828_v48 = vld [vmem:[#allocation12_spill] sm:$0xff]  ;;  %v3832_v54 = vld [vmem:[#allocation13_spill] sm:$0xff] }
 0x209   : > { %v1859_v41 = vpop.f32.mrf.mxu0 }
 0x20a   : > { %v1929_v8 = vadd.f32 %v1856_v40, %v1780_v35  ;;  %2341 = vmatmul.msk.bf16.gmra.mxu2 %vm468_vm1, %v3245_v6 }
 0x20b   : > { %2369 = vmatmul.msk.bf16.gmra.mxu3 %vm468_vm1, %v3823_v5 }
 0x20c   : > { %v2464_v18 = vpop.eup %2463  ;;  %v1965_v49 = vadd.f32 %v3478_v45, %v1929_v8  ;;  %2397 = vmatmul.msk.bf16.gmra.mxu0 %vm468_vm1, %v3266_v13 }
 0x20d   : > { %2029 = vst.msk [vmem:[%s3488_s16 + $0x20] sm:$0xff] %vm2024_vm3, %v2464_v18  ;;  %v1558_v31 = vpop.f32.mrf.mxu2  ;;  %v1418_v26 = vpop.f32.mrf.mxu1 }
 0x20e   : > { %2465 = vtanh.f32 %v1965_v49  ;;  %v1629_v34 = vadd.f32 %v1558_v31, %v1487_v7  ;;  %v1710_v15 = vpop.f32.mrf.mxu3  ;;  %v1488_v27 = vadd.f32 %v1418_v26, %v3825_v62  ;;  %v3829_v31 = vld [vmem:[#allocation8_spill] sm:$0xff]  ;;  %v3830_v62 = vld [vmem:[#allocation21_spill] sm:$0xff] }
 0x210   : > { %v1781_v6 = vadd.f32 %v1710_v15, %v1629_v34 }
 0x211   : > { %v1861_v47 = vpop.f32.mrf.mxu0 }
 0x212   : > { %v1930_v57 = vadd.f32 %v1859_v41, %v1781_v6 }
 0x214   : > { %v2466_v22 = vpop.eup %2465  ;;  %v1966_v44 = vadd.f32 %v3478_v45, %v1930_v57 }
 0x215   : > { %2030 = vst.msk [vmem:[%s3488_s16 + $0x28] sm:$0xff] %vm2024_vm3, %v2466_v22  ;;  %v1560_v36 = vpop.f32.mrf.mxu2  ;;  %v1421_v9 = vpop.f32.mrf.mxu1 }
 0x216   : > { %2467 = vtanh.f32 %v1966_v44  ;;  %v1630_v32 = vadd.f32 %v1560_v36, %v1488_v27  ;;  %v1712_v53 = vpop.f32.mrf.mxu3  ;;  %v1489_v42 = vadd.f32 %v1421_v9, %v3827_v4  ;;  %v3831_v9 = vld [vmem:[#allocation9_spill] sm:$0xff] }
 0x218   : > { %v1782_v40 = vadd.f32 %v1712_v53, %v1630_v32  ;;  %2314 = vmatmul.msk.bf16.gmra.mxu1 %vm468_vm1, %v3266_v13 }
 0x219   : > { %v1864_v12 = vpop.f32.mrf.mxu0 }
 0x21a   : > { %v1931_v30 = vadd.f32 %v1861_v47, %v1782_v40  ;;  %2342 = vmatmul.msk.bf16.gmra.mxu2 %vm468_vm1, %v3270_v33 }
 0x21b   : > { %2370 = vmatmul.msk.bf16.gmra.mxu3 %vm468_vm1, %v3826_v25 }
 0x21c   : > { %v2468_v17 = vpop.eup %2467  ;;  %v1967_v13 = vadd.f32 %v3478_v45, %v1931_v30  ;;  %2398 = vmatmul.msk.bf16.gmra.mxu0 %vm468_vm1, %v3828_v48 }
 0x21d   : > { %2031 = vst.msk [vmem:[%s3488_s16 + $0x30] sm:$0xff] %vm2024_vm3, %v2468_v17  ;;  %v1563_v33 = vpop.f32.mrf.mxu2  ;;  %v1423_v35 = vpop.f32.mrf.mxu1 }
 0x21e   : > { %2469 = vtanh.f32 %v1967_v13  ;;  %v1631_v8 = vadd.f32 %v1563_v33, %v1489_v42  ;;  %v1715_v41 = vpop.f32.mrf.mxu3  ;;  %v1490_v26 = vadd.f32 %v1423_v35, %v3829_v31 }
 0x220   : > { %v1783_v5 = vadd.f32 %v1715_v41, %v1631_v8 }
 0x221   : > { %v1866_v49 = vpop.f32.mrf.mxu0 }
 0x222   : > { %v1932_v18 = vadd.f32 %v1864_v12, %v1783_v5 }
 0x224   : > { %v2470_v38 = vpop.eup %2469  ;;  %v1968_v7 = vadd.f32 %v3478_v45, %v1932_v18 }
 0x225   : > { %2032 = vst.msk [vmem:[%s3488_s16 + $0x38] sm:$0xff] %vm2024_vm3, %v2470_v38  ;;  %v1565_v34 = vpop.f32.mrf.mxu2  ;;  %v1426_v15 = vpop.f32.mrf.mxu1  ;;  %v252_v38 = vld [vmem:[%s2605_s4 + $0x1a0] sm:$0xff] }
 0x226   : > { %2471 = vtanh.f32 %v1968_v7  ;;  %v1632_v6 = vadd.f32 %v1565_v34, %v1490_v26  ;;  %v1717_v57 = vpop.f32.mrf.mxu3  ;;  %v1491_v39 = vadd.f32 %v1426_v15, %v3831_v9  ;;  %v253_v7 = vld [vmem:[%s2605_s4 + $0x1a8] sm:$0x3]  ;;  %v1659_v34 = vrot.slane %v252_v38, 1 }
 0x227   : > { %v1661_v15 = vrot.slane %v253_v7, 1 }
 0x228   : > { %v1784_v47 = vadd.f32 %v1717_v57, %v1632_v6  ;;  %2315 = vmatmul.msk.bf16.gmra.mxu1 %vm468_vm1, %v3828_v48 }
 0x229   : > { %v1869_v44 = vpop.f32.mrf.mxu0  ;;  %v1662_v9 = vsel %vm322_vm0, %v1659_v34, %v1661_v15 }
 0x22a   : > { %v1933_v22 = vadd.f32 %v1866_v49, %v1784_v47  ;;  %2343 = vmatmul.msk.bf16.gmra.mxu2 %vm468_vm1, %v3295_v37  ;;  %v251_v49 = vld [vmem:[%s2605_s4 + $0x198] sm:$0xff]  ;;  %v1808_v47 = vrot.slane %v252_v38, 2 }
 0x22b   : > { %2371 = vmatmul.msk.bf16.gmra.mxu3 %vm468_vm1, %v3830_v62  ;;  %v1658_v26 = vrot.slane %v251_v49, 1  ;;  %v1807_v57 = vrot.slane %v251_v49, 2 }
 0x22c   : > { %v2472_v27 = vpop.eup %2471  ;;  %v1969_v36 = vadd.f32 %v3478_v45, %v1933_v22  ;;  %2399 = vmatmul.msk.bf16.gmra.mxu0 %vm468_vm1, %v3328_v52  ;;  %v1810_v22 = vrot.slane %v253_v7, 2 }
 0x22d   : > { %2033 = vst.msk [vmem:[%s3488_s16 + $0x40] sm:$0xff] %vm2024_vm3, %v2472_v27  ;;  %v1568_v3 = vpop.f32.mrf.mxu2  ;;  %v1428_v32 = vpop.f32.mrf.mxu1 }
 0x22e   : > { %2473 = vtanh.f32 %v1969_v36  ;;  %v1633_v53 = vadd.f32 %v1568_v3, %v1491_v39  ;;  %v1720_v40 = vpop.f32.mrf.mxu3  ;;  %v1492_v25 = vadd.f32 %v1428_v32, %v3832_v54  ;;  %v1660_v36 = vsel %vm322_vm0, %v1658_v26, %v1659_v34 }
 0x22f   : > { %v1513_v32 = vpack.c.bf16 %v252_v38, %v251_v49 }
 0x230   : > { %v1785_v37 = vadd.f32 %v1720_v40, %v1633_v53 }
 0x231   : > { %v1871_v30 = vpop.f32.mrf.mxu0 }
 0x232   : > { %v1934_v20 = vadd.f32 %v1869_v44, %v1785_v37  ;;  %v1809_v37 = vsel %vm755_vm2, %v1807_v57, %v1808_v47 }
 0x234   : > { %v2474_v12 = vpop.eup %2473  ;;  %v1970_v21 = vadd.f32 %v3478_v45, %v1934_v20  ;;  %v1811_v20 = vsel %vm755_vm2, %v1808_v47, %v1810_v22 }
 0x235   : > { %2034 = vst.msk [vmem:[%s3488_s16 + $0x48] sm:$0xff] %vm2024_vm3, %v2474_v12  ;;  %v1570_v17 = vpop.f32.mrf.mxu2  ;;  %v1431_v13 = vpop.f32.mrf.mxu1 }
 0x236   : > { %2475 = vtanh.f32 %v1970_v21  ;;  %v1634_v4 = vadd.f32 %v1570_v17, %v1492_v25  ;;  %v1722_v42 = vpop.f32.mrf.mxu3  ;;  %v1493_v5 = vadd.f32 %v1431_v13, %v3323_v16 }
 0x238   : > { %v1786_v48 = vadd.f32 %v1722_v42, %v1634_v4  ;;  %2316 = vmatmul.msk.bf16.gmra.mxu1 %vm468_vm1, %v3328_v52 }
 0x239   : > { %v1874_v35 = vpop.f32.mrf.mxu0 }
 0x23a   : > { %v1935_v33 = vadd.f32 %v1871_v30, %v1786_v48  ;;  %2344 = vmatmul.msk.bf16.gmra.mxu2 %vm468_vm1, %v3334_v63  ;;  %v1665_v30 = vpack.c.bf16 %v1662_v9, %v1660_v36 }
 0x23b   : > { %2372 = vmatmul.msk.bf16.gmra.mxu3 %vm468_vm1, %v3338_v1 }
 0x23c   : > { %v2476_v8 = vpop.eup %2475  ;;  %v1971_v41 = vadd.f32 %v3478_v45, %v1935_v33  ;;  %2400 = vmatmul.msk.bf16.gmra.mxu0 %vm468_vm1, %v3547_v43 }
 0x23d   : > { %2035 = vst.msk [vmem:[%s3488_s16 + $0x50] sm:$0xff] %vm2024_vm3, %v2476_v8  ;;  %v1573_v18 = vpop.f32.mrf.mxu2  ;;  %v1433_v52 = vpop.f32.mrf.mxu1 }
 0x23e   : > { %2477 = vtanh.f32 %v1971_v41  ;;  %v1635_v63 = vadd.f32 %v1573_v18, %v1493_v5  ;;  %v1725_v31 = vpop.f32.mrf.mxu3  ;;  %v1494_v27 = vadd.f32 %v1433_v52, %v3342_v50  ;;  %v1814_v50 = vpack.c.bf16 %v1811_v20, %v1809_v37 }
 0x240   : > { %v1787_v1 = vadd.f32 %v1725_v31, %v1635_v63 }
 0x241   : > { %v1876_v16 = vpop.f32.mrf.mxu0 }
 0x242   : > { %v1936_v6 = vadd.f32 %v1874_v35, %v1787_v1 }
 0x244   : > { %v2478_v44 = vpop.eup %2477  ;;  %v1972_v62 = vadd.f32 %v3478_v45, %v1936_v6 }
 0x245   : > { %2036 = vst.msk [vmem:[%s3488_s16 + $0x58] sm:$0xff] %vm2024_vm3, %v2478_v44  ;;  %v1575_v39 = vpop.f32.mrf.mxu2  ;;  %v1436_v3 = vpop.f32.mrf.mxu1 }
 0x246   : > { %2479 = vtanh.f32 %v1972_v62  ;;  %v1636_v53 = vadd.f32 %v1575_v39, %v1494_v27  ;;  %v1727_v40 = vpop.f32.mrf.mxu3  ;;  %v1495_v13 = vadd.f32 %v1436_v3, %v3349_v10 }
 0x248   : > { %v1788_v12 = vadd.f32 %v1727_v40, %v1636_v53  ;;  %2317 = vmatmul.msk.bf16.gmra.mxu1 %vm468_vm1, %v3547_v43 }
 0x249   : > { %v1879_v54 = vpop.f32.mrf.mxu0 }
 0x24a   : > { %v1937_v21 = vadd.f32 %v1876_v16, %v1788_v12  ;;  %2345 = vmatmul.msk.bf16.gmra.mxu2 %vm468_vm1, %v1513_v32 }
 0x24b   : > { %2373 = vmatmul.msk.bf16.gmra.mxu3 %vm468_vm1, %v1665_v30 }
 0x24c   : > { %v2480_v25 = vpop.eup %2479  ;;  %v1973_v17 = vadd.f32 %v3478_v45, %v1937_v21  ;;  %2401 = vmatmul.msk.bf16.gmra.mxu0 %vm468_vm1, %v1814_v50 }
 0x24d   : > { %2037 = vst.msk [vmem:[%s3488_s16 + $0x60] sm:$0xff] %vm2024_vm3, %v2480_v25  ;;  %v1578_v4 = vpop.f32.mrf.mxu2  ;;  %v1438_v42 = vpop.f32.mrf.mxu1 }
 0x24e   : > { %2481 = vtanh.f32 %v1973_v17  ;;  %v1637_v43 = vadd.f32 %v1578_v4, %v1495_v13  ;;  %v1730_v48 = vpop.f32.mrf.mxu3  ;;  %v1496_v18 = vadd.f32 %v1438_v42, %v3356_v61 }
 0x250   : > { %v1789_v33 = vadd.f32 %v1730_v48, %v1637_v43 }
 0x251   : > { %v1881_v8 = vpop.f32.mrf.mxu0 }
 0x252   : > { %v1938_v35 = vadd.f32 %v1879_v54, %v1789_v33 }
 0x254   : > { %v2482_v41 = vpop.eup %2481  ;;  %v1974_v5 = vadd.f32 %v3478_v45, %v1938_v35 }
 0x255   : > { %2038 = vst.msk [vmem:[%s3488_s16 + $0x68] sm:$0xff] %vm2024_vm3, %v2482_v41  ;;  %v1580_v10 = vpop.f32.mrf.mxu2  ;;  %v1441_v52 = vpop.f32.mrf.mxu1 }
 0x256   : > { %2483 = vtanh.f32 %v1974_v5  ;;  %v1638_v49 = vadd.f32 %v1580_v10, %v1496_v18  ;;  %v1732_v38 = vpop.f32.mrf.mxu3  ;;  %v1497_v34 = vadd.f32 %v1441_v52, %v3363_v29 }
 0x258   : > { %v1790_v7 = vadd.f32 %v1732_v38, %v1638_v49 }
 0x259   : > { %v1884_v31 = vpop.f32.mrf.mxu0 }
 0x25a   : > { %v1939_v63 = vadd.f32 %v1881_v8, %v1790_v7 }
 0x25c   : > { %v2484_v1 = vpop.eup %2483  ;;  %v1975_v26 = vadd.f32 %v3478_v45, %v1939_v63 }
 0x25d   : > { %2039 = vst.msk [vmem:[%s3488_s16 + $0x70] sm:$0xff] %vm2024_vm3, %v2484_v1  ;;  %v1583_v15 = vpop.f32.mrf.mxu2  ;;  %v1443_v61 = vpop.f32.mrf.mxu1 }
 0x25e   : > { %2485 = vtanh.f32 %v1975_v26  ;;  %v1639_v6 = vadd.f32 %v1583_v15, %v1497_v34  ;;  %v1735_v16 = vpop.f32.mrf.mxu3  ;;  %v1498_v27 = vadd.f32 %v1443_v61, %v3370_v56 }
 0x260   : > { %v1791_v57 = vadd.f32 %v1735_v16, %v1639_v6 }
 0x261   : > { %v1886_v22 = vpop.f32.mrf.mxu0 }
 0x262   : > { %v1940_v47 = vadd.f32 %v1884_v31, %v1791_v57 }
 0x264   : > { %v2486_v44 = vpop.eup %2485  ;;  %v1976_v62 = vadd.f32 %v3478_v45, %v1940_v47 }
 0x265   : > { %2040 = vst.msk [vmem:[%s3488_s16 + $0x78] sm:$0xff] %vm2024_vm3, %v2486_v44  ;;  %v1585_v36 = vpop.f32.mrf.mxu2  ;;  %v1446_v29 = vpop.f32.mrf.mxu1 }
 0x266   : > { %2487 = vtanh.f32 %v1976_v62  ;;  %v1640_v9 = vadd.f32 %v1585_v36, %v1498_v27  ;;  %v1737_v39 = vpop.f32.mrf.mxu3  ;;  %v1499_v20 = vadd.f32 %v1446_v29, %v3377_v51 }
 0x268   : > { %v1792_v3 = vadd.f32 %v1737_v39, %v1640_v9 }
 0x269   : > { %v1889_v53 = vpop.f32.mrf.mxu0 }
 0x26a   : > { %v1941_v32 = vadd.f32 %v1886_v22, %v1792_v3 }
 0x26c   : > { %v2488_v40 = vpop.eup %2487  ;;  %v1977_v37 = vadd.f32 %v3478_v45, %v1941_v32 }
 0x26d   : > { %2041 = vst.msk [vmem:[%s3488_s16 + $0x80] sm:$0xff] %vm2024_vm3, %v2488_v40  ;;  %v1588_v30 = vpop.f32.mrf.mxu2  ;;  %v1448_v56 = vpop.f32.mrf.mxu1 }
 0x26e   : > { %2489 = vtanh.f32 %v1977_v37  ;;  %v1641_v12 = vadd.f32 %v1588_v30, %v1499_v20  ;;  %v1740_v50 = vpop.f32.mrf.mxu3  ;;  %v1500_v4 = vadd.f32 %v1448_v56, %v3384_v24 }
 0x270   : > { %v1793_v21 = vadd.f32 %v1740_v50, %v1641_v12 }
 0x271   : > { %v1891_v25 = vpop.f32.mrf.mxu0 }
 0x272   : > { %v1942_v54 = vadd.f32 %v1889_v53, %v1793_v21 }
 0x274   : > { %v2490_v17 = vpop.eup %2489  ;;  %v1978_v13 = vadd.f32 %v3478_v45, %v1942_v54 }
 0x275   : > { %2042 = vst.msk [vmem:[%s3488_s16 + $0x88] sm:$0xff] %vm2024_vm3, %v2490_v17  ;;  %v1590_v42 = vpop.f32.mrf.mxu2  ;;  %v1451_v51 = vpop.f32.mrf.mxu1 }
 0x276   : > { %2491 = vtanh.f32 %v1978_v13  ;;  %v1642_v43 = vadd.f32 %v1590_v42, %v1500_v4  ;;  %v1742_v48 = vpop.f32.mrf.mxu3  ;;  %v1501_v18 = vadd.f32 %v1451_v51, %v3391_v0 }
 0x278   : > { %v1794_v33 = vadd.f32 %v1742_v48, %v1642_v43 }
 0x279   : > { %v1894_v8 = vpop.f32.mrf.mxu0 }
 0x27a   : > { %v1943_v35 = vadd.f32 %v1891_v25, %v1794_v33 }
 0x27c   : > { %v2492_v41 = vpop.eup %2491  ;;  %v1979_v5 = vadd.f32 %v3478_v45, %v1943_v35 }
 0x27d   : > { %2043 = vst.msk [vmem:[%s3488_s16 + $0x90] sm:$0xff] %vm2024_vm3, %v2492_v41  ;;  %v1593_v10 = vpop.f32.mrf.mxu2  ;;  %v1453_v24 = vpop.f32.mrf.mxu1 }
 0x27e   : > { %2493 = vtanh.f32 %v1979_v5  ;;  %v1643_v52 = vadd.f32 %v1593_v10, %v1501_v18  ;;  %v1745_v49 = vpop.f32.mrf.mxu3  ;;  %v1502_v26 = vadd.f32 %v1453_v24, %v3398_v46 }
 0x280   : > { %v1795_v38 = vadd.f32 %v1745_v49, %v1643_v52 }
 0x281   : > { %v1896_v63 = vpop.f32.mrf.mxu0 }
 0x282   : > { %v1944_v7 = vadd.f32 %v1894_v8, %v1795_v38 }
 0x284   : > { %v2494_v31 = vpop.eup %2493  ;;  %v1980_v1 = vadd.f32 %v3478_v45, %v1944_v7 }
 0x285   : > { %2044 = vst.msk [vmem:[%s3488_s16 + $0x98] sm:$0xff] %vm2024_vm3, %v2494_v31  ;;  %v1595_v34 = vpop.f32.mrf.mxu2  ;;  %v1456_v0 = vpop.f32.mrf.mxu1 }
 0x286   : > { %2495 = vtanh.f32 %v1980_v1  ;;  %v1644_v15 = vadd.f32 %v1595_v34, %v1502_v26  ;;  %v1747_v61 = vpop.f32.mrf.mxu3  ;;  %v1503_v44 = vadd.f32 %v1456_v0, %v3405_v59 }
 0x288   : > { %v1796_v6 = vadd.f32 %v1747_v61, %v1644_v15 }
 0x289   : > { %v1899_v57 = vpop.f32.mrf.mxu0 }
 0x28a   : > { %v1945_v16 = vadd.f32 %v1896_v63, %v1796_v6 }
 0x28c   : > { %v2496_v47 = vpop.eup %2495  ;;  %v1981_v22 = vadd.f32 %v3478_v45, %v1945_v16 }
 0x28d   : > { %2045 = vst.msk [vmem:[%s3488_s16 + $0xa0] sm:$0xff] %vm2024_vm3, %v2496_v47  ;;  %v1598_v62 = vpop.f32.mrf.mxu2  ;;  %v1458_v46 = vpop.f32.mrf.mxu1 }
 0x28e   : > { %2497 = vtanh.f32 %v1981_v22  ;;  %v1645_v27 = vadd.f32 %v1598_v62, %v1503_v44  ;;  %v1750_v36 = vpop.f32.mrf.mxu3  ;;  %v1504_v53 = vadd.f32 %v1458_v46, %v3412_v19 }
 0x290   : > { %v1797_v29 = vadd.f32 %v1750_v36, %v1645_v27 }
 0x291   : > { %v1901_v39 = vpop.f32.mrf.mxu0 }
 0x292   : > { %v1946_v9 = vadd.f32 %v1899_v57, %v1797_v29 }
 0x294   : > { %v2498_v3 = vpop.eup %2497  ;;  %v1982_v32 = vadd.f32 %v3478_v45, %v1946_v9 }
 0x295   : > { %2046 = vst.msk [vmem:[%s3488_s16 + $0xa8] sm:$0xff] %vm2024_vm3, %v2498_v3  ;;  %v1600_v40 = vpop.f32.mrf.mxu2  ;;  %v1461_v59 = vpop.f32.mrf.mxu1 }
 0x296   : > { %2499 = vtanh.f32 %v1982_v32  ;;  %v1646_v37 = vadd.f32 %v1600_v40, %v1504_v53  ;;  %v1752_v20 = vpop.f32.mrf.mxu3  ;;  %v1505_v54 = vadd.f32 %v1461_v59, %v3419_v55 }
 0x298   : > { %v1798_v30 = vadd.f32 %v1752_v20, %v1646_v37 }
 0x299   : > { %v1904_v12 = vpop.f32.mrf.mxu0 }
 0x29a   : > { %v1947_v56 = vadd.f32 %v1901_v39, %v1798_v30 }
 0x29c   : > { %v2500_v50 = vpop.eup %2499  ;;  %v1983_v21 = vadd.f32 %v3478_v45, %v1947_v56 }
 0x29d   : > { %2047 = vst.msk [vmem:[%s3488_s16 + $0xb0] sm:$0xff] %vm2024_vm3, %v2500_v50  ;;  %v1603_v25 = vpop.f32.mrf.mxu2  ;;  %v1463_v19 = vpop.f32.mrf.mxu1 }
 0x29e   : > { %2501 = vtanh.f32 %v1983_v21  ;;  %v1647_v17 = vadd.f32 %v1603_v25, %v1505_v54  ;;  %v1755_v13 = vpop.f32.mrf.mxu3  ;;  %v1506_v33 = vadd.f32 %v1463_v19, %v3426_v28 }
 0x2a0   : > { %v1799_v4 = vadd.f32 %v1755_v13, %v1647_v17 }
 0x2a1   : > { %v1906_v51 = vpop.f32.mrf.mxu0 }
 0x2a2   : > { %v1948_v42 = vadd.f32 %v1904_v12, %v1799_v4 }
 0x2a4   : > { %v2502_v43 = vpop.eup %2501  ;;  %v1984_v48 = vadd.f32 %v3478_v45, %v1948_v42 }
 0x2a5   : > { %2048 = vst.msk [vmem:[%s3488_s16 + $0xb8] sm:$0xff] %vm2024_vm3, %v2502_v43  ;;  %v1605_v35 = vpop.f32.mrf.mxu2  ;;  %v1466_v55 = vpop.f32.mrf.mxu1 }
 0x2a6   : > { %2503 = vtanh.f32 %v1984_v48  ;;  %v1648_v8 = vadd.f32 %v1605_v35, %v1506_v33  ;;  %v1757_v41 = vpop.f32.mrf.mxu3  ;;  %v1507_v49 = vadd.f32 %v1466_v55, %v3433_v14 }
 0x2a8   : > { %v1800_v5 = vadd.f32 %v1757_v41, %v1648_v8 }
 0x2a9   : > { %v1909_v10 = vpop.f32.mrf.mxu0 }
 0x2aa   : > { %v1949_v18 = vadd.f32 %v1906_v51, %v1800_v5 }
 0x2ac   : > { %v2504_v24 = vpop.eup %2503  ;;  %v1985_v52 = vadd.f32 %v3478_v45, %v1949_v18 }
 0x2ad   : > { %2049 = vst.msk [vmem:[%s3488_s16 + $0xc0] sm:$0xff] %vm2024_vm3, %v2504_v24  ;;  %v1608_v38 = vpop.f32.mrf.mxu2  ;;  %v1468_v28 = vpop.f32.mrf.mxu1 }
 0x2ae   : > { %2505 = vtanh.f32 %v1985_v52  ;;  %v1649_v7 = vadd.f32 %v1608_v38, %v1507_v49  ;;  %v1760_v63 = vpop.f32.mrf.mxu3  ;;  %v1508_v15 = vadd.f32 %v1468_v28, %v3440_v58 }
 0x2b0   : > { %v1801_v31 = vadd.f32 %v1760_v63, %v1649_v7 }
 0x2b1   : > { %v1911_v26 = vpop.f32.mrf.mxu0 }
 0x2b2   : > { %v1950_v1 = vadd.f32 %v1909_v10, %v1801_v31 }
 0x2b4   : > { %v2506_v34 = vpop.eup %2505  ;;  %v1986_v0 = vadd.f32 %v3478_v45, %v1950_v1 }
 0x2b5   : > { %2050 = vst.msk [vmem:[%s3488_s16 + $0xc8] sm:$0xff] %vm2024_vm3, %v2506_v34  ;;  %v1610_v61 = vpop.f32.mrf.mxu2  ;;  %v1471_v14 = vpop.f32.mrf.mxu1 }
 0x2b6   : > { %2507 = vtanh.f32 %v1986_v0  ;;  %v1650_v6 = vadd.f32 %v1610_v61, %v1508_v15  ;;  %v1762_v16 = vpop.f32.mrf.mxu3  ;;  %v1509_v46 = vadd.f32 %v1471_v14, %v3447_v23 }
 0x2b8   : > { %v1802_v57 = vadd.f32 %v1762_v16, %v1650_v6 }
 0x2b9   : > { %v1914_v22 = vpop.f32.mrf.mxu0 }
 0x2ba   : > { %v1951_v47 = vadd.f32 %v1911_v26, %v1802_v57 }
 0x2bc   : > { %v2508_v44 = vpop.eup %2507  ;;  %v1987_v62 = vadd.f32 %v3478_v45, %v1951_v47 }
 0x2bd   : > { %2051 = vst.msk [vmem:[%s3488_s16 + $0xd0] sm:$0xff] %vm2024_vm3, %v2508_v44  ;;  %v1613_v27 = vpop.f32.mrf.mxu2  ;;  %v1473_v58 = vpop.f32.mrf.mxu1 }
 0x2be   : > { %2509 = vtanh.f32 %v1987_v62  ;;  %v1651_v36 = vadd.f32 %v1613_v27, %v1509_v46  ;;  %v1765_v29 = vpop.f32.mrf.mxu3  ;;  %v1510_v53 = vadd.f32 %v1473_v58, %v3454_v60 }
 0x2c0   : > { %v1803_v9 = vadd.f32 %v1765_v29, %v1651_v36 }
 0x2c1   : > { %v1916_v40 = vpop.f32.mrf.mxu0 }
 0x2c2   : > { %v1952_v39 = vadd.f32 %v1914_v22, %v1803_v9 }
 0x2c4   : > { %v2510_v3 = vpop.eup %2509  ;;  %v1988_v32 = vadd.f32 %v3478_v45, %v1952_v39 }
 0x2c5   : > { %2052 = vst.msk [vmem:[%s3488_s16 + $0xd8] sm:$0xff] %vm2024_vm3, %v2510_v3  ;;  %v1615_v59 = vpop.f32.mrf.mxu2  ;;  %v1476_v20 = vpop.f32.mrf.mxu1 }
 0x2c6   : > { %2511 = vtanh.f32 %v1988_v32  ;;  %v1652_v23 = vadd.f32 %v1615_v59, %v1510_v53  ;;  %v1767_v37 = vpop.f32.mrf.mxu3  ;;  %v1511_v21 = vadd.f32 %v1476_v20, %v3461_v11 }
 0x2c8   : > { %v1804_v30 = vadd.f32 %v1767_v37, %v1652_v23 }
 0x2c9   : > { %v1919_v19 = vpop.f32.mrf.mxu0 }
 0x2ca   : > { %v1953_v56 = vadd.f32 %v1916_v40, %v1804_v30 }
 0x2cc   : > { %v2512_v12 = vpop.eup %2511  ;;  %v1989_v50 = vadd.f32 %v3478_v45, %v1953_v56 }
 0x2cd   : > { %2053 = vst.msk [vmem:[%s3488_s16 + $0xe0] sm:$0xff] %vm2024_vm3, %v2512_v12  ;;  %v1618_v54 = vpop.f32.mrf.mxu2  ;;  %v1478_v13 = vpop.f32.mrf.mxu1 }
 0x2ce   : > { %2513 = vtanh.f32 %v1989_v50  ;;  %v1653_v60 = vadd.f32 %v1618_v54, %v1511_v21  ;;  %v1770_v25 = vpop.f32.mrf.mxu3  ;;  %v1512_v43 = vadd.f32 %v1478_v13, %v3468_v2 }
 0x2d0   : > { %v1805_v17 = vadd.f32 %v1770_v25, %v1653_v60 }
 0x2d1   : > { %v1921_v55 = vpop.f32.mrf.mxu0 }
 0x2d2   : > { %v1954_v4 = vadd.f32 %v1919_v19, %v1805_v17 }
 0x2d4   : > { %v2514_v42 = vpop.eup %2513  ;;  %v1990_v51 = vadd.f32 %v3478_v45, %v1954_v4 }
 0x2d5   : > { %2054 = vst.msk [vmem:[%s3488_s16 + $0xe8] sm:$0xff] %vm2024_vm3, %v2514_v42  ;;  %v1620_v11 = vpop.f32.mrf.mxu2 }
 0x2d6   : > { %2515 = vtanh.f32 %v1990_v51  ;;  %v1654_v48 = vadd.f32 %v1620_v11, %v1512_v43  ;;  %v1772_v33 = vpop.f32.mrf.mxu3 }
 0x2d8   : > { %v1806_v35 = vadd.f32 %v1772_v33, %v1654_v48 }
 0x2da   : > { %v1955_v8 = vadd.f32 %v1921_v55, %v1806_v35 }
 0x2dc   : > { %v2516_v41 = vpop.eup %2515  ;;  %v1991_v5 = vadd.f32 %v3478_v45, %v1955_v8 }
 0x2dd   : > { %2055 = vst.msk [vmem:[%s3488_s16 + $0xf0] sm:$0xff] %vm2024_vm3, %v2516_v41 }
 0x2de   : > { %2517 = vtanh.f32 %v1991_v5 }
 0x2e4   : > { %v2518_v18 = vpop.eup %2517 }
 0x2e5   : > { %2056 = vst.msk [vmem:[%s3488_s16 + $0xf8] sm:$0xff] %vm2024_vm3, %v2518_v18 }
 0x2e6 PF: > { %s13_s14 = sadd.s32 1, %s2541_s14   ;;  %s3833_s12 = smov %s2537_s13 }
 0x2e7   : > { %p10_p5 = scmp.ge.s32.totalorder %s13_s14, 4   ;;  %s3834_s13 = smov %s3836_s15 }
 0x2e9   :  { %12 = sbr.rel (!%p10_p5) target bundleno = 2 (0x2), region = 71 }

</bundles_post_ra>
